<compile_context>
chip_gen: v5e
topology: v5e:2x2
jax: 0.10.0
libtpu: 0.0.40
codegen_flags: <defaults>
</compile_context>

<pallas_src>
import math
import functools

import jax
import jax.numpy as jnp
from jax.experimental import pallas as pl
from jax.experimental.pallas import tpu as pltpu


# ----------------------------------------------------------------- in-kernel building blocks

def _layernorm(x, w, b, eps=1e-5):
    mu = jnp.mean(x, axis=-1, keepdims=True)
    var = jnp.mean(jnp.square(x - mu), axis=-1, keepdims=True)
    return (x - mu) * jax.lax.rsqrt(var + eps) * w + b


# ----------------------------------------------------------------- fused whole-model kernel (one sample / step)

def _custom_transformer_kernel(
        x_ref,
        c1w_ref, bn1s_ref, bn1b_ref, c2w_ref,
        wqkv_ref, bqkv_ref, wo_ref, bo_ref, ln1w_ref, ln1b_ref,
        w1_ref, b1_ref, w2_ref, b2_ref, ln2w_ref, ln2b_ref,
        clf1w_ref, bn2s_ref, bn2b_ref, clf2w_ref, clf2b_ref,
        o_ref,
        *, n_head, n_enc, n_w, k):
    x = x_ref[...].astype(jnp.float32)                     # (W, C_in)  — one sample per grid step
    pad = (k - 1) // 2

    # Hoisted conv machinery (built ONCE, shared by all 4 convs): banded shift matrices
    # S_d[i, j] = (j == i + d)  =>  (S_d @ z)[i] = z[i + d], zero outside the sample,
    # so 'same' zero padding is free and the shift runs on the otherwise-idle MXU
    # (no halo scratch, no misaligned sublane copies, no per-tap where/selects).
    row_w = jax.lax.broadcasted_iota(jnp.int32, (n_w, n_w), 0)
    col_w = jax.lax.broadcasted_iota(jnp.int32, (n_w, n_w), 1)
    shift_mats = tuple((col_w == row_w + (t - pad)).astype(jnp.float32) for t in range(k))

    def conv1d_same(a, w_ref):
        """'same' Conv1d(k, stride=1) on a (W, Cin) activation: per-tap matmul + MXU shift-realign."""
        a_bf = a.astype(jnp.bfloat16)
        out = jnp.dot(a_bf, w_ref[pad], preferred_element_type=jnp.float32)      # centre tap (d = 0)
        for t in range(k):
            if t == pad:
                continue
            z = jnp.dot(a_bf, w_ref[t], preferred_element_type=jnp.float32)      # (W, Cout)
            out = out + jnp.dot(shift_mats[t], z, preferred_element_type=jnp.float32)
        return out

    # ---- self.first : Conv1d(k5, no bias) + BN(folded) + ReLU + Conv1d(k5, no bias)
    h = conv1d_same(x, c1w_ref)
    h = jnp.maximum(h * bn1s_ref[...] + bn1b_ref[...], 0.0)
    h = conv1d_same(h, c2w_ref)

    # NOTE: self.pe (PositionalEncoder) is never applied in the reference forward(); omitted.

    H = h.shape[-1]
    dh = H // n_head
    scale = 1.0 / math.sqrt(dh)

    # ---- TransformerEncoder stack (post-norm, ReLU FF; dropout = identity in eval mode).
    # Per-sample attention: (W, W) scores per head — no block-diagonal mask needed.
    # TODO(synk): for large n_enc/H/ff move the layer loop onto an "arbitrary" grid axis so the stacked
    #             encoder weights are streamed layer-by-layer instead of being fully VMEM resident.
    for l in range(n_enc):
        qkv = jnp.dot(h.astype(jnp.bfloat16), wqkv_ref[l],
                      preferred_element_type=jnp.float32) + bqkv_ref[l]          # (W, 3H)
        q, kk, v = qkv[:, :H], qkv[:, H:2 * H], qkv[:, 2 * H:]
        wo_l = wo_ref[l]                                                         # (n_head, dh, H) bf16
        attn = jnp.zeros((n_w, H), jnp.float32)
        for hh in range(n_head):                         # output projection fused per head (no attn scratch)
            sl = slice(hh * dh, (hh + 1) * dh)
            s = jax.lax.dot_general(q[:, sl] * scale, kk[:, sl],
                                    (((1,), (1,)), ((), ())),
                                    preferred_element_type=jnp.float32)          # (W, W) == q @ k.T
            s = s - jnp.max(s, axis=-1, keepdims=True)
            p = jnp.exp(s)
            p = p * pl.reciprocal(jnp.sum(p, axis=-1, keepdims=True), approx=True)
            oh = jnp.dot(p, v[:, sl], preferred_element_type=jnp.float32)        # (W, dh)
            attn = attn + jnp.dot(oh.astype(jnp.bfloat16), wo_l[hh],
                                  preferred_element_type=jnp.float32)
        attn = attn + bo_ref[l]
        y = _layernorm(h + attn, ln1w_ref[l], ln1b_ref[l])
        ff = jnp.maximum(
            jnp.dot(y.astype(jnp.bfloat16), w1_ref[l],
                    preferred_element_type=jnp.float32) + b1_ref[l], 0.0)
        ff = jnp.dot(ff.astype(jnp.bfloat16), w2_ref[l],
                     preferred_element_type=jnp.float32) + b2_ref[l]
        h = _layernorm(y + ff, ln2w_ref[l], ln2b_ref[l])

    # ---- self.clfconv : Conv1d(k5, no bias) + BN(folded) + Tanh + Conv1d(k5, bias) ; final sigmoid.
    # clf2 weights/bias are lane-padded to 128 in the wrapper so the final store is lane-dense (no vst.msk).
    y = conv1d_same(h, clf1w_ref)
    y = jnp.tanh(y * bn2s_ref[...] + bn2b_ref[...])
    y = conv1d_same(y, clf2w_ref) + clf2b_ref[...]
    o_ref[...] = jax.nn.sigmoid(y).astype(o_ref.dtype)


# ----------------------------------------------------------------- wrapper

def custom_transformer_forward(signal_ncw, params, *, n_head):
    """signal_ncw: (N, C, W) as in the PyTorch module. Returns {'prediction': (N, n_outputs, W)}."""
    N, C, W = signal_ncw.shape
    assert W % 8 == 0, "per-sample block needs W % 8 == 0 (sublane tiling)"
    H = params["wo"].shape[-1]
    n_out = params["clf2_w"].shape[-1]
    n_enc = params["wqkv"].shape[0]
    k = params["conv1_w"].shape[0]
    LANE = 128
    n_out_pad = ((n_out + LANE - 1) // LANE) * LANE

    # channels-last; one sample per grid step
    x = jnp.transpose(signal_ncw, (0, 2, 1)).reshape(N * W, C).astype(jnp.float32)

    # lane-dense output: pad the last conv's output channels up to a full 128-lane slab
    clf2_w = jnp.pad(params["clf2_w"], ((0, 0), (0, 0), (0, n_out_pad - n_out)))
    clf2_b = jnp.pad(params["clf2_b"], ((0, 0), (0, n_out_pad - n_out)))

    weights = (params["conv1_w"], params["bn1_scale"], params["bn1_shift"], params["conv2_w"],
               params["wqkv"], params["bqkv"], params["wo"], params["bo"],
               params["ln1_w"], params["ln1_b"], params["w1"], params["b1"],
               params["w2"], params["b2"], params["ln2_w"], params["ln2_b"],
               params["clf1_w"], params["bn2_scale"], params["bn2_shift"],
               clf2_w, clf2_b)

    def _resident_spec(a):
        # whole (small) weight kept VMEM-resident; block index is constant across the grid,
        # so it is DMA'd once and revisited, not re-fetched per step
        zero = (0,) * a.ndim
        return pl.BlockSpec(a.shape, lambda n, _z=zero: _z)

    in_specs = [pl.BlockSpec((W, C), lambda n: (n, 0))] + [_resident_spec(a) for a in weights]
    out_spec = pl.BlockSpec((W, n_out_pad), lambda n: (n, 0))

    # explicit scoped-VMEM budget: resident weights + per-sample working set + double-buffered I/O blocks
    io_bytes = x.size * x.dtype.itemsize + N * W * n_out_pad * 4
    weight_bytes = sum(int(a.size) * a.dtype.itemsize for a in weights)
    act_bytes = 8 * W * max(1024, 3 * H, n_out_pad) * 4
    vmem_limit = int(min(64 * 2 ** 20, max(32 * 2 ** 20, 4 * (io_bytes + weight_bytes + act_bytes))))

    kernel = functools.partial(_custom_transformer_kernel,
                               n_head=n_head, n_enc=n_enc, n_w=W, k=k)
    out_flat = pl.pallas_call(
        kernel,
        out_shape=jax.ShapeDtypeStruct((N * W, n_out_pad), jnp.float32),
        grid_spec=pltpu.PrefetchScalarGridSpec(
            num_scalar_prefetch=0,
            grid=(N,),
            in_specs=in_specs,
            out_specs=out_spec),
        compiler_params=pltpu.CompilerParams(
            dimension_semantics=("parallel",),      # samples independent -> sharded over TCs on v7x
            vmem_limit_bytes=vmem_limit),
    )(x, *weights)

    pred = jnp.transpose(out_flat[:, :n_out].reshape(N, W, n_out), (0, 2, 1))    # (N, n_outputs, W)
    return {"prediction": pred}


# ----------------------------------------------------------------- parameter init (deterministic, synthetic)

def init_params(key, C, H, n_out, n_enc, n_head, ff=1024, k=5):
    ks = iter(jax.random.split(key, 256))

    def nrm(shape, s=0.05):
        return s * jax.random.normal(next(ks), shape, jnp.float32)

    eps = 1e-5
    Hh = H // 2
    dh = H // n_head
    p = {}

    # first: Conv1d(C->H/2, k5, no bias) + BN(H/2) + ReLU + Conv1d(H/2->H, k5, no bias); conv weights (k,Cin,Cout)
    p["conv1_w"] = nrm((k, C, Hh), 0.1).astype(jnp.bfloat16)
    g1, bb1 = 1.0 + nrm((Hh,)), nrm((Hh,))
    rm1, rv1 = jnp.zeros((Hh,), jnp.float32), jnp.ones((Hh,), jnp.float32)
    s1 = g1 / jnp.sqrt(rv1 + eps)
    p["bn1_scale"] = s1.reshape(1, Hh)
    p["bn1_shift"] = (bb1 - rm1 * s1).reshape(1, Hh)
    p["conv2_w"] = nrm((k, Hh, H), 0.1).astype(jnp.bfloat16)

    # encoder layers, stacked along a leading layer axis (wo stored head-major)
    wqkv, bqkv, wo, bo = [], [], [], []
    ln1w, ln1b, w1, b1f, w2, b2f, ln2w, ln2b = [], [], [], [], [], [], [], []
    for _ in range(n_enc):
        wqkv.append(nrm((H, 3 * H))); bqkv.append(nrm((1, 3 * H)))
        wo.append(nrm((H, H)).reshape(n_head, dh, H)); bo.append(nrm((1, H)))
        ln1w.append(1.0 + nrm((1, H))); ln1b.append(nrm((1, H)))
        w1.append(nrm((H, ff)));      b1f.append(nrm((1, ff)))
        w2.append(nrm((ff, H)));      b2f.append(nrm((1, H)))
        ln2w.append(1.0 + nrm((1, H))); ln2b.append(nrm((1, H)))
    p["wqkv"] = jnp.stack(wqkv).astype(jnp.bfloat16)   # (L, H, 3H)
    p["bqkv"] = jnp.stack(bqkv)                        # (L, 1, 3H)
    p["wo"] = jnp.stack(wo).astype(jnp.bfloat16)       # (L, n_head, dh, H)
    p["bo"] = jnp.stack(bo)
    p["ln1_w"] = jnp.stack(ln1w); p["ln1_b"] = jnp.stack(ln1b)
    p["w1"] = jnp.stack(w1).astype(jnp.bfloat16)       # (L, H, ff)
    p["b1"] = jnp.stack(b1f)
    p["w2"] = jnp.stack(w2).astype(jnp.bfloat16)       # (L, ff, H)
    p["b2"] = jnp.stack(b2f)
    p["ln2_w"] = jnp.stack(ln2w); p["ln2_b"] = jnp.stack(ln2b)

    # clfconv: Conv1d(H->H, k5, no bias) + BN(H) + Tanh + Conv1d(H->n_out, k5, bias); then sigmoid
    p["clf1_w"] = nrm((k, H, H), 0.1).astype(jnp.bfloat16)
    g2, bb2 = 1.0 + nrm((H,)), nrm((H,))
    rm2, rv2 = jnp.zeros((H,), jnp.float32), jnp.ones((H,), jnp.float32)
    s2 = g2 / jnp.sqrt(rv2 + eps)
    p["bn2_scale"] = s2.reshape(1, H)
    p["bn2_shift"] = (bb2 - rm2 * s2).reshape(1, H)    # full BN fold incl. running-mean term
    p["clf2_w"] = nrm((k, H, n_out), 0.1).astype(jnp.bfloat16)
    p["clf2_b"] = nrm((n_out,)).reshape(1, n_out)
    return p


# ----------------------------------------------------------------- main

if __name__ == "__main__":
    key = jax.random.PRNGKey(0)
    N, C, W = 2, 4, 16                 # batch, input_feature_size, signal length
    H, n_head, n_enc, n_out = 32, 4, 2, 3

    params = init_params(key, C, H, n_out, n_enc, n_head)
    signal = jax.random.normal(jax.random.fold_in(key, 999), (N, C, W), jnp.float32)

    fwd = jax.jit(functools.partial(custom_transformer_forward, n_head=n_head))
    out = fwd(signal, params)
    pred = jax.block_until_ready(out["prediction"])

    assert pred.shape == (N, n_out, W), pred.shape
    assert bool(jnp.all(jnp.isfinite(pred)))
    assert bool(jnp.all((pred >= 0.0) & (pred <= 1.0)))   # sigmoid output range
    print("KERNEL_OK")
</pallas_src>

<mosaic_0001>
module attributes {stable_mosaic.version = 11 : i64} {
  func.func @_custom_transformer_kernel(%arg0: i32, %arg1: memref<16x4xf32, #tpu.memory_space<vmem>>, %arg2: memref<5x4x16xbf16, #tpu.memory_space<vmem>>, %arg3: memref<1x16xf32, #tpu.memory_space<vmem>>, %arg4: memref<1x16xf32, #tpu.memory_space<vmem>>, %arg5: memref<5x16x32xbf16, #tpu.memory_space<vmem>>, %arg6: memref<2x32x96xbf16, #tpu.memory_space<vmem>>, %arg7: memref<2x1x96xf32, #tpu.memory_space<vmem>>, %arg8: memref<2x4x8x32xbf16, #tpu.memory_space<vmem>>, %arg9: memref<2x1x32xf32, #tpu.memory_space<vmem>>, %arg10: memref<2x1x32xf32, #tpu.memory_space<vmem>>, %arg11: memref<2x1x32xf32, #tpu.memory_space<vmem>>, %arg12: memref<2x32x1024xbf16, #tpu.memory_space<vmem>>, %arg13: memref<2x1x1024xf32, #tpu.memory_space<vmem>>, %arg14: memref<2x1024x32xbf16, #tpu.memory_space<vmem>>, %arg15: memref<2x1x32xf32, #tpu.memory_space<vmem>>, %arg16: memref<2x1x32xf32, #tpu.memory_space<vmem>>, %arg17: memref<2x1x32xf32, #tpu.memory_space<vmem>>, %arg18: memref<5x32x32xbf16, #tpu.memory_space<vmem>>, %arg19: memref<1x32xf32, #tpu.memory_space<vmem>>, %arg20: memref<1x32xf32, #tpu.memory_space<vmem>>, %arg21: memref<5x32x128xbf16, #tpu.memory_space<vmem>>, %arg22: memref<1x128xf32, #tpu.memory_space<vmem>>, %arg23: memref<16x128xf32, #tpu.memory_space<vmem>>) attributes {dimension_semantics = [#tpu.dimension_semantics<parallel>], iteration_bounds = array<i64: 2>, scalar_prefetch = 0 : i64, scratch_operands = 0 : i64, tpu.core_type = #tpu.core_type<tc>, window_params = [{transform_indices = @transform_0, window_bounds = array<i64: 16, 4>}, {pipeline_mode = #tpu.pipeline_mode<synchronous>, transform_indices = @transform_1, window_bounds = array<i64: 5, 4, 16>}, {pipeline_mode = #tpu.pipeline_mode<synchronous>, transform_indices = @transform_2, window_bounds = array<i64: 1, 16>}, {pipeline_mode = #tpu.pipeline_mode<synchronous>, transform_indices = @transform_3, window_bounds = array<i64: 1, 16>}, {pipeline_mode = #tpu.pipeline_mode<synchronous>, transform_indices = @transform_4, window_bounds = array<i64: 5, 16, 32>}, {pipeline_mode = #tpu.pipeline_mode<synchronous>, transform_indices = @transform_5, window_bounds = array<i64: 2, 32, 96>}, {pipeline_mode = #tpu.pipeline_mode<synchronous>, transform_indices = @transform_6, window_bounds = array<i64: 2, 1, 96>}, {pipeline_mode = #tpu.pipeline_mode<synchronous>, transform_indices = @transform_7, window_bounds = array<i64: 2, 4, 8, 32>}, {pipeline_mode = #tpu.pipeline_mode<synchronous>, transform_indices = @transform_8, window_bounds = array<i64: 2, 1, 32>}, {pipeline_mode = #tpu.pipeline_mode<synchronous>, transform_indices = @transform_9, window_bounds = array<i64: 2, 1, 32>}, {pipeline_mode = #tpu.pipeline_mode<synchronous>, transform_indices = @transform_10, window_bounds = array<i64: 2, 1, 32>}, {pipeline_mode = #tpu.pipeline_mode<synchronous>, transform_indices = @transform_11, window_bounds = array<i64: 2, 32, 1024>}, {pipeline_mode = #tpu.pipeline_mode<synchronous>, transform_indices = @transform_12, window_bounds = array<i64: 2, 1, 1024>}, {pipeline_mode = #tpu.pipeline_mode<synchronous>, transform_indices = @transform_13, window_bounds = array<i64: 2, 1024, 32>}, {pipeline_mode = #tpu.pipeline_mode<synchronous>, transform_indices = @transform_14, window_bounds = array<i64: 2, 1, 32>}, {pipeline_mode = #tpu.pipeline_mode<synchronous>, transform_indices = @transform_15, window_bounds = array<i64: 2, 1, 32>}, {pipeline_mode = #tpu.pipeline_mode<synchronous>, transform_indices = @transform_16, window_bounds = array<i64: 2, 1, 32>}, {pipeline_mode = #tpu.pipeline_mode<synchronous>, transform_indices = @transform_17, window_bounds = array<i64: 5, 32, 32>}, {pipeline_mode = #tpu.pipeline_mode<synchronous>, transform_indices = @transform_18, window_bounds = array<i64: 1, 32>}, {pipeline_mode = #tpu.pipeline_mode<synchronous>, transform_indices = @transform_19, window_bounds = array<i64: 1, 32>}, {pipeline_mode = #tpu.pipeline_mode<synchronous>, transform_indices = @transform_20, window_bounds = array<i64: 5, 32, 128>}, {pipeline_mode = #tpu.pipeline_mode<synchronous>, transform_indices = @transform_21, window_bounds = array<i64: 1, 128>}, {transform_indices = @transform_22, window_bounds = array<i64: 16, 128>}]} {
    %c0 = arith.constant 0 : index
    %c0_0 = arith.constant 0 : index
    %0 = vector.load %arg1[%c0, %c0_0] : memref<16x4xf32, #tpu.memory_space<vmem>>, vector<16x4xf32>
    %1 = tpu.iota {dimensions = array<i32: 0>} : vector<16x16xi32>
    %2 = tpu.iota {dimensions = array<i32: 1>} : vector<16x16xi32>
    %c-2_i32 = arith.constant -2 : i32
    %3 = vector.broadcast %c-2_i32 : i32 to vector<16x16xi32>
    %4 = arith.addi %1, %3 : vector<16x16xi32>
    %5 = arith.cmpi eq, %2, %4 : vector<16x16xi32>
    %6 = arith.extui %5 : vector<16x16xi1> to vector<16x16xi32>
    %7 = arith.sitofp %6 : vector<16x16xi32> to vector<16x16xf32>
    %c-1_i32 = arith.constant -1 : i32
    %8 = vector.broadcast %c-1_i32 : i32 to vector<16x16xi32>
    %9 = arith.addi %1, %8 : vector<16x16xi32>
    %10 = arith.cmpi eq, %2, %9 : vector<16x16xi32>
    %11 = arith.extui %10 : vector<16x16xi1> to vector<16x16xi32>
    %12 = arith.sitofp %11 : vector<16x16xi32> to vector<16x16xf32>
    %c1_i32 = arith.constant 1 : i32
    %13 = vector.broadcast %c1_i32 : i32 to vector<16x16xi32>
    %14 = arith.addi %1, %13 : vector<16x16xi32>
    %15 = arith.cmpi eq, %2, %14 : vector<16x16xi32>
    %16 = arith.extui %15 : vector<16x16xi1> to vector<16x16xi32>
    %17 = arith.sitofp %16 : vector<16x16xi32> to vector<16x16xf32>
    %c2_i32 = arith.constant 2 : i32
    %18 = vector.broadcast %c2_i32 : i32 to vector<16x16xi32>
    %19 = arith.addi %1, %18 : vector<16x16xi32>
    %20 = arith.cmpi eq, %2, %19 : vector<16x16xi32>
    %21 = arith.extui %20 : vector<16x16xi1> to vector<16x16xi32>
    %22 = arith.sitofp %21 : vector<16x16xi32> to vector<16x16xf32>
    %23 = arith.truncf %0 : vector<16x4xf32> to vector<16x4xbf16>
    %c2 = arith.constant 2 : index
    %c0_1 = arith.constant 0 : index
    %c0_2 = arith.constant 0 : index
    %24 = vector.load %arg2[%c2, %c0_1, %c0_2] : memref<5x4x16xbf16, #tpu.memory_space<vmem>>, vector<1x4x16xbf16>
    %25 = vector.shape_cast %24 : vector<1x4x16xbf16> to vector<4x16xbf16>
    %cst = arith.constant dense<0.000000e+00> : vector<16x16xf32>
    %26 = tpu.matmul %23, %25, %cst {dimension_numbers = #tpu.dot_dimension_numbers<[1], [0], [0], [1], [0, 0, 1, 1], [], []>} : vector<16x4xbf16>, vector<4x16xbf16>, vector<16x16xf32> -> vector<16x16xf32>
    %c0_3 = arith.constant 0 : index
    %c0_4 = arith.constant 0 : index
    %c0_5 = arith.constant 0 : index
    %27 = vector.load %arg2[%c0_3, %c0_4, %c0_5] : memref<5x4x16xbf16, #tpu.memory_space<vmem>>, vector<1x4x16xbf16>
    %28 = vector.shape_cast %27 : vector<1x4x16xbf16> to vector<4x16xbf16>
    %cst_6 = arith.constant dense<0.000000e+00> : vector<16x16xf32>
    %29 = tpu.matmul %23, %28, %cst_6 {dimension_numbers = #tpu.dot_dimension_numbers<[1], [0], [0], [1], [0, 0, 1, 1], [], []>} : vector<16x4xbf16>, vector<4x16xbf16>, vector<16x16xf32> -> vector<16x16xf32>
    %cst_7 = arith.constant dense<0.000000e+00> : vector<16x16xf32>
    %30 = tpu.matmul %7, %29, %cst_7 {dimension_numbers = #tpu.dot_dimension_numbers<[1], [0], [0], [1], [0, 0, 1, 1], [], []>} : vector<16x16xf32>, vector<16x16xf32>, vector<16x16xf32> -> vector<16x16xf32>
    %31 = arith.addf %26, %30 : vector<16x16xf32>
    %c1 = arith.constant 1 : index
    %c0_8 = arith.constant 0 : index
    %c0_9 = arith.constant 0 : index
    %32 = vector.load %arg2[%c1, %c0_8, %c0_9] : memref<5x4x16xbf16, #tpu.memory_space<vmem>>, vector<1x4x16xbf16>
    %33 = vector.shape_cast %32 : vector<1x4x16xbf16> to vector<4x16xbf16>
    %cst_10 = arith.constant dense<0.000000e+00> : vector<16x16xf32>
    %34 = tpu.matmul %23, %33, %cst_10 {dimension_numbers = #tpu.dot_dimension_numbers<[1], [0], [0], [1], [0, 0, 1, 1], [], []>} : vector<16x4xbf16>, vector<4x16xbf16>, vector<16x16xf32> -> vector<16x16xf32>
    %cst_11 = arith.constant dense<0.000000e+00> : vector<16x16xf32>
    %35 = tpu.matmul %12, %34, %cst_11 {dimension_numbers = #tpu.dot_dimension_numbers<[1], [0], [0], [1], [0, 0, 1, 1], [], []>} : vector<16x16xf32>, vector<16x16xf32>, vector<16x16xf32> -> vector<16x16xf32>
    %36 = arith.addf %31, %35 : vector<16x16xf32>
    %c3 = arith.constant 3 : index
    %c0_12 = arith.constant 0 : index
    %c0_13 = arith.constant 0 : index
    %37 = vector.load %arg2[%c3, %c0_12, %c0_13] : memref<5x4x16xbf16, #tpu.memory_space<vmem>>, vector<1x4x16xbf16>
    %38 = vector.shape_cast %37 : vector<1x4x16xbf16> to vector<4x16xbf16>
    %cst_14 = arith.constant dense<0.000000e+00> : vector<16x16xf32>
    %39 = tpu.matmul %23, %38, %cst_14 {dimension_numbers = #tpu.dot_dimension_numbers<[1], [0], [0], [1], [0, 0, 1, 1], [], []>} : vector<16x4xbf16>, vector<4x16xbf16>, vector<16x16xf32> -> vector<16x16xf32>
    %cst_15 = arith.constant dense<0.000000e+00> : vector<16x16xf32>
    %40 = tpu.matmul %17, %39, %cst_15 {dimension_numbers = #tpu.dot_dimension_numbers<[1], [0], [0], [1], [0, 0, 1, 1], [], []>} : vector<16x16xf32>, vector<16x16xf32>, vector<16x16xf32> -> vector<16x16xf32>
    %41 = arith.addf %36, %40 : vector<16x16xf32>
    %c4 = arith.constant 4 : index
    %c0_16 = arith.constant 0 : index
    %c0_17 = arith.constant 0 : index
    %42 = vector.load %arg2[%c4, %c0_16, %c0_17] : memref<5x4x16xbf16, #tpu.memory_space<vmem>>, vector<1x4x16xbf16>
    %43 = vector.shape_cast %42 : vector<1x4x16xbf16> to vector<4x16xbf16>
    %cst_18 = arith.constant dense<0.000000e+00> : vector<16x16xf32>
    %44 = tpu.matmul %23, %43, %cst_18 {dimension_numbers = #tpu.dot_dimension_numbers<[1], [0], [0], [1], [0, 0, 1, 1], [], []>} : vector<16x4xbf16>, vector<4x16xbf16>, vector<16x16xf32> -> vector<16x16xf32>
    %cst_19 = arith.constant dense<0.000000e+00> : vector<16x16xf32>
    %45 = tpu.matmul %22, %44, %cst_19 {dimension_numbers = #tpu.dot_dimension_numbers<[1], [0], [0], [1], [0, 0, 1, 1], [], []>} : vector<16x16xf32>, vector<16x16xf32>, vector<16x16xf32> -> vector<16x16xf32>
    %46 = arith.addf %41, %45 : vector<16x16xf32>
    %c0_20 = arith.constant 0 : index
    %c0_21 = arith.constant 0 : index
    %47 = vector.load %arg3[%c0_20, %c0_21] : memref<1x16xf32, #tpu.memory_space<vmem>>, vector<1x16xf32>
    %48 = vector.broadcast %47 : vector<1x16xf32> to vector<16x16xf32>
    %49 = arith.mulf %46, %48 : vector<16x16xf32>
    %c0_22 = arith.constant 0 : index
    %c0_23 = arith.constant 0 : index
    %50 = vector.load %arg4[%c0_22, %c0_23] : memref<1x16xf32, #tpu.memory_space<vmem>>, vector<1x16xf32>
    %51 = vector.broadcast %50 : vector<1x16xf32> to vector<16x16xf32>
    %52 = arith.addf %49, %51 : vector<16x16xf32>
    %cst_24 = arith.constant 0.000000e+00 : f32
    %53 = vector.broadcast %cst_24 : f32 to vector<16x16xf32>
    %54 = arith.maximumf %52, %53 : vector<16x16xf32>
    %55 = arith.truncf %54 : vector<16x16xf32> to vector<16x16xbf16>
    %c2_25 = arith.constant 2 : index
    %c0_26 = arith.constant 0 : index
    %c0_27 = arith.constant 0 : index
    %56 = vector.load %arg5[%c2_25, %c0_26, %c0_27] : memref<5x16x32xbf16, #tpu.memory_space<vmem>>, vector<1x16x32xbf16>
    %57 = vector.shape_cast %56 : vector<1x16x32xbf16> to vector<16x32xbf16>
    %cst_28 = arith.constant dense<0.000000e+00> : vector<16x32xf32>
    %58 = tpu.matmul %55, %57, %cst_28 {dimension_numbers = #tpu.dot_dimension_numbers<[1], [0], [0], [1], [0, 0, 1, 1], [], []>} : vector<16x16xbf16>, vector<16x32xbf16>, vector<16x32xf32> -> vector<16x32xf32>
    %c0_29 = arith.constant 0 : index
    %c0_30 = arith.constant 0 : index
    %c0_31 = arith.constant 0 : index
    %59 = vector.load %arg5[%c0_29, %c0_30, %c0_31] : memref<5x16x32xbf16, #tpu.memory_space<vmem>>, vector<1x16x32xbf16>
    %60 = vector.shape_cast %59 : vector<1x16x32xbf16> to vector<16x32xbf16>
    %cst_32 = arith.constant dense<0.000000e+00> : vector<16x32xf32>
    %61 = tpu.matmul %55, %60, %cst_32 {dimension_numbers = #tpu.dot_dimension_numbers<[1], [0], [0], [1], [0, 0, 1, 1], [], []>} : vector<16x16xbf16>, vector<16x32xbf16>, vector<16x32xf32> -> vector<16x32xf32>
    %cst_33 = arith.constant dense<0.000000e+00> : vector<16x32xf32>
    %62 = tpu.matmul %7, %61, %cst_33 {dimension_numbers = #tpu.dot_dimension_numbers<[1], [0], [0], [1], [0, 0, 1, 1], [], []>} : vector<16x16xf32>, vector<16x32xf32>, vector<16x32xf32> -> vector<16x32xf32>
    %63 = arith.addf %58, %62 : vector<16x32xf32>
    %c1_34 = arith.constant 1 : index
    %c0_35 = arith.constant 0 : index
    %c0_36 = arith.constant 0 : index
    %64 = vector.load %arg5[%c1_34, %c0_35, %c0_36] : memref<5x16x32xbf16, #tpu.memory_space<vmem>>, vector<1x16x32xbf16>
    %65 = vector.shape_cast %64 : vector<1x16x32xbf16> to vector<16x32xbf16>
    %cst_37 = arith.constant dense<0.000000e+00> : vector<16x32xf32>
    %66 = tpu.matmul %55, %65, %cst_37 {dimension_numbers = #tpu.dot_dimension_numbers<[1], [0], [0], [1], [0, 0, 1, 1], [], []>} : vector<16x16xbf16>, vector<16x32xbf16>, vector<16x32xf32> -> vector<16x32xf32>
    %cst_38 = arith.constant dense<0.000000e+00> : vector<16x32xf32>
    %67 = tpu.matmul %12, %66, %cst_38 {dimension_numbers = #tpu.dot_dimension_numbers<[1], [0], [0], [1], [0, 0, 1, 1], [], []>} : vector<16x16xf32>, vector<16x32xf32>, vector<16x32xf32> -> vector<16x32xf32>
    %68 = arith.addf %63, %67 : vector<16x32xf32>
    %c3_39 = arith.constant 3 : index
    %c0_40 = arith.constant 0 : index
    %c0_41 = arith.constant 0 : index
    %69 = vector.load %arg5[%c3_39, %c0_40, %c0_41] : memref<5x16x32xbf16, #tpu.memory_space<vmem>>, vector<1x16x32xbf16>
    %70 = vector.shape_cast %69 : vector<1x16x32xbf16> to vector<16x32xbf16>
    %cst_42 = arith.constant dense<0.000000e+00> : vector<16x32xf32>
    %71 = tpu.matmul %55, %70, %cst_42 {dimension_numbers = #tpu.dot_dimension_numbers<[1], [0], [0], [1], [0, 0, 1, 1], [], []>} : vector<16x16xbf16>, vector<16x32xbf16>, vector<16x32xf32> -> vector<16x32xf32>
    %cst_43 = arith.constant dense<0.000000e+00> : vector<16x32xf32>
    %72 = tpu.matmul %17, %71, %cst_43 {dimension_numbers = #tpu.dot_dimension_numbers<[1], [0], [0], [1], [0, 0, 1, 1], [], []>} : vector<16x16xf32>, vector<16x32xf32>, vector<16x32xf32> -> vector<16x32xf32>
    %73 = arith.addf %68, %72 : vector<16x32xf32>
    %c4_44 = arith.constant 4 : index
    %c0_45 = arith.constant 0 : index
    %c0_46 = arith.constant 0 : index
    %74 = vector.load %arg5[%c4_44, %c0_45, %c0_46] : memref<5x16x32xbf16, #tpu.memory_space<vmem>>, vector<1x16x32xbf16>
    %75 = vector.shape_cast %74 : vector<1x16x32xbf16> to vector<16x32xbf16>
    %cst_47 = arith.constant dense<0.000000e+00> : vector<16x32xf32>
    %76 = tpu.matmul %55, %75, %cst_47 {dimension_numbers = #tpu.dot_dimension_numbers<[1], [0], [0], [1], [0, 0, 1, 1], [], []>} : vector<16x16xbf16>, vector<16x32xbf16>, vector<16x32xf32> -> vector<16x32xf32>
    %cst_48 = arith.constant dense<0.000000e+00> : vector<16x32xf32>
    %77 = tpu.matmul %22, %76, %cst_48 {dimension_numbers = #tpu.dot_dimension_numbers<[1], [0], [0], [1], [0, 0, 1, 1], [], []>} : vector<16x16xf32>, vector<16x32xf32>, vector<16x32xf32> -> vector<16x32xf32>
    %78 = arith.addf %73, %77 : vector<16x32xf32>
    %79 = arith.truncf %78 : vector<16x32xf32> to vector<16x32xbf16>
    %c0_49 = arith.constant 0 : index
    %c0_50 = arith.constant 0 : index
    %c0_51 = arith.constant 0 : index
    %80 = vector.load %arg6[%c0_49, %c0_50, %c0_51] : memref<2x32x96xbf16, #tpu.memory_space<vmem>>, vector<1x32x96xbf16>
    %81 = vector.shape_cast %80 : vector<1x32x96xbf16> to vector<32x96xbf16>
    %cst_52 = arith.constant dense<0.000000e+00> : vector<16x96xf32>
    %82 = tpu.matmul %79, %81, %cst_52 {dimension_numbers = #tpu.dot_dimension_numbers<[1], [0], [0], [1], [0, 0, 1, 1], [], []>} : vector<16x32xbf16>, vector<32x96xbf16>, vector<16x96xf32> -> vector<16x96xf32>
    %c0_53 = arith.constant 0 : index
    %c0_54 = arith.constant 0 : index
    %c0_55 = arith.constant 0 : index
    %83 = vector.load %arg7[%c0_53, %c0_54, %c0_55] : memref<2x1x96xf32, #tpu.memory_space<vmem>>, vector<1x1x96xf32>
    %84 = vector.shape_cast %83 : vector<1x1x96xf32> to vector<1x96xf32>
    %85 = vector.broadcast %84 : vector<1x96xf32> to vector<16x96xf32>
    %86 = arith.addf %82, %85 : vector<16x96xf32>
    %87 = vector.extract_strided_slice %86 {offsets = [0, 0], sizes = [16, 32], strides = [1, 1]} : vector<16x96xf32> to vector<16x32xf32>
    %88 = vector.extract_strided_slice %86 {offsets = [0, 32], sizes = [16, 32], strides = [1, 1]} : vector<16x96xf32> to vector<16x32xf32>
    %89 = vector.extract_strided_slice %86 {offsets = [0, 64], sizes = [16, 32], strides = [1, 1]} : vector<16x96xf32> to vector<16x32xf32>
    %c0_56 = arith.constant 0 : index
    %c0_57 = arith.constant 0 : index
    %c0_58 = arith.constant 0 : index
    %c0_59 = arith.constant 0 : index
    %90 = vector.load %arg8[%c0_56, %c0_57, %c0_58, %c0_59] : memref<2x4x8x32xbf16, #tpu.memory_space<vmem>>, vector<1x4x8x32xbf16>
    %91 = vector.shape_cast %90 : vector<1x4x8x32xbf16> to vector<4x8x32xbf16>
    %cst_60 = arith.constant 0.000000e+00 : f32
    %92 = vector.broadcast %cst_60 : f32 to vector<16x32xf32>
    %93 = vector.extract_strided_slice %87 {offsets = [0, 0], sizes = [16, 8], strides = [1, 1]} : vector<16x32xf32> to vector<16x8xf32>
    %cst_61 = arith.constant 0.353553385 : f32
    %94 = vector.broadcast %cst_61 : f32 to vector<16x8xf32>
    %95 = arith.mulf %93, %94 : vector<16x8xf32>
    %96 = vector.extract_strided_slice %88 {offsets = [0, 0], sizes = [16, 8], strides = [1, 1]} : vector<16x32xf32> to vector<16x8xf32>
    %cst_62 = arith.constant dense<0.000000e+00> : vector<16x16xf32>
    %97 = tpu.matmul %95, %96, %cst_62 {dimension_numbers = #tpu.dot_dimension_numbers<[1], [1], [0], [0], [0, 0, 1, 0], [], []>} : vector<16x8xf32>, vector<16x8xf32>, vector<16x16xf32> -> vector<16x16xf32>
    %cst_63 = arith.constant dense<0xFF800000> : vector<16xf32>
    %98 = vector.multi_reduction <maximumf>, %97, %cst_63 [1] : vector<16x16xf32> to vector<16xf32>
    %99 = vector.shape_cast %98 : vector<16xf32> to vector<16x1xf32>
    %100 = vector.broadcast %99 : vector<16x1xf32> to vector<16x16xf32>
    %101 = arith.subf %97, %100 : vector<16x16xf32>
    %102 = math.exp %101 : vector<16x16xf32>
    %cst_64 = arith.constant dense<0.000000e+00> : vector<16xf32>
    %103 = vector.multi_reduction <add>, %102, %cst_64 [1] : vector<16x16xf32> to vector<16xf32>
    %104 = vector.shape_cast %103 : vector<16xf32> to vector<16x1xf32>
    %105 = tpu.reciprocal %104 {approx = true} : vector<16x1xf32> -> vector<16x1xf32>
    %106 = vector.broadcast %105 : vector<16x1xf32> to vector<16x16xf32>
    %107 = arith.mulf %102, %106 : vector<16x16xf32>
    %108 = vector.extract_strided_slice %89 {offsets = [0, 0], sizes = [16, 8], strides = [1, 1]} : vector<16x32xf32> to vector<16x8xf32>
    %cst_65 = arith.constant dense<0.000000e+00> : vector<16x8xf32>
    %109 = tpu.matmul %107, %108, %cst_65 {dimension_numbers = #tpu.dot_dimension_numbers<[1], [0], [0], [1], [0, 0, 1, 1], [], []>} : vector<16x16xf32>, vector<16x8xf32>, vector<16x8xf32> -> vector<16x8xf32>
    %110 = arith.truncf %109 : vector<16x8xf32> to vector<16x8xbf16>
    %111 = vector.extract_strided_slice %91 {offsets = [0, 0, 0], sizes = [1, 8, 32], strides = [1, 1, 1]} : vector<4x8x32xbf16> to vector<1x8x32xbf16>
    %112 = vector.shape_cast %111 : vector<1x8x32xbf16> to vector<8x32xbf16>
    %cst_66 = arith.constant dense<0.000000e+00> : vector<16x32xf32>
    %113 = tpu.matmul %110, %112, %cst_66 {dimension_numbers = #tpu.dot_dimension_numbers<[1], [0], [0], [1], [0, 0, 1, 1], [], []>} : vector<16x8xbf16>, vector<8x32xbf16>, vector<16x32xf32> -> vector<16x32xf32>
    %114 = arith.addf %92, %113 : vector<16x32xf32>
    %115 = vector.extract_strided_slice %87 {offsets = [0, 8], sizes = [16, 8], strides = [1, 1]} : vector<16x32xf32> to vector<16x8xf32>
    %cst_67 = arith.constant 0.353553385 : f32
    %116 = vector.broadcast %cst_67 : f32 to vector<16x8xf32>
    %117 = arith.mulf %115, %116 : vector<16x8xf32>
    %118 = vector.extract_strided_slice %88 {offsets = [0, 8], sizes = [16, 8], strides = [1, 1]} : vector<16x32xf32> to vector<16x8xf32>
    %cst_68 = arith.constant dense<0.000000e+00> : vector<16x16xf32>
    %119 = tpu.matmul %117, %118, %cst_68 {dimension_numbers = #tpu.dot_dimension_numbers<[1], [1], [0], [0], [0, 0, 1, 0], [], []>} : vector<16x8xf32>, vector<16x8xf32>, vector<16x16xf32> -> vector<16x16xf32>
    %cst_69 = arith.constant dense<0xFF800000> : vector<16xf32>
    %120 = vector.multi_reduction <maximumf>, %119, %cst_69 [1] : vector<16x16xf32> to vector<16xf32>
    %121 = vector.shape_cast %120 : vector<16xf32> to vector<16x1xf32>
    %122 = vector.broadcast %121 : vector<16x1xf32> to vector<16x16xf32>
    %123 = arith.subf %119, %122 : vector<16x16xf32>
    %124 = math.exp %123 : vector<16x16xf32>
    %cst_70 = arith.constant dense<0.000000e+00> : vector<16xf32>
    %125 = vector.multi_reduction <add>, %124, %cst_70 [1] : vector<16x16xf32> to vector<16xf32>
    %126 = vector.shape_cast %125 : vector<16xf32> to vector<16x1xf32>
    %127 = tpu.reciprocal %126 {approx = true} : vector<16x1xf32> -> vector<16x1xf32>
    %128 = vector.broadcast %127 : vector<16x1xf32> to vector<16x16xf32>
    %129 = arith.mulf %124, %128 : vector<16x16xf32>
    %130 = vector.extract_strided_slice %89 {offsets = [0, 8], sizes = [16, 8], strides = [1, 1]} : vector<16x32xf32> to vector<16x8xf32>
    %cst_71 = arith.constant dense<0.000000e+00> : vector<16x8xf32>
    %131 = tpu.matmul %129, %130, %cst_71 {dimension_numbers = #tpu.dot_dimension_numbers<[1], [0], [0], [1], [0, 0, 1, 1], [], []>} : vector<16x16xf32>, vector<16x8xf32>, vector<16x8xf32> -> vector<16x8xf32>
    %132 = arith.truncf %131 : vector<16x8xf32> to vector<16x8xbf16>
    %133 = vector.extract_strided_slice %91 {offsets = [1, 0, 0], sizes = [1, 8, 32], strides = [1, 1, 1]} : vector<4x8x32xbf16> to vector<1x8x32xbf16>
    %134 = vector.shape_cast %133 : vector<1x8x32xbf16> to vector<8x32xbf16>
    %cst_72 = arith.constant dense<0.000000e+00> : vector<16x32xf32>
    %135 = tpu.matmul %132, %134, %cst_72 {dimension_numbers = #tpu.dot_dimension_numbers<[1], [0], [0], [1], [0, 0, 1, 1], [], []>} : vector<16x8xbf16>, vector<8x32xbf16>, vector<16x32xf32> -> vector<16x32xf32>
    %136 = arith.addf %114, %135 : vector<16x32xf32>
    %137 = vector.extract_strided_slice %87 {offsets = [0, 16], sizes = [16, 8], strides = [1, 1]} : vector<16x32xf32> to vector<16x8xf32>
    %cst_73 = arith.constant 0.353553385 : f32
    %138 = vector.broadcast %cst_73 : f32 to vector<16x8xf32>
    %139 = arith.mulf %137, %138 : vector<16x8xf32>
    %140 = vector.extract_strided_slice %88 {offsets = [0, 16], sizes = [16, 8], strides = [1, 1]} : vector<16x32xf32> to vector<16x8xf32>
    %cst_74 = arith.constant dense<0.000000e+00> : vector<16x16xf32>
    %141 = tpu.matmul %139, %140, %cst_74 {dimension_numbers = #tpu.dot_dimension_numbers<[1], [1], [0], [0], [0, 0, 1, 0], [], []>} : vector<16x8xf32>, vector<16x8xf32>, vector<16x16xf32> -> vector<16x16xf32>
    %cst_75 = arith.constant dense<0xFF800000> : vector<16xf32>
    %142 = vector.multi_reduction <maximumf>, %141, %cst_75 [1] : vector<16x16xf32> to vector<16xf32>
    %143 = vector.shape_cast %142 : vector<16xf32> to vector<16x1xf32>
    %144 = vector.broadcast %143 : vector<16x1xf32> to vector<16x16xf32>
    %145 = arith.subf %141, %144 : vector<16x16xf32>
    %146 = math.exp %145 : vector<16x16xf32>
    %cst_76 = arith.constant dense<0.000000e+00> : vector<16xf32>
    %147 = vector.multi_reduction <add>, %146, %cst_76 [1] : vector<16x16xf32> to vector<16xf32>
    %148 = vector.shape_cast %147 : vector<16xf32> to vector<16x1xf32>
    %149 = tpu.reciprocal %148 {approx = true} : vector<16x1xf32> -> vector<16x1xf32>
    %150 = vector.broadcast %149 : vector<16x1xf32> to vector<16x16xf32>
    %151 = arith.mulf %146, %150 : vector<16x16xf32>
    %152 = vector.extract_strided_slice %89 {offsets = [0, 16], sizes = [16, 8], strides = [1, 1]} : vector<16x32xf32> to vector<16x8xf32>
    %cst_77 = arith.constant dense<0.000000e+00> : vector<16x8xf32>
    %153 = tpu.matmul %151, %152, %cst_77 {dimension_numbers = #tpu.dot_dimension_numbers<[1], [0], [0], [1], [0, 0, 1, 1], [], []>} : vector<16x16xf32>, vector<16x8xf32>, vector<16x8xf32> -> vector<16x8xf32>
    %154 = arith.truncf %153 : vector<16x8xf32> to vector<16x8xbf16>
    %155 = vector.extract_strided_slice %91 {offsets = [2, 0, 0], sizes = [1, 8, 32], strides = [1, 1, 1]} : vector<4x8x32xbf16> to vector<1x8x32xbf16>
    %156 = vector.shape_cast %155 : vector<1x8x32xbf16> to vector<8x32xbf16>
    %cst_78 = arith.constant dense<0.000000e+00> : vector<16x32xf32>
    %157 = tpu.matmul %154, %156, %cst_78 {dimension_numbers = #tpu.dot_dimension_numbers<[1], [0], [0], [1], [0, 0, 1, 1], [], []>} : vector<16x8xbf16>, vector<8x32xbf16>, vector<16x32xf32> -> vector<16x32xf32>
    %158 = arith.addf %136, %157 : vector<16x32xf32>
    %159 = vector.extract_strided_slice %87 {offsets = [0, 24], sizes = [16, 8], strides = [1, 1]} : vector<16x32xf32> to vector<16x8xf32>
    %cst_79 = arith.constant 0.353553385 : f32
    %160 = vector.broadcast %cst_79 : f32 to vector<16x8xf32>
    %161 = arith.mulf %159, %160 : vector<16x8xf32>
    %162 = vector.extract_strided_slice %88 {offsets = [0, 24], sizes = [16, 8], strides = [1, 1]} : vector<16x32xf32> to vector<16x8xf32>
    %cst_80 = arith.constant dense<0.000000e+00> : vector<16x16xf32>
    %163 = tpu.matmul %161, %162, %cst_80 {dimension_numbers = #tpu.dot_dimension_numbers<[1], [1], [0], [0], [0, 0, 1, 0], [], []>} : vector<16x8xf32>, vector<16x8xf32>, vector<16x16xf32> -> vector<16x16xf32>
    %cst_81 = arith.constant dense<0xFF800000> : vector<16xf32>
    %164 = vector.multi_reduction <maximumf>, %163, %cst_81 [1] : vector<16x16xf32> to vector<16xf32>
    %165 = vector.shape_cast %164 : vector<16xf32> to vector<16x1xf32>
    %166 = vector.broadcast %165 : vector<16x1xf32> to vector<16x16xf32>
    %167 = arith.subf %163, %166 : vector<16x16xf32>
    %168 = math.exp %167 : vector<16x16xf32>
    %cst_82 = arith.constant dense<0.000000e+00> : vector<16xf32>
    %169 = vector.multi_reduction <add>, %168, %cst_82 [1] : vector<16x16xf32> to vector<16xf32>
    %170 = vector.shape_cast %169 : vector<16xf32> to vector<16x1xf32>
    %171 = tpu.reciprocal %170 {approx = true} : vector<16x1xf32> -> vector<16x1xf32>
    %172 = vector.broadcast %171 : vector<16x1xf32> to vector<16x16xf32>
    %173 = arith.mulf %168, %172 : vector<16x16xf32>
    %174 = vector.extract_strided_slice %89 {offsets = [0, 24], sizes = [16, 8], strides = [1, 1]} : vector<16x32xf32> to vector<16x8xf32>
    %cst_83 = arith.constant dense<0.000000e+00> : vector<16x8xf32>
    %175 = tpu.matmul %173, %174, %cst_83 {dimension_numbers = #tpu.dot_dimension_numbers<[1], [0], [0], [1], [0, 0, 1, 1], [], []>} : vector<16x16xf32>, vector<16x8xf32>, vector<16x8xf32> -> vector<16x8xf32>
    %176 = arith.truncf %175 : vector<16x8xf32> to vector<16x8xbf16>
    %177 = vector.extract_strided_slice %91 {offsets = [3, 0, 0], sizes = [1, 8, 32], strides = [1, 1, 1]} : vector<4x8x32xbf16> to vector<1x8x32xbf16>
    %178 = vector.shape_cast %177 : vector<1x8x32xbf16> to vector<8x32xbf16>
    %cst_84 = arith.constant dense<0.000000e+00> : vector<16x32xf32>
    %179 = tpu.matmul %176, %178, %cst_84 {dimension_numbers = #tpu.dot_dimension_numbers<[1], [0], [0], [1], [0, 0, 1, 1], [], []>} : vector<16x8xbf16>, vector<8x32xbf16>, vector<16x32xf32> -> vector<16x32xf32>
    %180 = arith.addf %158, %179 : vector<16x32xf32>
    %c0_85 = arith.constant 0 : index
    %c0_86 = arith.constant 0 : index
    %c0_87 = arith.constant 0 : index
    %181 = vector.load %arg9[%c0_85, %c0_86, %c0_87] : memref<2x1x32xf32, #tpu.memory_space<vmem>>, vector<1x1x32xf32>
    %182 = vector.shape_cast %181 : vector<1x1x32xf32> to vector<1x32xf32>
    %183 = vector.broadcast %182 : vector<1x32xf32> to vector<16x32xf32>
    %184 = arith.addf %180, %183 : vector<16x32xf32>
    %185 = arith.addf %78, %184 : vector<16x32xf32>
    %c0_88 = arith.constant 0 : index
    %c0_89 = arith.constant 0 : index
    %c0_90 = arith.constant 0 : index
    %186 = vector.load %arg10[%c0_88, %c0_89, %c0_90] : memref<2x1x32xf32, #tpu.memory_space<vmem>>, vector<1x1x32xf32>
    %187 = vector.shape_cast %186 : vector<1x1x32xf32> to vector<1x32xf32>
    %c0_91 = arith.constant 0 : index
    %c0_92 = arith.constant 0 : index
    %c0_93 = arith.constant 0 : index
    %188 = vector.load %arg11[%c0_91, %c0_92, %c0_93] : memref<2x1x32xf32, #tpu.memory_space<vmem>>, vector<1x1x32xf32>
    %189 = vector.shape_cast %188 : vector<1x1x32xf32> to vector<1x32xf32>
    %cst_94 = arith.constant dense<0.000000e+00> : vector<16xf32>
    %190 = vector.multi_reduction <add>, %185, %cst_94 [1] : vector<16x32xf32> to vector<16xf32>
    %191 = vector.shape_cast %190 : vector<16xf32> to vector<16x1xf32>
    %cst_95 = arith.constant 3.200000e+01 : f32
    %192 = vector.broadcast %cst_95 : f32 to vector<16x1xf32>
    %193 = arith.divf %191, %192 : vector<16x1xf32>
    %194 = vector.broadcast %193 : vector<16x1xf32> to vector<16x32xf32>
    %195 = arith.subf %185, %194 : vector<16x32xf32>
    %196 = arith.mulf %195, %195 : vector<16x32xf32>
    %cst_96 = arith.constant dense<0.000000e+00> : vector<16xf32>
    %197 = vector.multi_reduction <add>, %196, %cst_96 [1] : vector<16x32xf32> to vector<16xf32>
    %198 = vector.shape_cast %197 : vector<16xf32> to vector<16x1xf32>
    %cst_97 = arith.constant 3.200000e+01 : f32
    %199 = vector.broadcast %cst_97 : f32 to vector<16x1xf32>
    %200 = arith.divf %198, %199 : vector<16x1xf32>
    %201 = vector.broadcast %193 : vector<16x1xf32> to vector<16x32xf32>
    %202 = arith.subf %185, %201 : vector<16x32xf32>
    %cst_98 = arith.constant 9.99999974E-6 : f32
    %203 = vector.broadcast %cst_98 : f32 to vector<16x1xf32>
    %204 = arith.addf %200, %203 : vector<16x1xf32>
    %205 = math.rsqrt %204 : vector<16x1xf32>
    %206 = vector.broadcast %205 : vector<16x1xf32> to vector<16x32xf32>
    %207 = arith.mulf %202, %206 : vector<16x32xf32>
    %208 = vector.broadcast %187 : vector<1x32xf32> to vector<16x32xf32>
    %209 = arith.mulf %207, %208 : vector<16x32xf32>
    %210 = vector.broadcast %189 : vector<1x32xf32> to vector<16x32xf32>
    %211 = arith.addf %209, %210 : vector<16x32xf32>
    %212 = arith.truncf %211 : vector<16x32xf32> to vector<16x32xbf16>
    %c0_99 = arith.constant 0 : index
    %c0_100 = arith.constant 0 : index
    %c0_101 = arith.constant 0 : index
    %213 = vector.load %arg12[%c0_99, %c0_100, %c0_101] : memref<2x32x1024xbf16, #tpu.memory_space<vmem>>, vector<1x32x1024xbf16>
    %214 = vector.shape_cast %213 : vector<1x32x1024xbf16> to vector<32x1024xbf16>
    %cst_102 = arith.constant dense<0.000000e+00> : vector<16x1024xf32>
    %215 = tpu.matmul %212, %214, %cst_102 {dimension_numbers = #tpu.dot_dimension_numbers<[1], [0], [0], [1], [0, 0, 1, 1], [], []>} : vector<16x32xbf16>, vector<32x1024xbf16>, vector<16x1024xf32> -> vector<16x1024xf32>
    %c0_103 = arith.constant 0 : index
    %c0_104 = arith.constant 0 : index
    %c0_105 = arith.constant 0 : index
    %216 = vector.load %arg13[%c0_103, %c0_104, %c0_105] : memref<2x1x1024xf32, #tpu.memory_space<vmem>>, vector<1x1x1024xf32>
    %217 = vector.shape_cast %216 : vector<1x1x1024xf32> to vector<1x1024xf32>
    %218 = vector.broadcast %217 : vector<1x1024xf32> to vector<16x1024xf32>
    %219 = arith.addf %215, %218 : vector<16x1024xf32>
    %cst_106 = arith.constant 0.000000e+00 : f32
    %220 = vector.broadcast %cst_106 : f32 to vector<16x1024xf32>
    %221 = arith.maximumf %219, %220 : vector<16x1024xf32>
    %222 = arith.truncf %221 : vector<16x1024xf32> to vector<16x1024xbf16>
    %c0_107 = arith.constant 0 : index
    %c0_108 = arith.constant 0 : index
    %c0_109 = arith.constant 0 : index
    %223 = vector.load %arg14[%c0_107, %c0_108, %c0_109] : memref<2x1024x32xbf16, #tpu.memory_space<vmem>>, vector<1x1024x32xbf16>
    %224 = vector.shape_cast %223 : vector<1x1024x32xbf16> to vector<1024x32xbf16>
    %cst_110 = arith.constant dense<0.000000e+00> : vector<16x32xf32>
    %225 = tpu.matmul %222, %224, %cst_110 {dimension_numbers = #tpu.dot_dimension_numbers<[1], [0], [0], [1], [0, 0, 1, 1], [], []>} : vector<16x1024xbf16>, vector<1024x32xbf16>, vector<16x32xf32> -> vector<16x32xf32>
    %c0_111 = arith.constant 0 : index
    %c0_112 = arith.constant 0 : index
    %c0_113 = arith.constant 0 : index
    %226 = vector.load %arg15[%c0_111, %c0_112, %c0_113] : memref<2x1x32xf32, #tpu.memory_space<vmem>>, vector<1x1x32xf32>
    %227 = vector.shape_cast %226 : vector<1x1x32xf32> to vector<1x32xf32>
    %228 = vector.broadcast %227 : vector<1x32xf32> to vector<16x32xf32>
    %229 = arith.addf %225, %228 : vector<16x32xf32>
    %230 = arith.addf %211, %229 : vector<16x32xf32>
    %c0_114 = arith.constant 0 : index
    %c0_115 = arith.constant 0 : index
    %c0_116 = arith.constant 0 : index
    %231 = vector.load %arg16[%c0_114, %c0_115, %c0_116] : memref<2x1x32xf32, #tpu.memory_space<vmem>>, vector<1x1x32xf32>
    %232 = vector.shape_cast %231 : vector<1x1x32xf32> to vector<1x32xf32>
    %c0_117 = arith.constant 0 : index
    %c0_118 = arith.constant 0 : index
    %c0_119 = arith.constant 0 : index
    %233 = vector.load %arg17[%c0_117, %c0_118, %c0_119] : memref<2x1x32xf32, #tpu.memory_space<vmem>>, vector<1x1x32xf32>
    %234 = vector.shape_cast %233 : vector<1x1x32xf32> to vector<1x32xf32>
    %cst_120 = arith.constant dense<0.000000e+00> : vector<16xf32>
    %235 = vector.multi_reduction <add>, %230, %cst_120 [1] : vector<16x32xf32> to vector<16xf32>
    %236 = vector.shape_cast %235 : vector<16xf32> to vector<16x1xf32>
    %cst_121 = arith.constant 3.200000e+01 : f32
    %237 = vector.broadcast %cst_121 : f32 to vector<16x1xf32>
    %238 = arith.divf %236, %237 : vector<16x1xf32>
    %239 = vector.broadcast %238 : vector<16x1xf32> to vector<16x32xf32>
    %240 = arith.subf %230, %239 : vector<16x32xf32>
    %241 = arith.mulf %240, %240 : vector<16x32xf32>
    %cst_122 = arith.constant dense<0.000000e+00> : vector<16xf32>
    %242 = vector.multi_reduction <add>, %241, %cst_122 [1] : vector<16x32xf32> to vector<16xf32>
    %243 = vector.shape_cast %242 : vector<16xf32> to vector<16x1xf32>
    %cst_123 = arith.constant 3.200000e+01 : f32
    %244 = vector.broadcast %cst_123 : f32 to vector<16x1xf32>
    %245 = arith.divf %243, %244 : vector<16x1xf32>
    %246 = vector.broadcast %238 : vector<16x1xf32> to vector<16x32xf32>
    %247 = arith.subf %230, %246 : vector<16x32xf32>
    %cst_124 = arith.constant 9.99999974E-6 : f32
    %248 = vector.broadcast %cst_124 : f32 to vector<16x1xf32>
    %249 = arith.addf %245, %248 : vector<16x1xf32>
    %250 = math.rsqrt %249 : vector<16x1xf32>
    %251 = vector.broadcast %250 : vector<16x1xf32> to vector<16x32xf32>
    %252 = arith.mulf %247, %251 : vector<16x32xf32>
    %253 = vector.broadcast %232 : vector<1x32xf32> to vector<16x32xf32>
    %254 = arith.mulf %252, %253 : vector<16x32xf32>
    %255 = vector.broadcast %234 : vector<1x32xf32> to vector<16x32xf32>
    %256 = arith.addf %254, %255 : vector<16x32xf32>
    %257 = arith.truncf %256 : vector<16x32xf32> to vector<16x32xbf16>
    %c1_125 = arith.constant 1 : index
    %c0_126 = arith.constant 0 : index
    %c0_127 = arith.constant 0 : index
    %258 = vector.load %arg6[%c1_125, %c0_126, %c0_127] : memref<2x32x96xbf16, #tpu.memory_space<vmem>>, vector<1x32x96xbf16>
    %259 = vector.shape_cast %258 : vector<1x32x96xbf16> to vector<32x96xbf16>
    %cst_128 = arith.constant dense<0.000000e+00> : vector<16x96xf32>
    %260 = tpu.matmul %257, %259, %cst_128 {dimension_numbers = #tpu.dot_dimension_numbers<[1], [0], [0], [1], [0, 0, 1, 1], [], []>} : vector<16x32xbf16>, vector<32x96xbf16>, vector<16x96xf32> -> vector<16x96xf32>
    %c1_129 = arith.constant 1 : index
    %c0_130 = arith.constant 0 : index
    %c0_131 = arith.constant 0 : index
    %261 = vector.load %arg7[%c1_129, %c0_130, %c0_131] : memref<2x1x96xf32, #tpu.memory_space<vmem>>, vector<1x1x96xf32>
    %262 = vector.shape_cast %261 : vector<1x1x96xf32> to vector<1x96xf32>
    %263 = vector.broadcast %262 : vector<1x96xf32> to vector<16x96xf32>
    %264 = arith.addf %260, %263 : vector<16x96xf32>
    %265 = vector.extract_strided_slice %264 {offsets = [0, 0], sizes = [16, 32], strides = [1, 1]} : vector<16x96xf32> to vector<16x32xf32>
    %266 = vector.extract_strided_slice %264 {offsets = [0, 32], sizes = [16, 32], strides = [1, 1]} : vector<16x96xf32> to vector<16x32xf32>
    %267 = vector.extract_strided_slice %264 {offsets = [0, 64], sizes = [16, 32], strides = [1, 1]} : vector<16x96xf32> to vector<16x32xf32>
    %c1_132 = arith.constant 1 : index
    %c0_133 = arith.constant 0 : index
    %c0_134 = arith.constant 0 : index
    %c0_135 = arith.constant 0 : index
    %268 = vector.load %arg8[%c1_132, %c0_133, %c0_134, %c0_135] : memref<2x4x8x32xbf16, #tpu.memory_space<vmem>>, vector<1x4x8x32xbf16>
    %269 = vector.shape_cast %268 : vector<1x4x8x32xbf16> to vector<4x8x32xbf16>
    %cst_136 = arith.constant 0.000000e+00 : f32
    %270 = vector.broadcast %cst_136 : f32 to vector<16x32xf32>
    %271 = vector.extract_strided_slice %265 {offsets = [0, 0], sizes = [16, 8], strides = [1, 1]} : vector<16x32xf32> to vector<16x8xf32>
    %cst_137 = arith.constant 0.353553385 : f32
    %272 = vector.broadcast %cst_137 : f32 to vector<16x8xf32>
    %273 = arith.mulf %271, %272 : vector<16x8xf32>
    %274 = vector.extract_strided_slice %266 {offsets = [0, 0], sizes = [16, 8], strides = [1, 1]} : vector<16x32xf32> to vector<16x8xf32>
    %cst_138 = arith.constant dense<0.000000e+00> : vector<16x16xf32>
    %275 = tpu.matmul %273, %274, %cst_138 {dimension_numbers = #tpu.dot_dimension_numbers<[1], [1], [0], [0], [0, 0, 1, 0], [], []>} : vector<16x8xf32>, vector<16x8xf32>, vector<16x16xf32> -> vector<16x16xf32>
    %cst_139 = arith.constant dense<0xFF800000> : vector<16xf32>
    %276 = vector.multi_reduction <maximumf>, %275, %cst_139 [1] : vector<16x16xf32> to vector<16xf32>
    %277 = vector.shape_cast %276 : vector<16xf32> to vector<16x1xf32>
    %278 = vector.broadcast %277 : vector<16x1xf32> to vector<16x16xf32>
    %279 = arith.subf %275, %278 : vector<16x16xf32>
    %280 = math.exp %279 : vector<16x16xf32>
    %cst_140 = arith.constant dense<0.000000e+00> : vector<16xf32>
    %281 = vector.multi_reduction <add>, %280, %cst_140 [1] : vector<16x16xf32> to vector<16xf32>
    %282 = vector.shape_cast %281 : vector<16xf32> to vector<16x1xf32>
    %283 = tpu.reciprocal %282 {approx = true} : vector<16x1xf32> -> vector<16x1xf32>
    %284 = vector.broadcast %283 : vector<16x1xf32> to vector<16x16xf32>
    %285 = arith.mulf %280, %284 : vector<16x16xf32>
    %286 = vector.extract_strided_slice %267 {offsets = [0, 0], sizes = [16, 8], strides = [1, 1]} : vector<16x32xf32> to vector<16x8xf32>
    %cst_141 = arith.constant dense<0.000000e+00> : vector<16x8xf32>
    %287 = tpu.matmul %285, %286, %cst_141 {dimension_numbers = #tpu.dot_dimension_numbers<[1], [0], [0], [1], [0, 0, 1, 1], [], []>} : vector<16x16xf32>, vector<16x8xf32>, vector<16x8xf32> -> vector<16x8xf32>
    %288 = arith.truncf %287 : vector<16x8xf32> to vector<16x8xbf16>
    %289 = vector.extract_strided_slice %269 {offsets = [0, 0, 0], sizes = [1, 8, 32], strides = [1, 1, 1]} : vector<4x8x32xbf16> to vector<1x8x32xbf16>
    %290 = vector.shape_cast %289 : vector<1x8x32xbf16> to vector<8x32xbf16>
    %cst_142 = arith.constant dense<0.000000e+00> : vector<16x32xf32>
    %291 = tpu.matmul %288, %290, %cst_142 {dimension_numbers = #tpu.dot_dimension_numbers<[1], [0], [0], [1], [0, 0, 1, 1], [], []>} : vector<16x8xbf16>, vector<8x32xbf16>, vector<16x32xf32> -> vector<16x32xf32>
    %292 = arith.addf %270, %291 : vector<16x32xf32>
    %293 = vector.extract_strided_slice %265 {offsets = [0, 8], sizes = [16, 8], strides = [1, 1]} : vector<16x32xf32> to vector<16x8xf32>
    %cst_143 = arith.constant 0.353553385 : f32
    %294 = vector.broadcast %cst_143 : f32 to vector<16x8xf32>
    %295 = arith.mulf %293, %294 : vector<16x8xf32>
    %296 = vector.extract_strided_slice %266 {offsets = [0, 8], sizes = [16, 8], strides = [1, 1]} : vector<16x32xf32> to vector<16x8xf32>
    %cst_144 = arith.constant dense<0.000000e+00> : vector<16x16xf32>
    %297 = tpu.matmul %295, %296, %cst_144 {dimension_numbers = #tpu.dot_dimension_numbers<[1], [1], [0], [0], [0, 0, 1, 0], [], []>} : vector<16x8xf32>, vector<16x8xf32>, vector<16x16xf32> -> vector<16x16xf32>
    %cst_145 = arith.constant dense<0xFF800000> : vector<16xf32>
    %298 = vector.multi_reduction <maximumf>, %297, %cst_145 [1] : vector<16x16xf32> to vector<16xf32>
    %299 = vector.shape_cast %298 : vector<16xf32> to vector<16x1xf32>
    %300 = vector.broadcast %299 : vector<16x1xf32> to vector<16x16xf32>
    %301 = arith.subf %297, %300 : vector<16x16xf32>
    %302 = math.exp %301 : vector<16x16xf32>
    %cst_146 = arith.constant dense<0.000000e+00> : vector<16xf32>
    %303 = vector.multi_reduction <add>, %302, %cst_146 [1] : vector<16x16xf32> to vector<16xf32>
    %304 = vector.shape_cast %303 : vector<16xf32> to vector<16x1xf32>
    %305 = tpu.reciprocal %304 {approx = true} : vector<16x1xf32> -> vector<16x1xf32>
    %306 = vector.broadcast %305 : vector<16x1xf32> to vector<16x16xf32>
    %307 = arith.mulf %302, %306 : vector<16x16xf32>
    %308 = vector.extract_strided_slice %267 {offsets = [0, 8], sizes = [16, 8], strides = [1, 1]} : vector<16x32xf32> to vector<16x8xf32>
    %cst_147 = arith.constant dense<0.000000e+00> : vector<16x8xf32>
    %309 = tpu.matmul %307, %308, %cst_147 {dimension_numbers = #tpu.dot_dimension_numbers<[1], [0], [0], [1], [0, 0, 1, 1], [], []>} : vector<16x16xf32>, vector<16x8xf32>, vector<16x8xf32> -> vector<16x8xf32>
    %310 = arith.truncf %309 : vector<16x8xf32> to vector<16x8xbf16>
    %311 = vector.extract_strided_slice %269 {offsets = [1, 0, 0], sizes = [1, 8, 32], strides = [1, 1, 1]} : vector<4x8x32xbf16> to vector<1x8x32xbf16>
    %312 = vector.shape_cast %311 : vector<1x8x32xbf16> to vector<8x32xbf16>
    %cst_148 = arith.constant dense<0.000000e+00> : vector<16x32xf32>
    %313 = tpu.matmul %310, %312, %cst_148 {dimension_numbers = #tpu.dot_dimension_numbers<[1], [0], [0], [1], [0, 0, 1, 1], [], []>} : vector<16x8xbf16>, vector<8x32xbf16>, vector<16x32xf32> -> vector<16x32xf32>
    %314 = arith.addf %292, %313 : vector<16x32xf32>
    %315 = vector.extract_strided_slice %265 {offsets = [0, 16], sizes = [16, 8], strides = [1, 1]} : vector<16x32xf32> to vector<16x8xf32>
    %cst_149 = arith.constant 0.353553385 : f32
    %316 = vector.broadcast %cst_149 : f32 to vector<16x8xf32>
    %317 = arith.mulf %315, %316 : vector<16x8xf32>
    %318 = vector.extract_strided_slice %266 {offsets = [0, 16], sizes = [16, 8], strides = [1, 1]} : vector<16x32xf32> to vector<16x8xf32>
    %cst_150 = arith.constant dense<0.000000e+00> : vector<16x16xf32>
    %319 = tpu.matmul %317, %318, %cst_150 {dimension_numbers = #tpu.dot_dimension_numbers<[1], [1], [0], [0], [0, 0, 1, 0], [], []>} : vector<16x8xf32>, vector<16x8xf32>, vector<16x16xf32> -> vector<16x16xf32>
    %cst_151 = arith.constant dense<0xFF800000> : vector<16xf32>
    %320 = vector.multi_reduction <maximumf>, %319, %cst_151 [1] : vector<16x16xf32> to vector<16xf32>
    %321 = vector.shape_cast %320 : vector<16xf32> to vector<16x1xf32>
    %322 = vector.broadcast %321 : vector<16x1xf32> to vector<16x16xf32>
    %323 = arith.subf %319, %322 : vector<16x16xf32>
    %324 = math.exp %323 : vector<16x16xf32>
    %cst_152 = arith.constant dense<0.000000e+00> : vector<16xf32>
    %325 = vector.multi_reduction <add>, %324, %cst_152 [1] : vector<16x16xf32> to vector<16xf32>
    %326 = vector.shape_cast %325 : vector<16xf32> to vector<16x1xf32>
    %327 = tpu.reciprocal %326 {approx = true} : vector<16x1xf32> -> vector<16x1xf32>
    %328 = vector.broadcast %327 : vector<16x1xf32> to vector<16x16xf32>
    %329 = arith.mulf %324, %328 : vector<16x16xf32>
    %330 = vector.extract_strided_slice %267 {offsets = [0, 16], sizes = [16, 8], strides = [1, 1]} : vector<16x32xf32> to vector<16x8xf32>
    %cst_153 = arith.constant dense<0.000000e+00> : vector<16x8xf32>
    %331 = tpu.matmul %329, %330, %cst_153 {dimension_numbers = #tpu.dot_dimension_numbers<[1], [0], [0], [1], [0, 0, 1, 1], [], []>} : vector<16x16xf32>, vector<16x8xf32>, vector<16x8xf32> -> vector<16x8xf32>
    %332 = arith.truncf %331 : vector<16x8xf32> to vector<16x8xbf16>
    %333 = vector.extract_strided_slice %269 {offsets = [2, 0, 0], sizes = [1, 8, 32], strides = [1, 1, 1]} : vector<4x8x32xbf16> to vector<1x8x32xbf16>
    %334 = vector.shape_cast %333 : vector<1x8x32xbf16> to vector<8x32xbf16>
    %cst_154 = arith.constant dense<0.000000e+00> : vector<16x32xf32>
    %335 = tpu.matmul %332, %334, %cst_154 {dimension_numbers = #tpu.dot_dimension_numbers<[1], [0], [0], [1], [0, 0, 1, 1], [], []>} : vector<16x8xbf16>, vector<8x32xbf16>, vector<16x32xf32> -> vector<16x32xf32>
    %336 = arith.addf %314, %335 : vector<16x32xf32>
    %337 = vector.extract_strided_slice %265 {offsets = [0, 24], sizes = [16, 8], strides = [1, 1]} : vector<16x32xf32> to vector<16x8xf32>
    %cst_155 = arith.constant 0.353553385 : f32
    %338 = vector.broadcast %cst_155 : f32 to vector<16x8xf32>
    %339 = arith.mulf %337, %338 : vector<16x8xf32>
    %340 = vector.extract_strided_slice %266 {offsets = [0, 24], sizes = [16, 8], strides = [1, 1]} : vector<16x32xf32> to vector<16x8xf32>
    %cst_156 = arith.constant dense<0.000000e+00> : vector<16x16xf32>
    %341 = tpu.matmul %339, %340, %cst_156 {dimension_numbers = #tpu.dot_dimension_numbers<[1], [1], [0], [0], [0, 0, 1, 0], [], []>} : vector<16x8xf32>, vector<16x8xf32>, vector<16x16xf32> -> vector<16x16xf32>
    %cst_157 = arith.constant dense<0xFF800000> : vector<16xf32>
    %342 = vector.multi_reduction <maximumf>, %341, %cst_157 [1] : vector<16x16xf32> to vector<16xf32>
    %343 = vector.shape_cast %342 : vector<16xf32> to vector<16x1xf32>
    %344 = vector.broadcast %343 : vector<16x1xf32> to vector<16x16xf32>
    %345 = arith.subf %341, %344 : vector<16x16xf32>
    %346 = math.exp %345 : vector<16x16xf32>
    %cst_158 = arith.constant dense<0.000000e+00> : vector<16xf32>
    %347 = vector.multi_reduction <add>, %346, %cst_158 [1] : vector<16x16xf32> to vector<16xf32>
    %348 = vector.shape_cast %347 : vector<16xf32> to vector<16x1xf32>
    %349 = tpu.reciprocal %348 {approx = true} : vector<16x1xf32> -> vector<16x1xf32>
    %350 = vector.broadcast %349 : vector<16x1xf32> to vector<16x16xf32>
    %351 = arith.mulf %346, %350 : vector<16x16xf32>
    %352 = vector.extract_strided_slice %267 {offsets = [0, 24], sizes = [16, 8], strides = [1, 1]} : vector<16x32xf32> to vector<16x8xf32>
    %cst_159 = arith.constant dense<0.000000e+00> : vector<16x8xf32>
    %353 = tpu.matmul %351, %352, %cst_159 {dimension_numbers = #tpu.dot_dimension_numbers<[1], [0], [0], [1], [0, 0, 1, 1], [], []>} : vector<16x16xf32>, vector<16x8xf32>, vector<16x8xf32> -> vector<16x8xf32>
    %354 = arith.truncf %353 : vector<16x8xf32> to vector<16x8xbf16>
    %355 = vector.extract_strided_slice %269 {offsets = [3, 0, 0], sizes = [1, 8, 32], strides = [1, 1, 1]} : vector<4x8x32xbf16> to vector<1x8x32xbf16>
    %356 = vector.shape_cast %355 : vector<1x8x32xbf16> to vector<8x32xbf16>
    %cst_160 = arith.constant dense<0.000000e+00> : vector<16x32xf32>
    %357 = tpu.matmul %354, %356, %cst_160 {dimension_numbers = #tpu.dot_dimension_numbers<[1], [0], [0], [1], [0, 0, 1, 1], [], []>} : vector<16x8xbf16>, vector<8x32xbf16>, vector<16x32xf32> -> vector<16x32xf32>
    %358 = arith.addf %336, %357 : vector<16x32xf32>
    %c1_161 = arith.constant 1 : index
    %c0_162 = arith.constant 0 : index
    %c0_163 = arith.constant 0 : index
    %359 = vector.load %arg9[%c1_161, %c0_162, %c0_163] : memref<2x1x32xf32, #tpu.memory_space<vmem>>, vector<1x1x32xf32>
    %360 = vector.shape_cast %359 : vector<1x1x32xf32> to vector<1x32xf32>
    %361 = vector.broadcast %360 : vector<1x32xf32> to vector<16x32xf32>
    %362 = arith.addf %358, %361 : vector<16x32xf32>
    %363 = arith.addf %256, %362 : vector<16x32xf32>
    %c1_164 = arith.constant 1 : index
    %c0_165 = arith.constant 0 : index
    %c0_166 = arith.constant 0 : index
    %364 = vector.load %arg10[%c1_164, %c0_165, %c0_166] : memref<2x1x32xf32, #tpu.memory_space<vmem>>, vector<1x1x32xf32>
    %365 = vector.shape_cast %364 : vector<1x1x32xf32> to vector<1x32xf32>
    %c1_167 = arith.constant 1 : index
    %c0_168 = arith.constant 0 : index
    %c0_169 = arith.constant 0 : index
    %366 = vector.load %arg11[%c1_167, %c0_168, %c0_169] : memref<2x1x32xf32, #tpu.memory_space<vmem>>, vector<1x1x32xf32>
    %367 = vector.shape_cast %366 : vector<1x1x32xf32> to vector<1x32xf32>
    %cst_170 = arith.constant dense<0.000000e+00> : vector<16xf32>
    %368 = vector.multi_reduction <add>, %363, %cst_170 [1] : vector<16x32xf32> to vector<16xf32>
    %369 = vector.shape_cast %368 : vector<16xf32> to vector<16x1xf32>
    %cst_171 = arith.constant 3.200000e+01 : f32
    %370 = vector.broadcast %cst_171 : f32 to vector<16x1xf32>
    %371 = arith.divf %369, %370 : vector<16x1xf32>
    %372 = vector.broadcast %371 : vector<16x1xf32> to vector<16x32xf32>
    %373 = arith.subf %363, %372 : vector<16x32xf32>
    %374 = arith.mulf %373, %373 : vector<16x32xf32>
    %cst_172 = arith.constant dense<0.000000e+00> : vector<16xf32>
    %375 = vector.multi_reduction <add>, %374, %cst_172 [1] : vector<16x32xf32> to vector<16xf32>
    %376 = vector.shape_cast %375 : vector<16xf32> to vector<16x1xf32>
    %cst_173 = arith.constant 3.200000e+01 : f32
    %377 = vector.broadcast %cst_173 : f32 to vector<16x1xf32>
    %378 = arith.divf %376, %377 : vector<16x1xf32>
    %379 = vector.broadcast %371 : vector<16x1xf32> to vector<16x32xf32>
    %380 = arith.subf %363, %379 : vector<16x32xf32>
    %cst_174 = arith.constant 9.99999974E-6 : f32
    %381 = vector.broadcast %cst_174 : f32 to vector<16x1xf32>
    %382 = arith.addf %378, %381 : vector<16x1xf32>
    %383 = math.rsqrt %382 : vector<16x1xf32>
    %384 = vector.broadcast %383 : vector<16x1xf32> to vector<16x32xf32>
    %385 = arith.mulf %380, %384 : vector<16x32xf32>
    %386 = vector.broadcast %365 : vector<1x32xf32> to vector<16x32xf32>
    %387 = arith.mulf %385, %386 : vector<16x32xf32>
    %388 = vector.broadcast %367 : vector<1x32xf32> to vector<16x32xf32>
    %389 = arith.addf %387, %388 : vector<16x32xf32>
    %390 = arith.truncf %389 : vector<16x32xf32> to vector<16x32xbf16>
    %c1_175 = arith.constant 1 : index
    %c0_176 = arith.constant 0 : index
    %c0_177 = arith.constant 0 : index
    %391 = vector.load %arg12[%c1_175, %c0_176, %c0_177] : memref<2x32x1024xbf16, #tpu.memory_space<vmem>>, vector<1x32x1024xbf16>
    %392 = vector.shape_cast %391 : vector<1x32x1024xbf16> to vector<32x1024xbf16>
    %cst_178 = arith.constant dense<0.000000e+00> : vector<16x1024xf32>
    %393 = tpu.matmul %390, %392, %cst_178 {dimension_numbers = #tpu.dot_dimension_numbers<[1], [0], [0], [1], [0, 0, 1, 1], [], []>} : vector<16x32xbf16>, vector<32x1024xbf16>, vector<16x1024xf32> -> vector<16x1024xf32>
    %c1_179 = arith.constant 1 : index
    %c0_180 = arith.constant 0 : index
    %c0_181 = arith.constant 0 : index
    %394 = vector.load %arg13[%c1_179, %c0_180, %c0_181] : memref<2x1x1024xf32, #tpu.memory_space<vmem>>, vector<1x1x1024xf32>
    %395 = vector.shape_cast %394 : vector<1x1x1024xf32> to vector<1x1024xf32>
    %396 = vector.broadcast %395 : vector<1x1024xf32> to vector<16x1024xf32>
    %397 = arith.addf %393, %396 : vector<16x1024xf32>
    %cst_182 = arith.constant 0.000000e+00 : f32
    %398 = vector.broadcast %cst_182 : f32 to vector<16x1024xf32>
    %399 = arith.maximumf %397, %398 : vector<16x1024xf32>
    %400 = arith.truncf %399 : vector<16x1024xf32> to vector<16x1024xbf16>
    %c1_183 = arith.constant 1 : index
    %c0_184 = arith.constant 0 : index
    %c0_185 = arith.constant 0 : index
    %401 = vector.load %arg14[%c1_183, %c0_184, %c0_185] : memref<2x1024x32xbf16, #tpu.memory_space<vmem>>, vector<1x1024x32xbf16>
    %402 = vector.shape_cast %401 : vector<1x1024x32xbf16> to vector<1024x32xbf16>
    %cst_186 = arith.constant dense<0.000000e+00> : vector<16x32xf32>
    %403 = tpu.matmul %400, %402, %cst_186 {dimension_numbers = #tpu.dot_dimension_numbers<[1], [0], [0], [1], [0, 0, 1, 1], [], []>} : vector<16x1024xbf16>, vector<1024x32xbf16>, vector<16x32xf32> -> vector<16x32xf32>
    %c1_187 = arith.constant 1 : index
    %c0_188 = arith.constant 0 : index
    %c0_189 = arith.constant 0 : index
    %404 = vector.load %arg15[%c1_187, %c0_188, %c0_189] : memref<2x1x32xf32, #tpu.memory_space<vmem>>, vector<1x1x32xf32>
    %405 = vector.shape_cast %404 : vector<1x1x32xf32> to vector<1x32xf32>
    %406 = vector.broadcast %405 : vector<1x32xf32> to vector<16x32xf32>
    %407 = arith.addf %403, %406 : vector<16x32xf32>
    %408 = arith.addf %389, %407 : vector<16x32xf32>
    %c1_190 = arith.constant 1 : index
    %c0_191 = arith.constant 0 : index
    %c0_192 = arith.constant 0 : index
    %409 = vector.load %arg16[%c1_190, %c0_191, %c0_192] : memref<2x1x32xf32, #tpu.memory_space<vmem>>, vector<1x1x32xf32>
    %410 = vector.shape_cast %409 : vector<1x1x32xf32> to vector<1x32xf32>
    %c1_193 = arith.constant 1 : index
    %c0_194 = arith.constant 0 : index
    %c0_195 = arith.constant 0 : index
    %411 = vector.load %arg17[%c1_193, %c0_194, %c0_195] : memref<2x1x32xf32, #tpu.memory_space<vmem>>, vector<1x1x32xf32>
    %412 = vector.shape_cast %411 : vector<1x1x32xf32> to vector<1x32xf32>
    %cst_196 = arith.constant dense<0.000000e+00> : vector<16xf32>
    %413 = vector.multi_reduction <add>, %408, %cst_196 [1] : vector<16x32xf32> to vector<16xf32>
    %414 = vector.shape_cast %413 : vector<16xf32> to vector<16x1xf32>
    %cst_197 = arith.constant 3.200000e+01 : f32
    %415 = vector.broadcast %cst_197 : f32 to vector<16x1xf32>
    %416 = arith.divf %414, %415 : vector<16x1xf32>
    %417 = vector.broadcast %416 : vector<16x1xf32> to vector<16x32xf32>
    %418 = arith.subf %408, %417 : vector<16x32xf32>
    %419 = arith.mulf %418, %418 : vector<16x32xf32>
    %cst_198 = arith.constant dense<0.000000e+00> : vector<16xf32>
    %420 = vector.multi_reduction <add>, %419, %cst_198 [1] : vector<16x32xf32> to vector<16xf32>
    %421 = vector.shape_cast %420 : vector<16xf32> to vector<16x1xf32>
    %cst_199 = arith.constant 3.200000e+01 : f32
    %422 = vector.broadcast %cst_199 : f32 to vector<16x1xf32>
    %423 = arith.divf %421, %422 : vector<16x1xf32>
    %424 = vector.broadcast %416 : vector<16x1xf32> to vector<16x32xf32>
    %425 = arith.subf %408, %424 : vector<16x32xf32>
    %cst_200 = arith.constant 9.99999974E-6 : f32
    %426 = vector.broadcast %cst_200 : f32 to vector<16x1xf32>
    %427 = arith.addf %423, %426 : vector<16x1xf32>
    %428 = math.rsqrt %427 : vector<16x1xf32>
    %429 = vector.broadcast %428 : vector<16x1xf32> to vector<16x32xf32>
    %430 = arith.mulf %425, %429 : vector<16x32xf32>
    %431 = vector.broadcast %410 : vector<1x32xf32> to vector<16x32xf32>
    %432 = arith.mulf %430, %431 : vector<16x32xf32>
    %433 = vector.broadcast %412 : vector<1x32xf32> to vector<16x32xf32>
    %434 = arith.addf %432, %433 : vector<16x32xf32>
    %435 = arith.truncf %434 : vector<16x32xf32> to vector<16x32xbf16>
    %c2_201 = arith.constant 2 : index
    %c0_202 = arith.constant 0 : index
    %c0_203 = arith.constant 0 : index
    %436 = vector.load %arg18[%c2_201, %c0_202, %c0_203] : memref<5x32x32xbf16, #tpu.memory_space<vmem>>, vector<1x32x32xbf16>
    %437 = vector.shape_cast %436 : vector<1x32x32xbf16> to vector<32x32xbf16>
    %cst_204 = arith.constant dense<0.000000e+00> : vector<16x32xf32>
    %438 = tpu.matmul %435, %437, %cst_204 {dimension_numbers = #tpu.dot_dimension_numbers<[1], [0], [0], [1], [0, 0, 1, 1], [], []>} : vector<16x32xbf16>, vector<32x32xbf16>, vector<16x32xf32> -> vector<16x32xf32>
    %c0_205 = arith.constant 0 : index
    %c0_206 = arith.constant 0 : index
    %c0_207 = arith.constant 0 : index
    %439 = vector.load %arg18[%c0_205, %c0_206, %c0_207] : memref<5x32x32xbf16, #tpu.memory_space<vmem>>, vector<1x32x32xbf16>
    %440 = vector.shape_cast %439 : vector<1x32x32xbf16> to vector<32x32xbf16>
    %cst_208 = arith.constant dense<0.000000e+00> : vector<16x32xf32>
    %441 = tpu.matmul %435, %440, %cst_208 {dimension_numbers = #tpu.dot_dimension_numbers<[1], [0], [0], [1], [0, 0, 1, 1], [], []>} : vector<16x32xbf16>, vector<32x32xbf16>, vector<16x32xf32> -> vector<16x32xf32>
    %cst_209 = arith.constant dense<0.000000e+00> : vector<16x32xf32>
    %442 = tpu.matmul %7, %441, %cst_209 {dimension_numbers = #tpu.dot_dimension_numbers<[1], [0], [0], [1], [0, 0, 1, 1], [], []>} : vector<16x16xf32>, vector<16x32xf32>, vector<16x32xf32> -> vector<16x32xf32>
    %443 = arith.addf %438, %442 : vector<16x32xf32>
    %c1_210 = arith.constant 1 : index
    %c0_211 = arith.constant 0 : index
    %c0_212 = arith.constant 0 : index
    %444 = vector.load %arg18[%c1_210, %c0_211, %c0_212] : memref<5x32x32xbf16, #tpu.memory_space<vmem>>, vector<1x32x32xbf16>
    %445 = vector.shape_cast %444 : vector<1x32x32xbf16> to vector<32x32xbf16>
    %cst_213 = arith.constant dense<0.000000e+00> : vector<16x32xf32>
    %446 = tpu.matmul %435, %445, %cst_213 {dimension_numbers = #tpu.dot_dimension_numbers<[1], [0], [0], [1], [0, 0, 1, 1], [], []>} : vector<16x32xbf16>, vector<32x32xbf16>, vector<16x32xf32> -> vector<16x32xf32>
    %cst_214 = arith.constant dense<0.000000e+00> : vector<16x32xf32>
    %447 = tpu.matmul %12, %446, %cst_214 {dimension_numbers = #tpu.dot_dimension_numbers<[1], [0], [0], [1], [0, 0, 1, 1], [], []>} : vector<16x16xf32>, vector<16x32xf32>, vector<16x32xf32> -> vector<16x32xf32>
    %448 = arith.addf %443, %447 : vector<16x32xf32>
    %c3_215 = arith.constant 3 : index
    %c0_216 = arith.constant 0 : index
    %c0_217 = arith.constant 0 : index
    %449 = vector.load %arg18[%c3_215, %c0_216, %c0_217] : memref<5x32x32xbf16, #tpu.memory_space<vmem>>, vector<1x32x32xbf16>
    %450 = vector.shape_cast %449 : vector<1x32x32xbf16> to vector<32x32xbf16>
    %cst_218 = arith.constant dense<0.000000e+00> : vector<16x32xf32>
    %451 = tpu.matmul %435, %450, %cst_218 {dimension_numbers = #tpu.dot_dimension_numbers<[1], [0], [0], [1], [0, 0, 1, 1], [], []>} : vector<16x32xbf16>, vector<32x32xbf16>, vector<16x32xf32> -> vector<16x32xf32>
    %cst_219 = arith.constant dense<0.000000e+00> : vector<16x32xf32>
    %452 = tpu.matmul %17, %451, %cst_219 {dimension_numbers = #tpu.dot_dimension_numbers<[1], [0], [0], [1], [0, 0, 1, 1], [], []>} : vector<16x16xf32>, vector<16x32xf32>, vector<16x32xf32> -> vector<16x32xf32>
    %453 = arith.addf %448, %452 : vector<16x32xf32>
    %c4_220 = arith.constant 4 : index
    %c0_221 = arith.constant 0 : index
    %c0_222 = arith.constant 0 : index
    %454 = vector.load %arg18[%c4_220, %c0_221, %c0_222] : memref<5x32x32xbf16, #tpu.memory_space<vmem>>, vector<1x32x32xbf16>
    %455 = vector.shape_cast %454 : vector<1x32x32xbf16> to vector<32x32xbf16>
    %cst_223 = arith.constant dense<0.000000e+00> : vector<16x32xf32>
    %456 = tpu.matmul %435, %455, %cst_223 {dimension_numbers = #tpu.dot_dimension_numbers<[1], [0], [0], [1], [0, 0, 1, 1], [], []>} : vector<16x32xbf16>, vector<32x32xbf16>, vector<16x32xf32> -> vector<16x32xf32>
    %cst_224 = arith.constant dense<0.000000e+00> : vector<16x32xf32>
    %457 = tpu.matmul %22, %456, %cst_224 {dimension_numbers = #tpu.dot_dimension_numbers<[1], [0], [0], [1], [0, 0, 1, 1], [], []>} : vector<16x16xf32>, vector<16x32xf32>, vector<16x32xf32> -> vector<16x32xf32>
    %458 = arith.addf %453, %457 : vector<16x32xf32>
    %c0_225 = arith.constant 0 : index
    %c0_226 = arith.constant 0 : index
    %459 = vector.load %arg19[%c0_225, %c0_226] : memref<1x32xf32, #tpu.memory_space<vmem>>, vector<1x32xf32>
    %460 = vector.broadcast %459 : vector<1x32xf32> to vector<16x32xf32>
    %461 = arith.mulf %458, %460 : vector<16x32xf32>
    %c0_227 = arith.constant 0 : index
    %c0_228 = arith.constant 0 : index
    %462 = vector.load %arg20[%c0_227, %c0_228] : memref<1x32xf32, #tpu.memory_space<vmem>>, vector<1x32xf32>
    %463 = vector.broadcast %462 : vector<1x32xf32> to vector<16x32xf32>
    %464 = arith.addf %461, %463 : vector<16x32xf32>
    %465 = math.tanh %464 : vector<16x32xf32>
    %466 = arith.truncf %465 : vector<16x32xf32> to vector<16x32xbf16>
    %c2_229 = arith.constant 2 : index
    %c0_230 = arith.constant 0 : index
    %c0_231 = arith.constant 0 : index
    %467 = vector.load %arg21[%c2_229, %c0_230, %c0_231] : memref<5x32x128xbf16, #tpu.memory_space<vmem>>, vector<1x32x128xbf16>
    %468 = vector.shape_cast %467 : vector<1x32x128xbf16> to vector<32x128xbf16>
    %cst_232 = arith.constant dense<0.000000e+00> : vector<16x128xf32>
    %469 = tpu.matmul %466, %468, %cst_232 {dimension_numbers = #tpu.dot_dimension_numbers<[1], [0], [0], [1], [0, 0, 1, 1], [], []>} : vector<16x32xbf16>, vector<32x128xbf16>, vector<16x128xf32> -> vector<16x128xf32>
    %c0_233 = arith.constant 0 : index
    %c0_234 = arith.constant 0 : index
    %c0_235 = arith.constant 0 : index
    %470 = vector.load %arg21[%c0_233, %c0_234, %c0_235] : memref<5x32x128xbf16, #tpu.memory_space<vmem>>, vector<1x32x128xbf16>
    %471 = vector.shape_cast %470 : vector<1x32x128xbf16> to vector<32x128xbf16>
    %cst_236 = arith.constant dense<0.000000e+00> : vector<16x128xf32>
    %472 = tpu.matmul %466, %471, %cst_236 {dimension_numbers = #tpu.dot_dimension_numbers<[1], [0], [0], [1], [0, 0, 1, 1], [], []>} : vector<16x32xbf16>, vector<32x128xbf16>, vector<16x128xf32> -> vector<16x128xf32>
    %cst_237 = arith.constant dense<0.000000e+00> : vector<16x128xf32>
    %473 = tpu.matmul %7, %472, %cst_237 {dimension_numbers = #tpu.dot_dimension_numbers<[1], [0], [0], [1], [0, 0, 1, 1], [], []>} : vector<16x16xf32>, vector<16x128xf32>, vector<16x128xf32> -> vector<16x128xf32>
    %474 = arith.addf %469, %473 : vector<16x128xf32>
    %c1_238 = arith.constant 1 : index
    %c0_239 = arith.constant 0 : index
    %c0_240 = arith.constant 0 : index
    %475 = vector.load %arg21[%c1_238, %c0_239, %c0_240] : memref<5x32x128xbf16, #tpu.memory_space<vmem>>, vector<1x32x128xbf16>
    %476 = vector.shape_cast %475 : vector<1x32x128xbf16> to vector<32x128xbf16>
    %cst_241 = arith.constant dense<0.000000e+00> : vector<16x128xf32>
    %477 = tpu.matmul %466, %476, %cst_241 {dimension_numbers = #tpu.dot_dimension_numbers<[1], [0], [0], [1], [0, 0, 1, 1], [], []>} : vector<16x32xbf16>, vector<32x128xbf16>, vector<16x128xf32> -> vector<16x128xf32>
    %cst_242 = arith.constant dense<0.000000e+00> : vector<16x128xf32>
    %478 = tpu.matmul %12, %477, %cst_242 {dimension_numbers = #tpu.dot_dimension_numbers<[1], [0], [0], [1], [0, 0, 1, 1], [], []>} : vector<16x16xf32>, vector<16x128xf32>, vector<16x128xf32> -> vector<16x128xf32>
    %479 = arith.addf %474, %478 : vector<16x128xf32>
    %c3_243 = arith.constant 3 : index
    %c0_244 = arith.constant 0 : index
    %c0_245 = arith.constant 0 : index
    %480 = vector.load %arg21[%c3_243, %c0_244, %c0_245] : memref<5x32x128xbf16, #tpu.memory_space<vmem>>, vector<1x32x128xbf16>
    %481 = vector.shape_cast %480 : vector<1x32x128xbf16> to vector<32x128xbf16>
    %cst_246 = arith.constant dense<0.000000e+00> : vector<16x128xf32>
    %482 = tpu.matmul %466, %481, %cst_246 {dimension_numbers = #tpu.dot_dimension_numbers<[1], [0], [0], [1], [0, 0, 1, 1], [], []>} : vector<16x32xbf16>, vector<32x128xbf16>, vector<16x128xf32> -> vector<16x128xf32>
    %cst_247 = arith.constant dense<0.000000e+00> : vector<16x128xf32>
    %483 = tpu.matmul %17, %482, %cst_247 {dimension_numbers = #tpu.dot_dimension_numbers<[1], [0], [0], [1], [0, 0, 1, 1], [], []>} : vector<16x16xf32>, vector<16x128xf32>, vector<16x128xf32> -> vector<16x128xf32>
    %484 = arith.addf %479, %483 : vector<16x128xf32>
    %c4_248 = arith.constant 4 : index
    %c0_249 = arith.constant 0 : index
    %c0_250 = arith.constant 0 : index
    %485 = vector.load %arg21[%c4_248, %c0_249, %c0_250] : memref<5x32x128xbf16, #tpu.memory_space<vmem>>, vector<1x32x128xbf16>
    %486 = vector.shape_cast %485 : vector<1x32x128xbf16> to vector<32x128xbf16>
    %cst_251 = arith.constant dense<0.000000e+00> : vector<16x128xf32>
    %487 = tpu.matmul %466, %486, %cst_251 {dimension_numbers = #tpu.dot_dimension_numbers<[1], [0], [0], [1], [0, 0, 1, 1], [], []>} : vector<16x32xbf16>, vector<32x128xbf16>, vector<16x128xf32> -> vector<16x128xf32>
    %cst_252 = arith.constant dense<0.000000e+00> : vector<16x128xf32>
    %488 = tpu.matmul %22, %487, %cst_252 {dimension_numbers = #tpu.dot_dimension_numbers<[1], [0], [0], [1], [0, 0, 1, 1], [], []>} : vector<16x16xf32>, vector<16x128xf32>, vector<16x128xf32> -> vector<16x128xf32>
    %489 = arith.addf %484, %488 : vector<16x128xf32>
    %c0_253 = arith.constant 0 : index
    %c0_254 = arith.constant 0 : index
    %490 = vector.load %arg22[%c0_253, %c0_254] : memref<1x128xf32, #tpu.memory_space<vmem>>, vector<1x128xf32>
    %491 = vector.broadcast %490 : vector<1x128xf32> to vector<16x128xf32>
    %492 = arith.addf %489, %491 : vector<16x128xf32>
    %493 = arith.negf %492 : vector<16x128xf32>
    %494 = math.exp %493 : vector<16x128xf32>
    %cst_255 = arith.constant 1.000000e+00 : f32
    %495 = vector.broadcast %cst_255 : f32 to vector<16x128xf32>
    %496 = arith.addf %495, %494 : vector<16x128xf32>
    %497 = arith.divf %495, %496 : vector<16x128xf32>
    %c0_256 = arith.constant 0 : index
    %c0_257 = arith.constant 0 : index
    %498 = vector.load %arg23[%c0_256, %c0_257] : memref<16x128xf32, #tpu.memory_space<vmem>>, vector<16x128xf32>
    tpu.vector_store %arg23[%c0_256, %c0_257], %497 {strides = array<i32>} : memref<16x128xf32, #tpu.memory_space<vmem>>, vector<16x128xf32>,
    return
  }
  func.func @transform_0(%arg0: i32) -> (i32, i32) {
    %c0_i32 = arith.constant 0 : i32
    %c0_i32_0 = arith.constant 0 : i32
    return %arg0, %c0_i32 : i32, i32
  }
  func.func @transform_1(%arg0: i32) -> (i32, i32, i32) {
    %c0_i32 = arith.constant 0 : i32
    %c0_i32_0 = arith.constant 0 : i32
    %c0_i32_1 = arith.constant 0 : i32
    %c0_i32_2 = arith.constant 0 : i32
    return %c0_i32, %c0_i32_0, %c0_i32_1 : i32, i32, i32
  }
  func.func @transform_2(%arg0: i32) -> (i32, i32) {
    %c0_i32 = arith.constant 0 : i32
    %c0_i32_0 = arith.constant 0 : i32
    %c0_i32_1 = arith.constant 0 : i32
    return %c0_i32, %c0_i32_0 : i32, i32
  }
  func.func @transform_3(%arg0: i32) -> (i32, i32) {
    %c0_i32 = arith.constant 0 : i32
    %c0_i32_0 = arith.constant 0 : i32
    %c0_i32_1 = arith.constant 0 : i32
    return %c0_i32, %c0_i32_0 : i32, i32
  }
  func.func @transform_4(%arg0: i32) -> (i32, i32, i32) {
    %c0_i32 = arith.constant 0 : i32
    %c0_i32_0 = arith.constant 0 : i32
    %c0_i32_1 = arith.constant 0 : i32
    %c0_i32_2 = arith.constant 0 : i32
    return %c0_i32, %c0_i32_0, %c0_i32_1 : i32, i32, i32
  }
  func.func @transform_5(%arg0: i32) -> (i32, i32, i32) {
    %c0_i32 = arith.constant 0 : i32
    %c0_i32_0 = arith.constant 0 : i32
    %c0_i32_1 = arith.constant 0 : i32
    %c0_i32_2 = arith.constant 0 : i32
    return %c0_i32, %c0_i32_0, %c0_i32_1 : i32, i32, i32
  }
  func.func @transform_6(%arg0: i32) -> (i32, i32, i32) {
    %c0_i32 = arith.constant 0 : i32
    %c0_i32_0 = arith.constant 0 : i32
    %c0_i32_1 = arith.constant 0 : i32
    %c0_i32_2 = arith.constant 0 : i32
    return %c0_i32, %c0_i32_0, %c0_i32_1 : i32, i32, i32
  }
  func.func @transform_7(%arg0: i32) -> (i32, i32, i32, i32) {
    %c0_i32 = arith.constant 0 : i32
    %c0_i32_0 = arith.constant 0 : i32
    %c0_i32_1 = arith.constant 0 : i32
    %c0_i32_2 = arith.constant 0 : i32
    %c0_i32_3 = arith.constant 0 : i32
    return %c0_i32, %c0_i32_0, %c0_i32_1, %c0_i32_2 : i32, i32, i32, i32
  }
  func.func @transform_8(%arg0: i32) -> (i32, i32, i32) {
    %c0_i32 = arith.constant 0 : i32
    %c0_i32_0 = arith.constant 0 : i32
    %c0_i32_1 = arith.constant 0 : i32
    %c0_i32_2 = arith.constant 0 : i32
    return %c0_i32, %c0_i32_0, %c0_i32_1 : i32, i32, i32
  }
  func.func @transform_9(%arg0: i32) -> (i32, i32, i32) {
    %c0_i32 = arith.constant 0 : i32
    %c0_i32_0 = arith.constant 0 : i32
    %c0_i32_1 = arith.constant 0 : i32
    %c0_i32_2 = arith.constant 0 : i32
    return %c0_i32, %c0_i32_0, %c0_i32_1 : i32, i32, i32
  }
  func.func @transform_10(%arg0: i32) -> (i32, i32, i32) {
    %c0_i32 = arith.constant 0 : i32
    %c0_i32_0 = arith.constant 0 : i32
    %c0_i32_1 = arith.constant 0 : i32
    %c0_i32_2 = arith.constant 0 : i32
    return %c0_i32, %c0_i32_0, %c0_i32_1 : i32, i32, i32
  }
  func.func @transform_11(%arg0: i32) -> (i32, i32, i32) {
    %c0_i32 = arith.constant 0 : i32
    %c0_i32_0 = arith.constant 0 : i32
    %c0_i32_1 = arith.constant 0 : i32
    %c0_i32_2 = arith.constant 0 : i32
    return %c0_i32, %c0_i32_0, %c0_i32_1 : i32, i32, i32
  }
  func.func @transform_12(%arg0: i32) -> (i32, i32, i32) {
    %c0_i32 = arith.constant 0 : i32
    %c0_i32_0 = arith.constant 0 : i32
    %c0_i32_1 = arith.constant 0 : i32
    %c0_i32_2 = arith.constant 0 : i32
    return %c0_i32, %c0_i32_0, %c0_i32_1 : i32, i32, i32
  }
  func.func @transform_13(%arg0: i32) -> (i32, i32, i32) {
    %c0_i32 = arith.constant 0 : i32
    %c0_i32_0 = arith.constant 0 : i32
    %c0_i32_1 = arith.constant 0 : i32
    %c0_i32_2 = arith.constant 0 : i32
    return %c0_i32, %c0_i32_0, %c0_i32_1 : i32, i32, i32
  }
  func.func @transform_14(%arg0: i32) -> (i32, i32, i32) {
    %c0_i32 = arith.constant 0 : i32
    %c0_i32_0 = arith.constant 0 : i32
    %c0_i32_1 = arith.constant 0 : i32
    %c0_i32_2 = arith.constant 0 : i32
    return %c0_i32, %c0_i32_0, %c0_i32_1 : i32, i32, i32
  }
  func.func @transform_15(%arg0: i32) -> (i32, i32, i32) {
    %c0_i32 = arith.constant 0 : i32
    %c0_i32_0 = arith.constant 0 : i32
    %c0_i32_1 = arith.constant 0 : i32
    %c0_i32_2 = arith.constant 0 : i32
    return %c0_i32, %c0_i32_0, %c0_i32_1 : i32, i32, i32
  }
  func.func @transform_16(%arg0: i32) -> (i32, i32, i32) {
    %c0_i32 = arith.constant 0 : i32
    %c0_i32_0 = arith.constant 0 : i32
    %c0_i32_1 = arith.constant 0 : i32
    %c0_i32_2 = arith.constant 0 : i32
    return %c0_i32, %c0_i32_0, %c0_i32_1 : i32, i32, i32
  }
  func.func @transform_17(%arg0: i32) -> (i32, i32, i32) {
    %c0_i32 = arith.constant 0 : i32
    %c0_i32_0 = arith.constant 0 : i32
    %c0_i32_1 = arith.constant 0 : i32
    %c0_i32_2 = arith.constant 0 : i32
    return %c0_i32, %c0_i32_0, %c0_i32_1 : i32, i32, i32
  }
  func.func @transform_18(%arg0: i32) -> (i32, i32) {
    %c0_i32 = arith.constant 0 : i32
    %c0_i32_0 = arith.constant 0 : i32
    %c0_i32_1 = arith.constant 0 : i32
    return %c0_i32, %c0_i32_0 : i32, i32
  }
  func.func @transform_19(%arg0: i32) -> (i32, i32) {
    %c0_i32 = arith.constant 0 : i32
    %c0_i32_0 = arith.constant 0 : i32
    %c0_i32_1 = arith.constant 0 : i32
    return %c0_i32, %c0_i32_0 : i32, i32
  }
  func.func @transform_20(%arg0: i32) -> (i32, i32, i32) {
    %c0_i32 = arith.constant 0 : i32
    %c0_i32_0 = arith.constant 0 : i32
    %c0_i32_1 = arith.constant 0 : i32
    %c0_i32_2 = arith.constant 0 : i32
    return %c0_i32, %c0_i32_0, %c0_i32_1 : i32, i32, i32
  }
  func.func @transform_21(%arg0: i32) -> (i32, i32) {
    %c0_i32 = arith.constant 0 : i32
    %c0_i32_0 = arith.constant 0 : i32
    %c0_i32_1 = arith.constant 0 : i32
    return %c0_i32, %c0_i32_0 : i32, i32
  }
  func.func @transform_22(%arg0: i32) -> (i32, i32) {
    %c0_i32 = arith.constant 0 : i32
    %c0_i32_0 = arith.constant 0 : i32
    return %arg0, %c0_i32 : i32, i32
  }
}

</mosaic_0001>

<bundles_post_ra>
// kernel: custom_transformer_forward.1
= control target key start
LH: loop header
LB: loop body
LE: loop exit
PB: predicated region body
PF: predicated region fallthrough
CT: control target
= control target key end

     0   :  { %s7684_s0 = inlined_call_operand.vmem [shape: f32[32,4], index: 0, kind: input, shape index: {}]   ;;  %s7685_s1 = inlined_call_operand.vmem [shape: bf16[5,4,16], index: 1, kind: input, shape index: {}]   ;;  %s7686_s2 = inlined_call_operand.vmem [shape: f32[1,16], index: 2, kind: input, shape index: {}]   ;;  %s7687_s3 = inlined_call_operand.vmem [shape: f32[1,16], index: 3, kind: input, shape index: {}]   ;;  %s7688_s4 = inlined_call_operand.vmem [shape: bf16[5,16,32], index: 4, kind: input, shape index: {}]   ;;  %s7689_s5 = inlined_call_operand.vmem [shape: bf16[2,32,96], index: 5, kind: input, shape index: {}]   ;;  %s7690_s6 = inlined_call_operand.vmem [shape: f32[2,1,96], index: 6, kind: input, shape index: {}]   ;;  %s7691_s7 = inlined_call_operand.vmem [shape: bf16[2,4,8,32], index: 7, kind: input, shape index: {}]   ;;  %s7692_s8 = inlined_call_operand.vmem [shape: f32[2,1,32], index: 8, kind: input, shape index: {}]   ;;  %s7693_s9 = inlined_call_operand.vmem [shape: f32[2,1,32], index: 9, kind: input, shape index: {}]   ;;  %s7694_s10 = inlined_call_operand.vmem [shape: f32[2,1,32], index: 10, kind: input, shape index: {}]   ;;  %s7695_s11 = inlined_call_operand.vmem [shape: bf16[2,32,1024], index: 11, kind: input, shape index: {}]   ;;  %s7696_s12 = inlined_call_operand.vmem [shape: f32[2,1,1024], index: 12, kind: input, shape index: {}]   ;;  %s7697_s13 = inlined_call_operand.vmem [shape: bf16[2,1024,32], index: 13, kind: input, shape index: {}]   ;;  %s7698_s14 = inlined_call_operand.vmem [shape: f32[2,1,32], index: 14, kind: input, shape index: {}]   ;;  %s7699_s15 = inlined_call_operand.vmem [shape: f32[2,1,32], index: 15, kind: input, shape index: {}]   ;;  %s7700_s16 = inlined_call_operand.vmem [shape: f32[2,1,32], index: 16, kind: input, shape index: {}]   ;;  %s7701_s17 = inlined_call_operand.vmem [shape: bf16[5,32,32], index: 17, kind: input, shape index: {}]   ;;  %s7702_s18 = inlined_call_operand.vmem [shape: f32[1,32], index: 18, kind: input, shape index: {}]   ;;  %s7703_s19 = inlined_call_operand.vmem [shape: f32[1,32], index: 19, kind: input, shape index: {}]   ;;  %s7704_s20 = inlined_call_operand.vmem [shape: bf16[5,32,128], index: 20, kind: input, shape index: {}]   ;;  %s7705_s21 = inlined_call_operand.vmem [shape: f32[1,128], index: 21, kind: input, shape index: {}]   ;;  %s7706_s22 = inlined_call_operand.vmem [shape: f32[32,128], index: 22, kind: output, shape index: {}]  }
   0x1   :  { %7732 = sst [smem:[#allocation2_spill]] %s7684_s0 }
   0x2   :  { %7733 = sst [smem:[#allocation3_spill]] %s7685_s1 }
   0x3   :  { %7734 = sst [smem:[#allocation4_spill]] %s7686_s2 }
   0x4   :  { %7735 = sst [smem:[#allocation5_spill]] %s7687_s3  ;;  %s6480_s3 = smov 0  }
   0x5   :  { %7736 = sst [smem:[#allocation6_spill]] %s7688_s4 }
   0x6   :  { %7737 = sst [smem:[#allocation7_spill]] %s7689_s5 }
   0x7   :  { %7738 = sst [smem:[#allocation8_spill]] %s7690_s6 }
   0x8 LB: > { %s4870_s28 = sadd.s32 4294967295, %s6350_s3   ;;  %p4874_p0 = scmp.ge.s32.totalorder %s6350_s3, 1  ;;  %s6350_s3 = sphi %s6480_s3, %s32_s3  }
   0x9   : > { %p613_p1 = scmp.lt.s32.totalorder %s6350_s3, 3 }
   0xb   : > { %p614_p2 = pnand %p4874_p0, %p613_p1 }
   0xc   : > { %s7739_s4 = sld [smem:[#allocation3_spill]] (!%p614_p2)  ;;  %s4875_s0 = sshll.u32 (!%p614_p2), %s4870_s28, 1 }
   0xd   : > { %617 = sbr.rel (%p614_p2) target bundleno = 6472 (0x1948), region = 108  ;;  %p676_p3 = scmp.lt.s32.totalorder (!%p614_p2), %s4875_s0, 3 }
   0xe   : > { %s7740_s24 = sld [smem:[#allocation2_spill]] (!%p614_p2)  ;;  %s7728_s2 = smov (!%p614_p2), 96  }
   0xf   : > { %s7742_s5 = sld [smem:[#allocation4_spill]] (!%p614_p2)  ;;  %s7725_s27 = smov (!%p614_p2), 88  }
  0x10   : > { %s7743_s26 = sld [smem:[#allocation5_spill]] (!%p614_p2)  ;;  %s7723_s28 = smov (!%p614_p2), 120  }
  0x11   : > { %s7744_s30 = sld [smem:[#allocation7_spill]] (!%p614_p2)  ;;  %s7721_s29 = smov (!%p614_p2), 80  }
  0x12   : > { %v730_v0 = vld [vmem:[%s7739_s4] sm:$0x3]  ;;  %vm735_vm0 = vcmask 1041408   ;;  %s7759_s0 = smov (!%p676_p3, %s4875_s0), 3  ;;  %vm731_vm1 = vcmask 31744   ;;  %v690_v7 = vlaneseq  ;;  %v6352_v18 = vmov 0.0  }
  0x13   : > { %v737_v1 = vsel %vm735_vm0, %v730_v0, 0  ;;  %s7711_s23 = sshll.u32 %s7759_s0, 3  ;;  %v4887_v5 = vld [vmem:[%s7739_s4 + $0x4] sm:$0x3]  ;;  %v4892_v14 = vld [vmem:[%s7739_s4 + $0x2] sm:$0x3] }
  0x14   : > { %746 = vmatpush.bf16.msra.mxu0 %v737_v1  ;;  %s679_s6 = scalar_lea.vmem %s7740_s24, %s7711_s23  ;;  %v784_v6 = vsel %vm735_vm0, %v4887_v5, 0  ;;  %v691_v8 = vshrl.u32 %v690_v7, 7  ;;  %v6508_v11 = vand.u32 127, %v690_v7  ;;  %v4896_v15 = vld [vmem:[%s7739_s4 + $0x6] sm:$0x3]  ;;  %vm753_vm4 = vcmask 130048  }
  0x15   : > { %v688_v2 = vld [vmem:[%s679_s6] sm:$0xff]  ;;  %v689_v3 = vld [vmem:[%s679_s6 + $0x8] sm:$0xff]  ;;  %793 = vmatpush.bf16.msra.mxu2 %v784_v6  ;;  %v803_v21 = vsel %vm735_vm0, %v4892_v14, 0  ;;  %v853_v22 = vsel %vm735_vm0, %v4896_v15, 0  ;;  %s7741_s6 = sld [smem:[#allocation6_spill]]  ;;  %vm1201_vm11 = vcmask 261120  }
  0x16   : > { %v727_v4 = vpack.c.bf16 %v689_v3, %v688_v2  ;;  %v6506_v9 = vadd.s32 8, %v691_v8  ;;  %v695_v13 = vadd.s32 4294967294, %v691_v8  ;;  %v4900_v17 = vld [vmem:[%s7739_s4 + $0x8] sm:$0x3]  ;;  %v703_v28 = vadd.s32 4294967295, %v691_v8  ;;  %s7712_s1 = smov 72  }
  0x17   : > { %v903_v23 = vsel %vm735_vm0, %v4900_v17, 0  ;;  %v711_v33 = vadd.s32 1, %v691_v8  ;;  %v719_v38 = vadd.s32 2, %v691_v8  ;;  %v6231_v59 = vld [vmem:[%s7742_s5] ss:$0 sm:$0xff]  ;;  %vm1231_vm12 = vcmask 64512  }
  0x18   : > { %4888 = vmatmul.msk.bf16.vlgmr.msra.gmra.mxu0 %vm731_vm1, %v727_v4  ;;  %4891 = vmatmul.msk.bf16.vlgmr.msra.gmra.mxu2 %vm731_vm1, %v727_v4  ;;  %v696_v12 = vadd.s32 4294967294, %v6506_v9  ;;  %vm697_vm3 = vcmp.eq.s32.totalorder %v6508_v11, %v695_v13  ;;  %v704_v29 = vadd.s32 4294967295, %v6506_v9  ;;  %vm705_vm5 = vcmp.eq.s32.totalorder %v6508_v11, %v703_v28  ;;  %v6232_v63 = vld [vmem:[%s7743_s26] ss:$0 sm:$0xff]  ;;  %s7745_s26 = sld [smem:[#allocation8_spill]]  ;;  %s7714_s5 = smov 104  }
  0x19   : > { %v6524_v20 = vsel %vm697_vm3, 1.0, %v6352_v18  ;;  %v6539_v31 = vsel %vm705_vm5, 1.0, %v6352_v18  ;;  %vm713_vm7 = vcmp.eq.s32.totalorder %v6508_v11, %v711_v33  ;;  %v712_v37 = vadd.s32 1, %v6506_v9  ;;  %s7727_s24 = smov 64   ;;  %s7719_s25 = smov 112  }
  0x1a   : > { %vm698_vm2 = vcmp.eq.s32.totalorder %v6508_v11, %v696_v12  ;;  %vm706_vm6 = vcmp.eq.s32.totalorder %v6508_v11, %v704_v29  ;;  %v6548_v36 = vsel %vm713_vm7, 1.0, %v6352_v18  ;;  %vm721_vm9 = vcmp.eq.s32.totalorder %v6508_v11, %v719_v38  ;;  %s7718_s23 = smov 56   ;;  %s7750_s4 = smov 80  }
  0x1b   : > { %v6522_v19 = vsel %vm698_vm2, 1.0, %v6352_v18  ;;  %v6541_v32 = vsel %vm706_vm6, 1.0, %v6352_v18  ;;  %vm714_vm8 = vcmp.eq.s32.totalorder %v6508_v11, %v712_v37  ;;  %v6557_v41 = vsel %vm721_vm9, 1.0, %v6352_v18  ;;  %v5978_v46 = vld [vmem:[%s7741_s6] sm:$0xff]  ;;  %v5977_v47 = vld [vmem:[%s7741_s6 + $0x10] sm:$0xff]  ;;  %v5979_v48 = vld [vmem:[%s7741_s6 + $0x8] sm:$0xff] }
  0x1c   : > { %v6555_v40 = vsel %vm714_vm8, 1.0, %v6352_v18  ;;  %v720_v42 = vadd.s32 2, %v6506_v9  ;;  %v5981_v49 = vld [vmem:[%s7741_s6 + $0x20] sm:$0xff]  ;;  %v5980_v13 = vld [vmem:[%s7741_s6 + $0x18] sm:$0xff]  ;;  %vm1423_vm13 = vcmask 1043456   ;;  %s7751_s6 = smov 112  }
  0x1e   : > { %vm722_vm10 = vcmp.eq.s32.totalorder %v6508_v11, %v720_v42 }
  0x1f   : > { %v6565_v43 = vsel %vm722_vm10, 1.0, %v6352_v18 }
  0x95   : > { %v748_v10 = vpop.f32.mrf.mxu0 }
  0x9b   : > { %v795_v44 = vpop.f32.mrf.mxu2 }
  0x9d   : > { %v750_v16 = vpop.f32.mrf.mxu0 }
  0x9e   : > { %774 = vmatpush.msra.mxu1 %v750_v16  ;;  %6166 = vmatpush.msra.mxu3 %v750_v16 }
  0xa0   : > { %775 = vmatpush.msra.mxu1 %v748_v10  ;;  %6167 = vmatpush.msra.mxu3 %v748_v10 }
  0xa1   : > { %4890 = vmatmul.msk.f32.vlgmr.msra.gmra.mxu3 %vm753_vm4, %v6522_v19  ;;  %4889 = vmatmul.msk.f32.vlgmr.msra.gmra.mxu1 %vm753_vm4, %v6524_v20 }
  0xa2   : > { %812 = vmatpush.bf16.msrb.mxu3 %v803_v21  ;;  %862 = vmatpush.bf16.msrb.mxu1 %v853_v22  ;;  %v5983_v22 = vld [vmem:[%s7744_s30 + $0x8] sm:$0xff] }
  0xa3   : > { %v797_v45 = vpop.f32.mrf.mxu2 }
  0xa6   : > { %912 = vmatpush.bf16.msra.mxu3 %v903_v23  ;;  %986 = vmatpush.bf16.msra.mxu1 %v5978_v46  ;;  %v5982_v23 = vld [vmem:[%s7744_s30] sm:$0xff] }
  0xa9   : > { %4893 = vmatmul.msk.bf16.vlgmr.msrb.gmra.mxu3 %vm731_vm1, %v727_v4  ;;  %4897 = vmatmul.msk.bf16.vlgmr.msrb.gmra.mxu1 %vm731_vm1, %v727_v4 }
  0xaa   : > { %1029 = vmatpush.bf16.msrb.mxu3 %v5977_v47 }
  0xb9   : > { %4901 = vmatmul.msk.bf16.vlgmr.msra.gmra.mxu3 %vm731_vm1, %v727_v4 }
 0x11e   : > { %v777_v24 = vpop.f32.mrf.mxu1 }
 0x11f   : > { %v796_v52 = vadd.f32 %v795_v44, %v777_v24 }
 0x124   : > { %v780_v25 = vpop.f32.mrf.mxu3 }
 0x125   : > { %v798_v57 = vadd.f32 %v797_v45, %v780_v25 }
 0x126   : > { %v864_v27 = vpop.f32.mrf.mxu1 }
 0x12c   : > { %v814_v26 = vpop.f32.mrf.mxu3 }
 0x12e   : > { %v866_v34 = vpop.f32.mrf.mxu1 }
 0x134   : > { %v816_v30 = vpop.f32.mrf.mxu3 }
 0x135   : > { %839 = vmatpush.msrb.mxu0 %v816_v30  ;;  %6168 = vmatpush.msrb.mxu2 %v816_v30 }
 0x137   : > { %840 = vmatpush.msrb.mxu0 %v814_v26  ;;  %6169 = vmatpush.msrb.mxu2 %v814_v26 }
 0x138   : > { %4894 = vmatmul.msk.f32.vlgmr.msrb.gmra.mxu0 %vm753_vm4, %v6539_v31  ;;  %4895 = vmatmul.msk.f32.vlgmr.msrb.gmra.mxu2 %vm753_vm4, %v6541_v32 }
 0x139   : > { %889 = vmatpush.msra.mxu2 %v866_v34 }
 0x13b   : > { %890 = vmatpush.msra.mxu2 %v864_v27 }
 0x13c   : > { %v914_v35 = vpop.f32.mrf.mxu3 }
 0x140   : > { %4898 = vmatmul.msk.f32.vlgmr.msra.gmra.mxu2 %vm753_vm4, %v6548_v36 }
 0x144   : > { %v916_v39 = vpop.f32.mrf.mxu3 }
 0x145   : > { %939 = vmatpush.msra.mxu0 %v916_v39 }
 0x147   : > { %940 = vmatpush.msra.mxu0 %v914_v35 }
 0x148   : > { %4899 = vmatmul.msk.f32.gmra.mxu2 %vm753_vm4, %v6555_v40  ;;  %4902 = vmatmul.msk.f32.vlgmr.msra.gmra.mxu0 %vm753_vm4, %v6557_v41 }
 0x149   : > { %1052 = vmatpush.bf16.msrb.mxu0 %v5979_v48  ;;  %v6233_v48 = vld [vmem:[%s7745_s26] ss:$0 sm:$0xff] }
 0x14d   : > { %1148 = vmatpush.bf16.msra.mxu0 %v5981_v49 }
 0x150   : > { %4903 = vmatmul.msk.f32.gmra.mxu0 %vm753_vm4, %v6565_v43 }
 0x1b5   : > { %v842_v51 = vpop.f32.mrf.mxu0 }
 0x1b6   : > { %v848_v53 = vadd.f32 %v842_v51, %v796_v52 }
 0x1bb   : > { %v845_v50 = vpop.f32.mrf.mxu2 }
 0x1bc   : > { %v849_v60 = vadd.f32 %v845_v50, %v798_v57 }
 0x1c3   : > { %v892_v54 = vpop.f32.mrf.mxu2 }
 0x1c4   : > { %v898_v55 = vadd.f32 %v892_v54, %v848_v53 }
 0x1c5   : > { %v942_v56 = vpop.f32.mrf.mxu0 }
 0x1c6   : > { %v948_v58 = vadd.f32 %v942_v56, %v898_v55 }
 0x1c8   : > { %v954_v62 = vmul.f32 %v6231_v59, %v948_v58 }
 0x1ca   : > { %v960_v3 = vadd.f32 %v6232_v63, %v954_v62 }
 0x1cb   : > { %v895_v61 = vpop.f32.mrf.mxu2 }
 0x1cc   : > { %v899_v0 = vadd.f32 %v895_v61, %v849_v60  ;;  %v962_v6 = vmax.f32 %v960_v3, 0.0 }
 0x1cd   : > { %v945_v1 = vpop.f32.mrf.mxu0 }
 0x1ce   : > { %v949_v2 = vadd.f32 %v945_v1, %v899_v0 }
 0x1d0   : > { %v955_v4 = vmul.f32 %v6231_v59, %v949_v2 }
 0x1d2   : > { %v961_v5 = vadd.f32 %v6232_v63, %v955_v4 }
 0x1d4   : > { %v963_v7 = vmax.f32 %v961_v5, 0.0 }
 0x1d6   : > { %v964_v8 = vpack.c.bf16 %v963_v7, %v962_v6 }
 0x1d8   : > { %4910 = vmatmul.msk.bf16.vlgmr.msra.gmra.mxu1 %vm753_vm4, %v964_v8  ;;  %4917 = vmatmul.msk.bf16.vlgmr.msrb.gmra.mxu3 %vm753_vm4, %v964_v8 }
 0x1d9   : > { %4924 = vmatmul.msk.bf16.vlgmr.msrb.gmra.mxu0 %vm753_vm4, %v964_v8 }
 0x1e9   : > { %4942 = vmatmul.msk.bf16.vlgmr.msra.gmra.mxu0 %vm753_vm4, %v964_v8 }
 0x255   : > { %v988_v9 = vpop.f32.mrf.mxu1 }
 0x256   : > { %v1054_v10 = vpop.f32.mrf.mxu0 }
 0x25b   : > { %v1031_v25 = vpop.f32.mrf.mxu3 }
 0x25d   : > { %v990_v11 = vpop.f32.mrf.mxu1 }
 0x25e   : > { %v1056_v12 = vpop.f32.mrf.mxu0  ;;  %1007 = vmatpush.msrb.mxu2 %v990_v11 }
 0x25f   : > { %1073 = vmatpush.msrb.mxu1 %v1056_v12 }
 0x260   : > { %1008 = vmatpush.msrb.mxu2 %v988_v9 }
 0x261   : > { %1074 = vmatpush.msrb.mxu1 %v1054_v10  ;;  %4911 = vmatmul.msk.f32.vlgmr.msrb.gmra.mxu2 %vm753_vm4, %v6524_v20 }
 0x262   : > { %4925 = vmatmul.msk.f32.vlgmr.msrb.gmra.mxu1 %vm753_vm4, %v6539_v31  ;;  %1100 = vmatpush.bf16.msra.mxu2 %v5980_v13 }
 0x263   : > { %v1033_v27 = vpop.f32.mrf.mxu3 }
 0x266   : > { %v1150_v14 = vpop.f32.mrf.mxu0  ;;  %1211 = vmatpush.bf16.msrb.mxu2 %v5983_v22 }
 0x269   : > { %4912 = vmatmul.msk.f32.gmra.mxu2 %vm753_vm4, %v6522_v19 }
 0x26a   : > { %4926 = vmatmul.msk.f32.gmra.mxu1 %vm753_vm4, %v6541_v32  ;;  %1212 = vmatpush.bf16.msrb.mxu2 %v5982_v23 }
 0x26e   : > { %v1152_v15 = vpop.f32.mrf.mxu0 }
 0x26f   : > { %1169 = vmatpush.msra.mxu1 %v1152_v15  ;;  %v1219_v15 = vld [vmem:[%s7691_s7] sm:$0xf] }
 0x271   : > { %1170 = vmatpush.msra.mxu1 %v1150_v14  ;;  %4933 = vmatmul.msk.bf16.vlgmr.msra.gmra.mxu2 %vm753_vm4, %v964_v8 }
 0x272   : > { %4943 = vmatmul.msk.f32.vlgmr.msra.gmra.mxu1 %vm753_vm4, %v6557_v41 }
 0x27a   : > { %4944 = vmatmul.msk.f32.gmra.mxu1 %vm753_vm4, %v6565_v43 }
 0x2df   : > { %v1076_v24 = vpop.f32.mrf.mxu1 }
 0x2e4   : > { %v1010_v16 = vpop.f32.mrf.mxu2 }
 0x2e5   : > { %v1032_v30 = vadd.f32 %v1031_v25, %v1010_v16 }
 0x2e7   : > { %v1079_v26 = vpop.f32.mrf.mxu1  ;;  %v1082_v34 = vadd.f32 %v1076_v24, %v1032_v30 }
 0x2ec   : > { %v1013_v17 = vpop.f32.mrf.mxu2 }
 0x2ed   : > { %v1034_v33 = vadd.f32 %v1033_v27, %v1013_v17 }
 0x2ef   : > { %v1172_v28 = vpop.f32.mrf.mxu1  ;;  %v1083_v35 = vadd.f32 %v1079_v26, %v1034_v33 }
 0x2f4   : > { %v1102_v18 = vpop.f32.mrf.mxu2 }
 0x2f7   : > { %v1175_v39 = vpop.f32.mrf.mxu1 }
 0x2fc   : > { %v1104_v21 = vpop.f32.mrf.mxu2 }
 0x2fd   : > { %1121 = vmatpush.msra.mxu3 %v1104_v21 }
 0x2ff   : > { %1122 = vmatpush.msra.mxu3 %v1102_v18  ;;  %v1445_v18 = vsel %vm1423_vm13, %v1219_v15, 0 }
 0x300   : > { %4934 = vmatmul.msk.f32.vlgmr.msra.gmra.mxu3 %vm753_vm4, %v6548_v36 }
 0x308   : > { %4935 = vmatmul.msk.f32.gmra.mxu3 %vm753_vm4, %v6555_v40 }
 0x383   : > { %v1124_v29 = vpop.f32.mrf.mxu3 }
 0x384   : > { %v1130_v37 = vadd.f32 %v1124_v29, %v1082_v34 }
 0x386   : > { %v6617_v44 = vadd.f32 %v1172_v28, %v1130_v37 }
 0x38b   : > { %v1127_v38 = vpop.f32.mrf.mxu3 }
 0x38c   : > { %v1131_v42 = vadd.f32 %v1127_v38, %v1083_v35 }
 0x38e   : > { %v6619_v45 = vadd.f32 %v1175_v39, %v1131_v42 }
 0x390   : > { %v1180_v46 = vpack.c.bf16 %v6619_v45, %v6617_v44 }
 0x392   : > { %4953 = vmatmul.msk.bf16.vlgmr.msrb.gmra.mxu2 %vm1201_vm11, %v1180_v46 }
 0x415   : > { %v1214_v47 = vpop.f32.mrf.mxu2 }
 0x416   : > { %v1215_v51 = vadd.f32 %v6233_v48, %v1214_v47 }
 0x418   : > { %v1223_v54 = vmul.f32 0.35355338, %v1215_v51 }
 0x41d   : > { %v1216_v49 = vpop.f32.mrf.mxu2 }
 0x41e   : > { %v1217_v50 = vadd.f32 %v6233_v48, %v1216_v49 }
 0x420   : > { %1229 = vrot.lane.b32.xlu0 %v1217_v50, %s7728_s2  ;;  %v1224_v55 = vmul.f32 0.35355338, %v1217_v50  ;;  %v6643_v7 = vpack.i.bf16 %v1215_v51, %v1217_v50 }
 0x428   : > { %1227 = vrot.lane.b32.xlu0 %v1215_v51, %s7728_s2  ;;  %s7752_s2 = smov 104  }
 0x492   : > { %v1230_v52 = vpop.permute.xlu0 %1229 }
 0x493   : > { %4954 = vmatpush.xpose.msk.msrb.mxu3 %vm1231_vm12, %v1230_v52 }
 0x49a   : > { %v1228_v53 = vpop.permute.xlu0 %1227 }
 0x49b   : > { %4955 = vmatpush.xpose.msk.msrb.mxu3 %vm1231_vm12, %v1228_v53 }
 0x49e   : > { %4956 = vmatmul.msk.f32.vlgmr.msrb.gmra.mxu3 %vm1231_vm12, %v1223_v54 }
 0x4a6   : > { %4957 = vmatmul.msk.f32.gmra.mxu3 %vm1231_vm12, %v1224_v55 }
 0x521   : > { %v1259_v56 = vpop.f32.mrf.mxu3 }
 0x522   : > { %v1265_v57 = vsel %vm753_vm4, %v1259_v56, -inf }
 0x523   : > { %1266 = vmax.xlane.f32.xlu1 %v1265_v57 }
 0x529   : > { %v1262_v58 = vpop.f32.mrf.mxu3 }
 0x52a   : > { %v1268_v59 = vsel %vm753_vm4, %v1262_v58, -inf }
 0x52b   : > { %1269 = vmax.xlane.f32.xlu1 %v1268_v59 }
 0x544   : > { %1329 = vrot.lane.b32.xlu1 %v1217_v50, %s7725_s27 }
 0x54c   : > { %1325 = vrot.lane.b32.xlu1 %v1224_v55, %s7723_s28 }
 0x554   : > { %1465 = vrot.lane.b32.xlu1 %v1215_v51, %s7721_s29 }
 0x55c   : > { %1586 = vrot.lane.b32.xlu1 %v1217_v50, %s7712_s1 }
 0x564   : > { %1580 = vrot.lane.b32.xlu1 %v1223_v54, %s7714_s5 }
 0x596   : > { %v1267_v60 = vpop.xlane.xlu1 %1266 }
 0x597   : > { %v1271_v61 = vsub.f32 %v1259_v56, %v1267_v60 }
 0x599   : > { %v1273_v62 = vmul.f32 1.442695, %v1271_v61 }
 0x59b   : > { %6250 = vpow2.f32 %v1273_v62 }
 0x59e   : > { %v1270_v63 = vpop.xlane.xlu1 %1269 }
 0x59f   : > { %v1272_v0 = vsub.f32 %v1262_v58, %v1270_v63 }
 0x5a1   : > { %v6251_v1 = vpop.eup %6250  ;;  %v1275_v2 = vmul.f32 1.442695, %v1272_v0 }
 0x5a2   : > { %v1277_v3 = vsel %vm753_vm4, %v6251_v1, 0.0 }
 0x5a3   : > { %6252 = vpow2.f32 %v1275_v2  ;;  %1278 = vadd.xlane.f32.xlu2 %v1277_v3 }
 0x5a9   : > { %v6253_v4 = vpop.eup %6252 }
 0x5aa   : > { %v1280_v5 = vsel %vm753_vm4, %v6253_v4, 0.0 }
 0x5ab   : > { %1281 = vadd.xlane.f32.xlu0 %v1280_v5 }
 0x5b6   : > { %v1330_v6 = vpop.permute.xlu1 %1329 }
 0x5b7   : > { %4960 = vmatpush.xpose.msk.msrb.mxu1 %vm1231_vm12, %v1330_v6 }
 0x5bb   : > { %6192 = vrot.lane.b32.xlu2 %v6643_v7, %s7727_s24 }
 0x5be   : > { %v1326_v8 = vpop.permute.xlu1 %1325 }
 0x5bf   : > { %1584 = vrot.lane.b32.xlu0 %v1215_v51, %s7712_s1  ;;  %s7716_s1 = smov 40  }
 0x5c3   : > { %1327 = vrot.lane.b32.xlu2 %v1215_v51, %s7725_s27  ;;  %s7753_s27 = smov 72  }
 0x5c6   : > { %v1466_v10 = vpop.permute.xlu1 %1465 }
 0x5cb   : > { %1323 = vrot.lane.b32.xlu2 %v1223_v54, %s7723_s28  ;;  %s7748_s28 = smov 88  }
 0x5ce   : > { %v1587_v21 = vpop.permute.xlu1 %1586 }
 0x5d3   : > { %1467 = vrot.lane.b32.xlu2 %v1217_v50, %s7721_s29  ;;  %s7749_s29 = smov 120  }
 0x5d6   : > { %v1581_v42 = vpop.permute.xlu1 %1580 }
 0x5db   : > { %1461 = vrot.lane.b32.xlu2 %v1223_v54, %s7719_s25 }
 0x5e3   : > { %1463 = vrot.lane.b32.xlu2 %v1224_v55, %s7719_s25  ;;  %s7747_s25 = smov 64  }
 0x5eb   : > { %1582 = vrot.lane.b32.xlu2 %v1224_v55, %s7714_s5  ;;  %s7717_s5 = smov 48  }
 0x616   : > { %v1279_v9 = vpop.xlane.xlu2 %1278 }
 0x617   : > { %6254 = vrcp.f32 %v1279_v9 }
 0x61d   : > { %v6255_v13 = vpop.eup %6254 }
 0x61e   : > { %v6193_v11 = vpop.permute.xlu2 %6192  ;;  %v1282_v12 = vpop.xlane.xlu0 %1281  ;;  %v1285_v17 = vmul.f32 %v6255_v13, %v6251_v1 }
 0x61f   : > { %v6194_v14 = vunpack.i.l.bf16 %v6193_v11  ;;  %v6195_v16 = vunpack.i.h.bf16 %v6193_v11  ;;  %6256 = vrcp.f32 %v1282_v12 }
 0x621   : > { %1313 = vmatpush.msrb.mxu0 %v6194_v14 }
 0x623   : > { %1314 = vmatpush.msrb.mxu0 %v6195_v16 }
 0x624   : > { %4958 = vmatmul.msk.f32.vlgmr.msrb.gmra.mxu0 %vm753_vm4, %v1285_v17 }
 0x625   : > { %1454 = vmatpush.bf16.msra.mxu0 %v1445_v18  ;;  %v6257_v23 = vpop.eup %6256 }
 0x626   : > { %v1328_v22 = vpop.permute.xlu2 %1327  ;;  %v1286_v24 = vmul.f32 %v6257_v23, %v6253_v4 }
 0x627   : > { %4961 = vmatpush.xpose.msk.msrb.mxu1 %vm1231_vm12, %v1328_v22 }
 0x629   : > { %4975 = vmatpush.xpose.msk.msrb.mxu0 %vm1231_vm12, %v1587_v21 }
 0x62c   : > { %4959 = vmatmul.msk.f32.gmra.mxu0 %vm753_vm4, %v1286_v24 }
 0x62e   : > { %v1324_v25 = vpop.permute.xlu2 %1323 }
 0x62f   : > { %4962 = vmatmul.msk.f32.vlgmr.msrb.gmra.mxu1 %vm1231_vm12, %v1324_v25 }
 0x631   : > { %v1585_v26 = vpop.permute.xlu0 %1584 }
 0x632   : > { %4976 = vmatpush.xpose.msk.msrb.mxu0 %vm1231_vm12, %v1585_v26 }
 0x636   : > { %v1468_v27 = vpop.permute.xlu2 %1467 }
 0x637   : > { %4963 = vmatmul.msk.f32.gmra.mxu1 %vm1231_vm12, %v1326_v8 }
 0x638   : > { %4968 = vmatpush.xpose.msk.msra.mxu1 %vm1231_vm12, %v1468_v27 }
 0x63c   : > { %4969 = vmatpush.xpose.msk.msra.mxu1 %vm1231_vm12, %v1466_v10 }
 0x63e   : > { %v1462_v28 = vpop.permute.xlu2 %1461 }
 0x63f   : > { %4970 = vmatmul.msk.f32.vlgmr.msra.gmra.mxu1 %vm1231_vm12, %v1462_v28 }
 0x646   : > { %v1464_v29 = vpop.permute.xlu2 %1463 }
 0x647   : > { %4971 = vmatmul.msk.f32.gmra.mxu1 %vm1231_vm12, %v1464_v29 }
 0x64e   : > { %v1583_v48 = vpop.permute.xlu2 %1582 }
 0x6a1   : > { %v1316_v30 = vpop.f32.mrf.mxu0 }
 0x6a9   : > { %v1319_v33 = vpop.f32.mrf.mxu0 }
 0x6aa   : > { %v1322_v34 = vpack.c.bf16 %v1319_v33, %v1316_v30 }
 0x6ac   : > { %v1356_v35 = vpop.f32.mrf.mxu1  ;;  %4967 = vmatmul.msk.bf16.vlgmr.msra.gmra.mxu0 %vm1231_vm12, %v1322_v34 }
 0x6ad   : > { %v1362_v37 = vsel %vm753_vm4, %v1356_v35, -inf }
 0x6ae   : > { %1363 = vmax.xlane.f32.xlu1 %v1362_v37 }
 0x6b4   : > { %v1359_v38 = vpop.f32.mrf.mxu1 }
 0x6b5   : > { %v1365_v39 = vsel %vm753_vm4, %v1359_v38, -inf }
 0x6b6   : > { %1366 = vmax.xlane.f32.xlu0 %v1365_v39 }
 0x6bc   : > { %v1494_v46 = vpop.f32.mrf.mxu1  ;;  %4977 = vmatmul.msk.f32.vlgmr.msrb.gmra.mxu0 %vm1231_vm12, %v1581_v42 }
 0x6bd   : > { %v1500_v47 = vsel %vm753_vm4, %v1494_v46, -inf }
 0x6be   : > { %1501 = vmax.xlane.f32.xlu2 %v1500_v47 }
 0x6c4   : > { %v1497_v49 = vpop.f32.mrf.mxu1  ;;  %4978 = vmatmul.msk.f32.gmra.mxu0 %vm1231_vm12, %v1583_v48 }
 0x6c5   : > { %v1503_v50 = vsel %vm753_vm4, %v1497_v49, -inf }
 0x6c6   : > { %1504 = vmax.xlane.f32.xlu1 %v1503_v50 }
 0x721   : > { %v1364_v51 = vpop.xlane.xlu1 %1363 }
 0x722   : > { %v1368_v52 = vsub.f32 %v1356_v35, %v1364_v51 }
 0x724   : > { %v1370_v53 = vmul.f32 1.442695, %v1368_v52 }
 0x726   : > { %6258 = vpow2.f32 %v1370_v53 }
 0x729   : > { %v6676_v54 = vpop.f32.mrf.mxu0  ;;  %v1367_v61 = vpop.xlane.xlu0 %1366 }
 0x72a   : > { %v1369_v62 = vsub.f32 %v1359_v38, %v1367_v61 }
 0x72c   : > { %v6259_v55 = vpop.eup %6258  ;;  %v1372_v5 = vmul.f32 1.442695, %v1369_v62 }
 0x72d   : > { %v1374_v56 = vsel %vm753_vm4, %v6259_v55, 0.0 }
 0x72e   : > { %1375 = vadd.xlane.f32.xlu1 %v1374_v56  ;;  %v1220_v56 = vld [vmem:[%s7691_s7 + $0x4] sm:$0xf] }
 0x731   : > { %v6679_v57 = vpop.f32.mrf.mxu0  ;;  %v1502_v58 = vpop.xlane.xlu2 %1501 }
 0x732   : > { %v1506_v59 = vsub.f32 %v1494_v46, %v1502_v58  ;;  %v1425_v58 = vsel %vm1423_vm13, %v1220_v56, 0  ;;  %v5016_v56 = vld [vmem:[%s7695_s11 + $0x40] sm:$0xf] }
 0x733   : > { %1434 = vmatpush.bf16.msra.mxu3 %v1425_v58  ;;  %v5996_v58 = vld [vmem:[%s7695_s11 + $0x5c] sm:$0xf0] }
 0x734   : > { %v1508_v60 = vmul.f32 1.442695, %v1506_v59 }
 0x736   : > { %6260 = vpow2.f32 %v1508_v60 }
 0x739   : > { %v1613_v63 = vpop.f32.mrf.mxu0  ;;  %v1505_v0 = vpop.xlane.xlu1 %1504 }
 0x73a   : > { %v1507_v1 = vsub.f32 %v1497_v49, %v1505_v0  ;;  %v1619_v2 = vsel %vm753_vm4, %v1613_v63, -inf  ;;  %v1221_v0 = vld [vmem:[%s7691_s7 + $0x8] sm:$0xf] }
 0x73b   : > { %1620 = vmax.xlane.f32.xlu0 %v1619_v2 }
 0x73c   : > { %v6682_v3 = vpop.eup %6260  ;;  %v1510_v4 = vmul.f32 1.442695, %v1507_v1  ;;  %v1562_v1 = vsel %vm1423_vm13, %v1221_v0, 0 }
 0x73d   : > { %v1512_v6 = vsel %vm753_vm4, %v6682_v3, 0.0  ;;  %1571 = vmatpush.bf16.msrb.mxu3 %v1562_v1 }
 0x73e   : > { %6262 = vpow2.f32 %v1510_v4  ;;  %1513 = vadd.xlane.f32.xlu1 %v1512_v6 }
 0x73f   : > { %6264 = vpow2.f32 %v1372_v5 }
 0x741   : > { %v1616_v8 = vpop.f32.mrf.mxu0 }
 0x742   : > { %v1622_v9 = vsel %vm753_vm4, %v1616_v8, -inf }
 0x743   : > { %1623 = vmax.xlane.f32.xlu2 %v1622_v9  ;;  %v1222_v9 = vld [vmem:[%s7691_s7 + $0xc] sm:$0xf] }
 0x744   : > { %v6263_v10 = vpop.eup %6262 }
 0x745   : > { %v1515_v11 = vsel %vm753_vm4, %v6263_v10, 0.0  ;;  %v6265_v12 = vpop.eup %6264 }
 0x746   : > { %1516 = vadd.xlane.f32.xlu1 %v1515_v11  ;;  %v1377_v13 = vsel %vm753_vm4, %v6265_v12, 0.0 }
 0x74b   : > { %1378 = vadd.xlane.f32.xlu2 %v1377_v13 }
 0x74f   : > { %6197 = vrot.lane.b32.xlu0 %v6643_v7, %s7718_s23 }
 0x757   : > { %6207 = vrot.lane.b32.xlu0 %v6643_v7, %s7716_s1  ;;  %s7746_s1 = smov 96  }
 0x763   : > { %6202 = vrot.lane.b32.xlu2 %v6643_v7, %s7717_s5  ;;  %s7754_s5 = smov 56  }
 0x7a1   : > { %v1376_v22 = vpop.xlane.xlu1 %1375 }
 0x7ae   : > { %v1621_v14 = vpop.xlane.xlu0 %1620 }
 0x7af   : > { %v1625_v15 = vsub.f32 %v1613_v63, %v1621_v14 }
 0x7b1   : > { %v1627_v16 = vmul.f32 1.442695, %v1625_v15  ;;  %v1514_v35 = vpop.xlane.xlu1 %1513 }
 0x7b3   : > { %6266 = vpow2.f32 %v1627_v16 }
 0x7b6   : > { %v1624_v17 = vpop.xlane.xlu2 %1623 }
 0x7b7   : > { %v1626_v18 = vsub.f32 %v1616_v8, %v1624_v17 }
 0x7b9   : > { %v6267_v21 = vpop.eup %6266  ;;  %v1629_v23 = vmul.f32 1.442695, %v1626_v18  ;;  %v1517_v49 = vpop.xlane.xlu1 %1516 }
 0x7ba   : > { %v1631_v24 = vsel %vm753_vm4, %v6267_v21, 0.0 }
 0x7bb   : > { %6268 = vpow2.f32 %v1629_v23  ;;  %1632 = vadd.xlane.f32.xlu1 %v1631_v24 }
 0x7bc   : > { %6270 = vrcp.f32 %v1376_v22 }
 0x7be   : > { %v1379_v25 = vpop.xlane.xlu2 %1378 }
 0x7bf   : > { %6272 = vrcp.f32 %v1379_v25 }
 0x7c0   : > { %6274 = vrcp.f32 %v1514_v35  ;;  %v6364_v35 = vmov 32.0  }
 0x7c1   : > { %v6269_v26 = vpop.eup %6268  ;;  %v6198_v27 = vpop.permute.xlu0 %6197  ;;  %6276 = vrcp.f32 %v1517_v49 }
 0x7c2   : > { %v6271_v28 = vpop.eup %6270  ;;  %v6199_v29 = vunpack.i.l.bf16 %v6198_v27  ;;  %v1634_v7 = vsel %vm753_vm4, %v6269_v26, 0.0  ;;  %v6200_v30 = vunpack.i.h.bf16 %v6198_v27 }
 0x7c3   : > { %1635 = vadd.xlane.f32.xlu1 %v1634_v7  ;;  %v1382_v33 = vmul.f32 %v6271_v28, %v6259_v55 }
 0x7c4   : > { %1410 = vmatpush.msra.mxu2 %v6199_v29 }
 0x7c5   : > { %v6273_v42 = vpop.eup %6272 }
 0x7c6   : > { %1411 = vmatpush.msra.mxu2 %v6200_v30  ;;  %v6203_v34 = vpop.permute.xlu2 %6202  ;;  %v1383_v48 = vmul.f32 %v6273_v42, %v6265_v12  ;;  %v6275_v50 = vpop.eup %6274 }
 0x7c7   : > { %v6204_v37 = vunpack.i.l.bf16 %v6203_v34  ;;  %4964 = vmatmul.msk.f32.vlgmr.msra.gmra.mxu2 %vm753_vm4, %v1382_v33  ;;  %v6205_v38 = vunpack.i.h.bf16 %v6203_v34  ;;  %v1520_v51 = vmul.f32 %v6275_v50, %v6682_v3  ;;  %v6277_v52 = vpop.eup %6276 }
 0x7c8   : > { %v1521_v53 = vmul.f32 %v6277_v52, %v6263_v10  ;;  %v1681_v10 = vsel %vm1423_vm13, %v1222_v9, 0  ;;  %v5988_v9 = vld [vmem:[%s7695_s11 + $0x1c] sm:$0xf0] }
 0x7c9   : > { %v6208_v39 = vpop.permute.xlu0 %6207  ;;  %1548 = vmatpush.msrb.mxu2 %v6204_v37 }
 0x7ca   : > { %v6209_v46 = vunpack.i.l.bf16 %v6208_v39  ;;  %v6210_v47 = vunpack.i.h.bf16 %v6208_v39 }
 0x7cb   : > { %1549 = vmatpush.msrb.mxu2 %v6205_v38 }
 0x7cc   : > { %1667 = vmatpush.msrb.mxu1 %v6209_v46 }
 0x7cd   : > { %1690 = vmatpush.bf16.msra.mxu2 %v1681_v10  ;;  %v5984_v10 = vld [vmem:[%s7695_s11 + $0x4] sm:$0xf] }
 0x7ce   : > { %1668 = vmatpush.msrb.mxu1 %v6210_v47 }
 0x7cf   : > { %4965 = vmatmul.msk.f32.gmra.mxu2 %vm753_vm4, %v1383_v48 }
 0x7d7   : > { %4972 = vmatmul.msk.f32.vlgmr.msrb.gmra.mxu2 %vm753_vm4, %v1520_v51 }
 0x7df   : > { %4973 = vmatmul.msk.f32.gmra.mxu2 %vm753_vm4, %v1521_v53 }
 0x82e   : > { %v1633_v55 = vpop.xlane.xlu1 %1632 }
 0x82f   : > { %6278 = vrcp.f32 %v1633_v55 }
 0x835   : > { %v6279_v59 = vpop.eup %6278 }
 0x836   : > { %v1639_v60 = vmul.f32 %v6279_v59, %v6267_v21  ;;  %v1636_v61 = vpop.xlane.xlu1 %1635  ;;  %v6234_v21 = vld [vmem:[%s7692_s8] ss:$0 sm:$0xff]  ;;  %v5992_v59 = vld [vmem:[%s7695_s11 + $0x44] sm:$0xf] }
 0x837   : > { %6280 = vrcp.f32 %v1636_v61  ;;  %v5018_v61 = vld [vmem:[%s7695_s11 + $0x60] sm:$0xf0] }
 0x838   : > { %4979 = vmatmul.msk.f32.vlgmr.msrb.gmra.mxu1 %vm753_vm4, %v1639_v60  ;;  %6282 = vrcp.f32 %v6364_v35  ;;  %v5017_v60 = vor.u32 %v5996_v58, %v5016_v56  ;;  %v5021_v1 = vor.u32 %v5992_v59, %v5018_v61  ;;  %v5042_v35 = vld [vmem:[%s7695_s11 + $0x78] sm:$0xf0] }
 0x839   : > { %v5987_v56 = vld [vmem:[%s7695_s11 + $0x1c] sm:$0xf] }
 0x83a   : > { %1908 = vmatpush.bf16.msra.mxu0 %v5021_v1  ;;  %v5010_v58 = vld [vmem:[%s7695_s11 + $0x38] sm:$0xf0] }
 0x83d   : > { %v6281_v62 = vpop.eup %6280 }
 0x83e   : > { %v1640_v63 = vmul.f32 %v6281_v62, %v6269_v26  ;;  %v6283_v37 = vpop.eup %6282  ;;  %v5024_v62 = vld [vmem:[%s7695_s11 + $0x48] sm:$0xf] }
 0x83f   : > { %v1716_v38 = vmul.f32 32.0, %v6283_v37  ;;  %vm1720_vm14 = vweird.f32 %v6283_v37 }
 0x840   : > { %4980 = vmatmul.msk.f32.gmra.mxu1 %vm753_vm4, %v1640_v63  ;;  %v5997_v63 = vld [vmem:[%s7695_s11 + $0x64] sm:$0xf0] }
 0x841   : > { %v1717_v39 = vsub.f32 1.0, %v1716_v38 }
 0x84a   : > { %v1413_v2 = vpop.f32.mrf.mxu2 }
 0x852   : > { %v1416_v3 = vpop.f32.mrf.mxu2 }
 0x853   : > { %v1419_v4 = vpack.c.bf16 %v1416_v3, %v1413_v2  ;;  %v5025_v2 = vor.u32 %v5997_v63, %v5024_v62  ;;  %v5993_v3 = vld [vmem:[%s7695_s11 + $0x4c] sm:$0xf] }
 0x855   : > { %4966 = vmatmul.msk.bf16.vlgmr.msra.gmra.mxu3 %vm1231_vm12, %v1419_v4  ;;  %v5026_v4 = vld [vmem:[%s7695_s11 + $0x68] sm:$0xf0]  ;;  %1922 = vmatpush.bf16.msra.mxu1 %v5025_v2 }
 0x856   : > { %1894 = vmatpush.bf16.msra.mxu3 %v5017_v60  ;;  %v5013_v60 = vor.u32 %v5987_v56, %v5010_v58  ;;  %v6025_v56 = vld [vmem:[%s7697_s13 + $0xc8] sm:$0xff]  ;;  %v6046_v58 = vld [vmem:[%s7697_s13 + $0x170] sm:$0xff] }
 0x85a   : > { %v1551_v5 = vpop.f32.mrf.mxu2 }
 0x862   : > { %v1554_v6 = vpop.f32.mrf.mxu2 }
 0x863   : > { %v1557_v8 = vpack.c.bf16 %v1554_v6, %v1551_v5  ;;  %v5029_v6 = vor.u32 %v5993_v3, %v5026_v4 }
 0x865   : > { %4974 = vmatmul.msk.bf16.vlgmr.msrb.gmra.mxu3 %vm1231_vm12, %v1557_v8  ;;  %v4984_v8 = vld [vmem:[%s7695_s11] sm:$0xf]  ;;  %1936 = vmatpush.bf16.msrb.mxu2 %v5029_v6 }
 0x866   : > { %v6235_v6 = vld [vmem:[%s7693_s9] ss:$0 sm:$0xff] }
 0x8b5   : > { %v1670_v11 = vpop.f32.mrf.mxu1 }
 0x8bd   : > { %v1673_v12 = vpop.f32.mrf.mxu1 }
 0x8be   : > { %v1676_v13 = vpack.c.bf16 %v1673_v12, %v1670_v11  ;;  %v4985_v12 = vor.u32 %v5988_v9, %v4984_v8 }
 0x8c0   : > { %4981 = vmatmul.msk.bf16.vlgmr.msra.gmra.mxu2 %vm1231_vm12, %v1676_v13  ;;  %v4986_v13 = vld [vmem:[%s7695_s11 + $0x20] sm:$0xf0]  ;;  %1895 = vmatpush.bf16.msra.mxu3 %v4985_v12 }
 0x8d8   : > { %v1436_v14 = vpop.f32.mrf.mxu3 }
 0x8d9   : > { %v1457_v17 = vadd.f32 %v6676_v54, %v1436_v14  ;;  %v4992_v14 = vld [vmem:[%s7695_s11 + $0x8] sm:$0xf] }
 0x8e0   : > { %v1438_v15 = vpop.f32.mrf.mxu3 }
 0x8e1   : > { %v1459_v26 = vadd.f32 %v6679_v57, %v1438_v15  ;;  %v1718_v57 = vmul.f32 %v6283_v37, %v1717_v39  ;;  %v4989_v15 = vor.u32 %v5984_v10, %v4986_v13 }
 0x8e3   : > { %v1719_v42 = vadd.f32 %v6283_v37, %v1718_v57  ;;  %1909 = vmatpush.bf16.msra.mxu0 %v4989_v15 }
 0x8e8   : > { %v1573_v16 = vpop.f32.mrf.mxu3 }
 0x8e9   : > { %v1578_v18 = vadd.f32 %v1573_v16, %v1457_v17  ;;  %v5989_v16 = vld [vmem:[%s7695_s11 + $0x24] sm:$0xf0]  ;;  %v5985_v17 = vld [vmem:[%s7695_s11 + $0xc] sm:$0xf] }
 0x8f0   : > { %v1575_v25 = vpop.f32.mrf.mxu3 }
 0x8f1   : > { %v1579_v28 = vadd.f32 %v1575_v25, %v1459_v26  ;;  %v5998_v25 = vld [vmem:[%s7695_s11 + $0x6c] sm:$0xf0]  ;;  %v5994_v26 = vld [vmem:[%s7695_s11 + $0x54] sm:$0xf] }
 0x943   : > { %v1692_v22 = vpop.f32.mrf.mxu2 }
 0x944   : > { %v1697_v23 = vadd.f32 %v1692_v22, %v1578_v18  ;;  %v4994_v18 = vld [vmem:[%s7695_s11 + $0x28] sm:$0xf0] }
 0x945   : > { %v4997_v22 = vor.u32 %v5985_v17, %v4994_v18  ;;  %v6023_v18 = vld [vmem:[%s7697_s13 + $0xb8] sm:$0xff] }
 0x946   : > { %v1703_v24 = vadd.f32 %v6234_v21, %v1697_v23 }
 0x947   : > { %1937 = vmatpush.bf16.msrb.mxu2 %v4997_v22  ;;  %v6014_v22 = vld [vmem:[%s7697_s13 + $0x70] sm:$0xff] }
 0x948   : > { %v1705_v27 = vadd.f32 %v1703_v24, %v6617_v44  ;;  %v6728_v44 = vsel %vm1720_vm14, %v6283_v37, %v1719_v42  ;;  %v5032_v24 = vld [vmem:[%s7695_s11 + $0x50] sm:$0xf] }
 0x949   : > { %v5000_v37 = vld [vmem:[%s7695_s11 + $0x10] sm:$0xf] }
 0x94a   : > { %v1709_v29 = vsel %vm1201_vm11, %v1705_v27, 0.0  ;;  %v5990_v42 = vld [vmem:[%s7695_s11 + $0x2c] sm:$0xf0] }
 0x94b   : > { %1710 = vadd.xlane.f32.xlu0 %v1709_v29  ;;  %v1694_v7 = vpop.f32.mrf.mxu2  ;;  %v5034_v29 = vld [vmem:[%s7695_s11 + $0x70] sm:$0xf0] }
 0x94c   : > { %v1698_v30 = vadd.f32 %v1694_v7, %v1579_v28  ;;  %v5033_v28 = vor.u32 %v5998_v25, %v5032_v24  ;;  %v5040_v7 = vld [vmem:[%s7695_s11 + $0x58] sm:$0xf]  ;;  %v6006_v24 = vld [vmem:[%s7697_s13 + $0x30] sm:$0xff] }
 0x94d   : > { %v6030_v25 = vld [vmem:[%s7697_s13 + $0xf0] sm:$0xff] }
 0x94e   : > { %v1704_v54 = vadd.f32 %v6234_v21, %v1698_v30  ;;  %v4993_v21 = vor.u32 %v5989_v16, %v4992_v14  ;;  %v5999_v30 = vld [vmem:[%s7695_s11 + $0x74] sm:$0xf0]  ;;  %1950 = vmatpush.bf16.msrb.mxu3 %v5033_v28  ;;  %v6005_v28 = vld [vmem:[%s7697_s13 + $0x28] sm:$0xff] }
 0x950   : > { %v1706_v33 = vadd.f32 %v1704_v54, %v6619_v45  ;;  %1923 = vmatpush.bf16.msra.mxu1 %v4993_v21  ;;  %v5037_v54 = vor.u32 %v5994_v26, %v5034_v29  ;;  %v6031_v21 = vld [vmem:[%s7697_s13 + $0xf8] sm:$0xff]  ;;  %v6013_v26 = vld [vmem:[%s7697_s13 + $0x68] sm:$0xff] }
 0x951   : > { %v6029_v29 = vld [vmem:[%s7697_s13 + $0xe8] sm:$0xff] }
 0x952   : > { %v1712_v34 = vsel %vm1201_vm11, %v1706_v33, 0.0  ;;  %1964 = vmatpush.bf16.msrb.mxu0 %v5037_v54  ;;  %v6004_v54 = vld [vmem:[%s7697_s13 + $0x20] sm:$0xff] }
 0x953   : > { %1713 = vadd.xlane.f32.xlu2 %v1712_v34  ;;  %v5995_v34 = vld [vmem:[%s7695_s11 + $0x5c] sm:$0xf] }
 0x954   : > { %v5045_v57 = vor.u32 %v5995_v34, %v5042_v35  ;;  %v6011_v34 = vld [vmem:[%s7697_s13 + $0x58] sm:$0xff] }
 0x955   : > { %v6019_v35 = vld [vmem:[%s7697_s13 + $0x98] sm:$0xff] }
 0x956   : > { %1992 = vmatpush.bf16.msra.mxu2 %v5045_v57  ;;  %v6018_v57 = vld [vmem:[%s7697_s13 + $0x90] sm:$0xff] }
 0x95a   : > { %1993 = vmatpush.bf16.msra.mxu2 %v5013_v60  ;;  %v6000_v60 = vld [vmem:[%s7697_s13] sm:$0xff] }
 0x9be   : > { %v1711_v46 = vpop.xlane.xlu0 %1710 }
 0x9bf   : > { %v1722_v47 = vmul.f32 %v6728_v44, %v1711_v46  ;;  %v5986_v46 = vld [vmem:[%s7695_s11 + $0x14] sm:$0xf] }
 0x9c1   : > { %v6731_v48 = vsub.f32 %v1705_v27, %v1722_v47 }
 0x9c3   : > { %v1726_v45 = vmul.f32 %v6731_v48, %v6731_v48 }
 0x9c5   : > { %v1728_v49 = vsel %vm1201_vm11, %v1726_v45, 0.0  ;;  %v5001_v45 = vor.u32 %v5990_v42, %v5000_v37  ;;  %v6003_v37 = vld [vmem:[%s7697_s13 + $0x18] sm:$0xff]  ;;  %v6002_v42 = vld [vmem:[%s7697_s13 + $0x10] sm:$0xff] }
 0x9c6   : > { %1729 = vadd.xlane.f32.xlu1 %v1728_v49  ;;  %v1714_v50 = vpop.xlane.xlu2 %1713  ;;  %v5002_v49 = vld [vmem:[%s7695_s11 + $0x30] sm:$0xf0] }
 0x9c7   : > { %v1723_v51 = vmul.f32 %v6728_v44, %v1714_v50  ;;  %v5008_v50 = vld [vmem:[%s7695_s11 + $0x18] sm:$0xf]  ;;  %1951 = vmatpush.bf16.msrb.mxu3 %v5001_v45  ;;  %v6017_v45 = vld [vmem:[%s7697_s13 + $0x88] sm:$0xff] }
 0x9c9   : > { %v6737_v52 = vsub.f32 %v1706_v33, %v1723_v51  ;;  %v5041_v33 = vor.u32 %v5999_v30, %v5040_v7  ;;  %v5991_v51 = vld [vmem:[%s7695_s11 + $0x34] sm:$0xf0]  ;;  %v6012_v7 = vld [vmem:[%s7697_s13 + $0x60] sm:$0xff] }
 0x9ca   : > { %v6020_v30 = vld [vmem:[%s7697_s13 + $0xa0] sm:$0xff] }
 0x9cb   : > { %v1727_v53 = vmul.f32 %v6737_v52, %v6737_v52  ;;  %1978 = vmatpush.bf16.msrb.mxu1 %v5041_v33  ;;  %v6028_v33 = vld [vmem:[%s7697_s13 + $0xe0] sm:$0xff] }
 0x9cd   : > { %v1731_v55 = vsel %vm1201_vm11, %v1727_v53, 0.0  ;;  %v5005_v53 = vor.u32 %v5986_v46, %v5002_v49  ;;  %v6026_v46 = vld [vmem:[%s7697_s13 + $0xd0] sm:$0xff]  ;;  %v6008_v49 = vld [vmem:[%s7697_s13 + $0x40] sm:$0xff] }
 0x9ce   : > { %1732 = vadd.xlane.f32.xlu1 %v1731_v55  ;;  %v5009_v55 = vor.u32 %v5991_v51, %v5008_v50  ;;  %v6016_v50 = vld [vmem:[%s7697_s13 + $0x80] sm:$0xff]  ;;  %v6047_v51 = vld [vmem:[%s7697_s13 + $0x178] sm:$0xff] }
 0x9cf   : > { %1965 = vmatpush.bf16.msrb.mxu0 %v5005_v53  ;;  %v6055_v53 = vld [vmem:[%s7697_s13 + $0x1b8] sm:$0xff] }
 0x9d0   : > { %1979 = vmatpush.bf16.msrb.mxu1 %v5009_v55  ;;  %v6001_v55 = vld [vmem:[%s7697_s13 + $0x8] sm:$0xff] }
 0xa39   : > { %v1730_v0 = vpop.xlane.xlu1 %1729 }
 0xa3a   : > { %v1734_v5 = vmul.f32 %v1730_v0, %v6728_v44 }
 0xa3c   : > { %v6776_v11 = vadd.f32 1e-05, %v1734_v5 }
 0xa3e   : > { %6284 = vrsqrt.f32 %v6776_v11  ;;  %vm1744_vm0 = vweird.f32 %v6776_v11 }
 0xa41   : > { %v1733_v23 = vpop.xlane.xlu1 %1732 }
 0xa42   : > { %v1735_v27 = vmul.f32 %v1733_v23, %v6728_v44  ;;  %v6022_v23 = vld [vmem:[%s7697_s13 + $0xb0] sm:$0xff] }
 0xa44   : > { %v6285_v38 = vpop.eup %6284  ;;  %v1737_v39 = vadd.f32 1e-05, %v1735_v27  ;;  %v6021_v27 = vld [vmem:[%s7697_s13 + $0xa8] sm:$0xff] }
 0xa45   : > { %v1739_v47 = vmul.f32 %v6285_v38, %v6776_v11  ;;  %vm1745_vm15 = vweird.f32 %v6285_v38  ;;  %v6236_v11 = vld [vmem:[%s7694_s10] ss:$0 sm:$0xff] }
 0xa46   : > { %6286 = vrsqrt.f32 %v1737_v39  ;;  %vm1746_vm1 = vmor %vm1744_vm0, %vm1745_vm15  ;;  %vm1754_vm3 = vweird.f32 %v1737_v39 }
 0xa47   : > { %v1740_v59 = vmul.f32 %v6285_v38, %v1739_v47  ;;  %v6009_v47 = vld [vmem:[%s7697_s13 + $0x48] sm:$0xff] }
 0xa49   : > { %v1741_v61 = vmul.f32 0.5, %v1740_v59  ;;  %v6054_v59 = vld [vmem:[%s7697_s13 + $0x1b0] sm:$0xff] }
 0xa4b   : > { %v1742_v62 = vsub.f32 1.5, %v1741_v61  ;;  %v6024_v61 = vld [vmem:[%s7697_s13 + $0xc0] sm:$0xff] }
 0xa4c   : > { %v6287_v63 = vpop.eup %6286 }
 0xa4d   : > { %v1743_v0 = vmul.f32 %v6285_v38, %v1742_v62  ;;  %v1749_v1 = vmul.f32 %v6287_v63, %v1737_v39  ;;  %vm1755_vm2 = vweird.f32 %v6287_v63  ;;  %v6010_v39 = vld [vmem:[%s7697_s13 + $0x50] sm:$0xff]  ;;  %v6039_v62 = vld [vmem:[%s7697_s13 + $0x138] sm:$0xff] }
 0xa4e   : > { %vm1756_vm5 = vmor %vm1754_vm3, %vm1755_vm2 }
 0xa4f   : > { %v1750_v2 = vmul.f32 %v6287_v63, %v1749_v1  ;;  %v1747_v3 = vsel %vm1746_vm1, %v6285_v38, %v1743_v0  ;;  %v6027_v38 = vld [vmem:[%s7697_s13 + $0xd8] sm:$0xff]  ;;  %v6045_v0 = vld [vmem:[%s7697_s13 + $0x168] sm:$0xff] }
 0xa50   : > { %v1758_v8 = vmul.f32 %v1747_v3, %v6731_v48  ;;  %v6015_v48 = vld [vmem:[%s7697_s13 + $0x78] sm:$0xff]  ;;  %v6053_v1 = vld [vmem:[%s7697_s13 + $0x1a8] sm:$0xff]  ;;  %v6062_v3 = vld [vmem:[%s7697_s13 + $0x1f0] sm:$0xff] }
 0xa51   : > { %v1751_v4 = vmul.f32 0.5, %v1750_v2  ;;  %v6038_v2 = vld [vmem:[%s7697_s13 + $0x130] sm:$0xff] }
 0xa52   : > { %v1763_v12 = vmul.f32 %v6235_v6, %v1758_v8  ;;  %v6061_v8 = vld [vmem:[%s7697_s13 + $0x1e8] sm:$0xff] }
 0xa53   : > { %v1752_v5 = vsub.f32 1.5, %v1751_v4  ;;  %v6044_v4 = vld [vmem:[%s7697_s13 + $0x160] sm:$0xff] }
 0xa54   : > { %v6853_v15 = vadd.f32 %v6236_v11, %v1763_v12  ;;  %v6060_v12 = vld [vmem:[%s7697_s13 + $0x1e0] sm:$0xff] }
 0xa55   : > { %v1753_v9 = vmul.f32 %v6287_v63, %v1752_v5  ;;  %v6052_v5 = vld [vmem:[%s7697_s13 + $0x1a0] sm:$0xff] }
 0xa57   : > { %v1757_v10 = vsel %vm1756_vm5, %v6287_v63, %v1753_v9  ;;  %v6063_v63 = vld [vmem:[%s7697_s13 + $0x1f8] sm:$0xff] }
 0xa58   : > { %v1759_v13 = vmul.f32 %v1757_v10, %v6737_v52  ;;  %v6007_v52 = vld [vmem:[%s7697_s13 + $0x38] sm:$0xff] }
 0xa59   : > { %v6043_v9 = vld [vmem:[%s7697_s13 + $0x158] sm:$0xff] }
 0xa5a   : > { %v1764_v14 = vmul.f32 %v6235_v6, %v1759_v13  ;;  %v6037_v6 = vld [vmem:[%s7697_s13 + $0x128] sm:$0xff]  ;;  %v6051_v10 = vld [vmem:[%s7697_s13 + $0x198] sm:$0xff]  ;;  %v6042_v13 = vld [vmem:[%s7697_s13 + $0x150] sm:$0xff] }
 0xa5c   : > { %v6855_v16 = vadd.f32 %v6236_v11, %v1764_v14  ;;  %v6036_v11 = vld [vmem:[%s7697_s13 + $0x120] sm:$0xff]  ;;  %v6050_v14 = vld [vmem:[%s7697_s13 + $0x190] sm:$0xff] }
 0xa5e   : > { %v1770_v17 = vpack.c.bf16 %v6855_v16, %v6853_v15 }
 0xa60   : > { %5046 = vmatmul.msk.bf16.vlgmr.msra.gmra.mxu3 %vm1201_vm11, %v1770_v17  ;;  %5047 = vmatmul.msk.bf16.vlgmr.msra.gmra.mxu0 %vm1201_vm11, %v1770_v17 }
 0xa61   : > { %5048 = vmatmul.msk.bf16.vlgmr.msra.gmra.mxu1 %vm1201_vm11, %v1770_v17  ;;  %5049 = vmatmul.msk.bf16.vlgmr.msrb.gmra.mxu2 %vm1201_vm11, %v1770_v17 }
 0xa62   : > { %2554 = vmatpush.bf16.msra.mxu0 %v6015_v48  ;;  %2568 = vmatpush.bf16.msra.mxu1 %v6023_v18  ;;  %v6059_v48 = vld [vmem:[%s7697_s13 + $0x1d8] sm:$0xff]  ;;  %v6041_v18 = vld [vmem:[%s7697_s13 + $0x148] sm:$0xff] }
 0xa63   : > { %2540 = vmatpush.bf16.msra.mxu3 %v6007_v52  ;;  %2582 = vmatpush.bf16.msrb.mxu2 %v6031_v21  ;;  %v6049_v52 = vld [vmem:[%s7697_s13 + $0x188] sm:$0xff]  ;;  %v6034_v21 = vld [vmem:[%s7697_s13 + $0x110] sm:$0xff] }
 0xa66   : > { %2555 = vmatpush.bf16.msra.mxu0 %v6014_v22  ;;  %2569 = vmatpush.bf16.msra.mxu1 %v6022_v23  ;;  %v6058_v22 = vld [vmem:[%s7697_s13 + $0x1d0] sm:$0xff]  ;;  %v6040_v23 = vld [vmem:[%s7697_s13 + $0x140] sm:$0xff] }
 0xa67   : > { %2541 = vmatpush.bf16.msra.mxu3 %v6006_v24  ;;  %2583 = vmatpush.bf16.msrb.mxu2 %v6030_v25  ;;  %v6048_v24 = vld [vmem:[%s7697_s13 + $0x180] sm:$0xff]  ;;  %v6033_v25 = vld [vmem:[%s7697_s13 + $0x108] sm:$0xff] }
 0xa6a   : > { %2556 = vmatpush.bf16.msra.mxu0 %v6013_v26  ;;  %2570 = vmatpush.bf16.msra.mxu1 %v6021_v27  ;;  %v6057_v26 = vld [vmem:[%s7697_s13 + $0x1c8] sm:$0xff]  ;;  %v7056_v27 = vld [vmem:[%s7696_s12] sm:$0xff] }
 0xa6b   : > { %2542 = vmatpush.bf16.msra.mxu3 %v6005_v28  ;;  %2584 = vmatpush.bf16.msrb.mxu2 %v6029_v29 }
 0xa6e   : > { %2557 = vmatpush.bf16.msra.mxu0 %v6012_v7  ;;  %2571 = vmatpush.bf16.msra.mxu1 %v6020_v30  ;;  %v6032_v7 = vld [vmem:[%s7697_s13 + $0x100] sm:$0xff] }
 0xa6f   : > { %2543 = vmatpush.bf16.msra.mxu3 %v6004_v54  ;;  %2585 = vmatpush.bf16.msrb.mxu2 %v6028_v33  ;;  %v6056_v30 = vld [vmem:[%s7697_s13 + $0x1c0] sm:$0xff]  ;;  %v1790_v54 = vperm.slane %v7056_v27, 1  ;;  %v1791_v33 = vperm.slane %v7056_v27, 2 }
 0xa70   : > { %5050 = vmatmul.msk.bf16.vlgmr.msrb.gmra.mxu3 %vm1201_vm11, %v1770_v17  ;;  %5051 = vmatmul.msk.bf16.vlgmr.msrb.gmra.mxu0 %vm1201_vm11, %v1770_v17 }
 0xa71   : > { %5052 = vmatmul.msk.bf16.vlgmr.msrb.gmra.mxu1 %vm1201_vm11, %v1770_v17  ;;  %5053 = vmatmul.msk.bf16.vlgmr.msra.gmra.mxu2 %vm1201_vm11, %v1770_v17  ;;  %v6035_v17 = vld [vmem:[%s7697_s13 + $0x118] sm:$0xff] }
 0xa72   : > { %2558 = vmatpush.bf16.msra.mxu0 %v6011_v34  ;;  %2572 = vmatpush.bf16.msra.mxu1 %v6019_v35 }
 0xa73   : > { %2544 = vmatpush.bf16.msra.mxu3 %v6003_v37  ;;  %2586 = vmatpush.bf16.msrb.mxu2 %v6027_v38 }
 0xa76   : > { %2559 = vmatpush.bf16.msra.mxu0 %v6010_v39  ;;  %2573 = vmatpush.bf16.msra.mxu1 %v6018_v57  ;;  %v1789_v57 = vperm.slane %v7056_v27, 0 }
 0xa77   : > { %2545 = vmatpush.bf16.msra.mxu3 %v6002_v42  ;;  %2587 = vmatpush.bf16.msrb.mxu2 %v6026_v46 }
 0xa7a   : > { %2560 = vmatpush.bf16.msra.mxu0 %v6009_v47  ;;  %2574 = vmatpush.bf16.msra.mxu1 %v6017_v45  ;;  %v1792_v47 = vperm.slane %v7056_v27, 3 }
 0xa7b   : > { %2546 = vmatpush.bf16.msra.mxu3 %v6001_v55  ;;  %2588 = vmatpush.bf16.msrb.mxu2 %v6025_v56 }
 0xa7e   : > { %2561 = vmatpush.bf16.msra.mxu0 %v6008_v49  ;;  %2575 = vmatpush.bf16.msra.mxu1 %v6016_v50 }
 0xa7f   : > { %2547 = vmatpush.bf16.msra.mxu3 %v6000_v60  ;;  %2589 = vmatpush.bf16.msrb.mxu2 %v6024_v61 }
 0xa82   : > { %2610 = vmatpush.bf16.msrb.mxu0 %v6047_v51  ;;  %2624 = vmatpush.bf16.msrb.mxu1 %v6055_v53 }
 0xa83   : > { %2596 = vmatpush.bf16.msrb.mxu3 %v6039_v62  ;;  %2638 = vmatpush.bf16.msra.mxu2 %v6063_v63 }
 0xa86   : > { %2611 = vmatpush.bf16.msrb.mxu0 %v6046_v58  ;;  %2625 = vmatpush.bf16.msrb.mxu1 %v6054_v59 }
 0xa87   : > { %2597 = vmatpush.bf16.msrb.mxu3 %v6038_v2  ;;  %2639 = vmatpush.bf16.msra.mxu2 %v6062_v3 }
 0xa8a   : > { %2612 = vmatpush.bf16.msrb.mxu0 %v6045_v0  ;;  %2626 = vmatpush.bf16.msrb.mxu1 %v6053_v1 }
 0xa8b   : > { %2598 = vmatpush.bf16.msrb.mxu3 %v6037_v6  ;;  %2640 = vmatpush.bf16.msra.mxu2 %v6061_v8  ;;  %v1794_v8 = vperm.slane %v7056_v27, 5 }
 0xa8e   : > { %2613 = vmatpush.bf16.msrb.mxu0 %v6044_v4  ;;  %2627 = vmatpush.bf16.msrb.mxu1 %v6052_v5 }
 0xa8f   : > { %2599 = vmatpush.bf16.msrb.mxu3 %v6036_v11  ;;  %2641 = vmatpush.bf16.msra.mxu2 %v6060_v12 }
 0xa92   : > { %2614 = vmatpush.bf16.msrb.mxu0 %v6043_v9  ;;  %2628 = vmatpush.bf16.msrb.mxu1 %v6051_v10  ;;  %v1795_v10 = vperm.slane %v7056_v27, 6 }
 0xa93   : > { %2600 = vmatpush.bf16.msrb.mxu3 %v6035_v17  ;;  %2642 = vmatpush.bf16.msra.mxu2 %v6059_v48  ;;  %v1793_v48 = vperm.slane %v7056_v27, 4 }
 0xa96   : > { %2615 = vmatpush.bf16.msrb.mxu0 %v6042_v13  ;;  %2629 = vmatpush.bf16.msrb.mxu1 %v6050_v14 }
 0xa97   : > { %2601 = vmatpush.bf16.msrb.mxu3 %v6034_v21  ;;  %2643 = vmatpush.bf16.msra.mxu2 %v6058_v22  ;;  %v1796_v21 = vperm.slane %v7056_v27, 7 }
 0xa9a   : > { %2616 = vmatpush.bf16.msrb.mxu0 %v6041_v18  ;;  %2630 = vmatpush.bf16.msrb.mxu1 %v6049_v52 }
 0xa9b   : > { %2602 = vmatpush.bf16.msrb.mxu3 %v6033_v25  ;;  %2644 = vmatpush.bf16.msra.mxu2 %v6057_v26 }
 0xa9e   : > { %2617 = vmatpush.bf16.msrb.mxu0 %v6040_v23  ;;  %2631 = vmatpush.bf16.msrb.mxu1 %v6048_v24 }
 0xa9f   : > { %2603 = vmatpush.bf16.msrb.mxu3 %v6032_v7  ;;  %2645 = vmatpush.bf16.msra.mxu2 %v6056_v30 }
 0xadd   : > { %v1911_v28 = vpop.f32.mrf.mxu0 }
 0xade   : > { %v1925_v29 = vpop.f32.mrf.mxu1  ;;  %v1912_v35 = vadd.f32 %v1911_v28, %v1790_v54 }
 0xadf   : > { %v1926_v38 = vadd.f32 %v1925_v29, %v1791_v33 }
 0xae0   : > { %v2001_v49 = vmax.f32 %v1912_v35, 0.0 }
 0xae1   : > { %v2002_v51 = vmax.f32 %v1926_v38, 0.0 }
 0xae3   : > { %v1897_v34 = vpop.f32.mrf.mxu3 }
 0xae4   : > { %v1939_v37 = vpop.f32.mrf.mxu2  ;;  %v1898_v55 = vadd.f32 %v1897_v34, %v1789_v57 }
 0xae5   : > { %v1913_v39 = vpop.f32.mrf.mxu0  ;;  %v1940_v58 = vadd.f32 %v1939_v37, %v1792_v47 }
 0xae6   : > { %v1914_v42 = vadd.f32 %v1913_v39, %v1790_v54  ;;  %v1927_v46 = vpop.f32.mrf.mxu1  ;;  %v2000_v1 = vmax.f32 %v1898_v55, 0.0 }
 0xae7   : > { %v1928_v45 = vadd.f32 %v1927_v46, %v1791_v33  ;;  %v2003_v4 = vmax.f32 %v1940_v58, 0.0 }
 0xae8   : > { %v2009_v50 = vmax.f32 %v1914_v42, 0.0 }
 0xae9   : > { %v2010_v53 = vmax.f32 %v1928_v45, 0.0  ;;  %v6237_v45 = vld [vmem:[%s7698_s14] ss:$0 sm:$0xff] }
 0xaea   : > { %v2017_v56 = vpack.c.bf16 %v2009_v50, %v2001_v49 }
 0xaeb   : > { %v2018_v59 = vpack.c.bf16 %v2010_v53, %v2002_v51  ;;  %v1899_v60 = vpop.f32.mrf.mxu3 }
 0xaec   : > { %v1900_v61 = vadd.f32 %v1899_v60, %v1789_v57  ;;  %v1941_v62 = vpop.f32.mrf.mxu2  ;;  %2562 = vmatmul.bf16.vlgmr.msra.gmra.mxu0 %v2017_v56 }
 0xaed   : > { %v1942_v63 = vadd.f32 %v1941_v62, %v1792_v47  ;;  %2576 = vmatmul.bf16.vlgmr.msra.gmra.mxu1 %v2018_v59  ;;  %v1967_v0 = vpop.f32.mrf.mxu0 }
 0xaee   : > { %v2008_v2 = vmax.f32 %v1900_v61, 0.0  ;;  %v1981_v3 = vpop.f32.mrf.mxu1  ;;  %v1968_v12 = vadd.f32 %v1967_v0, %v1794_v8 }
 0xaef   : > { %v2011_v5 = vmax.f32 %v1942_v63, 0.0  ;;  %v1982_v14 = vadd.f32 %v1981_v3, %v1795_v10 }
 0xaf0   : > { %v2016_v6 = vpack.c.bf16 %v2008_v2, %v2000_v1  ;;  %v2005_v23 = vmax.f32 %v1968_v12, 0.0 }
 0xaf1   : > { %v2019_v9 = vpack.c.bf16 %v2011_v5, %v2003_v4  ;;  %v2006_v25 = vmax.f32 %v1982_v14, 0.0 }
 0xaf2   : > { %2548 = vmatmul.bf16.vlgmr.msra.gmra.mxu3 %v2016_v6 }
 0xaf3   : > { %2590 = vmatmul.bf16.vlgmr.msrb.gmra.mxu2 %v2019_v9  ;;  %v1953_v11 = vpop.f32.mrf.mxu3 }
 0xaf4   : > { %v1995_v13 = vpop.f32.mrf.mxu2  ;;  %v1954_v28 = vadd.f32 %v1953_v11, %v1793_v48 }
 0xaf5   : > { %v1969_v17 = vpop.f32.mrf.mxu0  ;;  %v1996_v7 = vadd.f32 %v1995_v13, %v1796_v21 }
 0xaf6   : > { %v1970_v18 = vadd.f32 %v1969_v17, %v1794_v8  ;;  %v1983_v52 = vpop.f32.mrf.mxu1  ;;  %v2004_v37 = vmax.f32 %v1954_v28, 0.0 }
 0xaf7   : > { %v1984_v22 = vadd.f32 %v1983_v52, %v1795_v10  ;;  %v2007_v39 = vmax.f32 %v1996_v7, 0.0 }
 0xaf8   : > { %v2013_v24 = vmax.f32 %v1970_v18, 0.0 }
 0xaf9   : > { %v2014_v26 = vmax.f32 %v1984_v22, 0.0 }
 0xafa   : > { %v2021_v29 = vpack.c.bf16 %v2013_v24, %v2005_v23 }
 0xafb   : > { %v2022_v30 = vpack.c.bf16 %v2014_v26, %v2006_v25  ;;  %v1955_v54 = vpop.f32.mrf.mxu3 }
 0xafc   : > { %v1956_v33 = vadd.f32 %v1955_v54, %v1793_v48  ;;  %v1997_v34 = vpop.f32.mrf.mxu2  ;;  %2618 = vmatmul.bf16.vlgmr.msrb.gmra.mxu0 %v2021_v29 }
 0xafd   : > { %v1998_v35 = vadd.f32 %v1997_v34, %v1796_v21  ;;  %2632 = vmatmul.bf16.vlgmr.msrb.gmra.mxu1 %v2022_v30 }
 0xafe   : > { %v2012_v38 = vmax.f32 %v1956_v33, 0.0 }
 0xaff   : > { %v2015_v57 = vmax.f32 %v1998_v35, 0.0 }
 0xb00   : > { %v2020_v27 = vpack.c.bf16 %v2012_v38, %v2004_v37 }
 0xb01   : > { %v2023_v42 = vpack.c.bf16 %v2015_v57, %v2007_v39  ;;  %v6064_v39 = vld [vmem:[%s7744_s30 + $0x10] sm:$0xff] }
 0xb02   : > { %2604 = vmatmul.bf16.vlgmr.msrb.gmra.mxu3 %v2020_v27 }
 0xb03   : > { %2646 = vmatmul.bf16.vlgmr.msra.gmra.mxu2 %v2023_v42 }
 0xb69   : > { %v2563_v46 = vpop.f32.mrf.mxu0 }
 0xb6a   : > { %v2577_v47 = vpop.f32.mrf.mxu1 }
 0xb71   : > { %v2565_v53 = vpop.f32.mrf.mxu0 }
 0xb72   : > { %v2579_v56 = vpop.f32.mrf.mxu1 }
 0xb75   : > { %v2549_v49 = vpop.f32.mrf.mxu3 }
 0xb76   : > { %v2591_v50 = vpop.f32.mrf.mxu2  ;;  %v2550_v51 = vadd.f32 %v6237_v45, %v2549_v49 }
 0xb78   : > { %v2564_v55 = vadd.f32 %v2563_v46, %v2550_v51 }
 0xb79   : > { %v2619_v0 = vpop.f32.mrf.mxu0 }
 0xb7a   : > { %v2578_v60 = vadd.f32 %v2577_v47, %v2564_v55  ;;  %v2633_v3 = vpop.f32.mrf.mxu1 }
 0xb7c   : > { %v2592_v62 = vadd.f32 %v2591_v50, %v2578_v60 }
 0xb7d   : > { %v2551_v58 = vpop.f32.mrf.mxu3 }
 0xb7e   : > { %v2593_v59 = vpop.f32.mrf.mxu2  ;;  %v2552_v61 = vadd.f32 %v6237_v45, %v2551_v58 }
 0xb80   : > { %v2566_v63 = vadd.f32 %v2565_v53, %v2552_v61  ;;  %v6238_v61 = vld [vmem:[%s7699_s15] ss:$0 sm:$0xff] }
 0xb81   : > { %v2621_v14 = vpop.f32.mrf.mxu0 }
 0xb82   : > { %v2580_v4 = vadd.f32 %v2579_v56, %v2566_v63  ;;  %v2635_v18 = vpop.f32.mrf.mxu1 }
 0xb84   : > { %v2594_v9 = vadd.f32 %v2593_v59, %v2580_v4 }
 0xb85   : > { %v2605_v1 = vpop.f32.mrf.mxu3 }
 0xb86   : > { %v2606_v2 = vadd.f32 %v2605_v1, %v2592_v62  ;;  %v2647_v6 = vpop.f32.mrf.mxu2  ;;  %v6239_v1 = vld [vmem:[%s7700_s16] ss:$0 sm:$0xff] }
 0xb88   : > { %v2620_v5 = vadd.f32 %v2619_v0, %v2606_v2 }
 0xb8a   : > { %v2634_v8 = vadd.f32 %v2633_v3, %v2620_v5 }
 0xb8c   : > { %v2648_v10 = vadd.f32 %v2647_v6, %v2634_v8 }
 0xb8d   : > { %v2607_v11 = vpop.f32.mrf.mxu3 }
 0xb8e   : > { %v2608_v12 = vadd.f32 %v2607_v11, %v2594_v9  ;;  %v2652_v13 = vadd.f32 %v2648_v10, %v6853_v15  ;;  %v2649_v21 = vpop.f32.mrf.mxu2  ;;  %v6240_v9 = vld [vmem:[%s7745_s26 + $0x1] ss:$0 sm:$0xff] }
 0xb90   : > { %v2622_v17 = vadd.f32 %v2621_v14, %v2608_v12  ;;  %v2656_v48 = vsel %vm1201_vm11, %v2652_v13, 0.0 }
 0xb91   : > { %2657 = vadd.xlane.f32.xlu1 %v2656_v48 }
 0xb92   : > { %v2636_v52 = vadd.f32 %v2635_v18, %v2622_v17 }
 0xb94   : > { %v2650_v22 = vadd.f32 %v2649_v21, %v2636_v52 }
 0xb96   : > { %v2653_v23 = vadd.f32 %v2650_v22, %v6855_v16  ;;  %v6065_v16 = vld [vmem:[%s7744_s30 + $0x18] sm:$0xff] }
 0xb97   : > { %2742 = vmatpush.bf16.msra.mxu3 %v6065_v16 }
 0xb98   : > { %v2659_v24 = vsel %vm1201_vm11, %v2653_v23, 0.0 }
 0xb99   : > { %2660 = vadd.xlane.f32.xlu1 %v2659_v24 }
 0xb9b   : > { %2743 = vmatpush.bf16.msra.mxu3 %v6064_v39 }
 0xc04   : > { %v2658_v25 = vpop.xlane.xlu1 %2657 }
 0xc05   : > { %v2662_v26 = vmul.f32 %v2658_v25, %v6728_v44 }
 0xc07   : > { %v2664_v28 = vsub.f32 %v2652_v13, %v2662_v26 }
 0xc09   : > { %v2666_v29 = vmul.f32 %v2664_v28, %v2664_v28 }
 0xc0b   : > { %v2668_v15 = vsel %vm1201_vm11, %v2666_v29, 0.0 }
 0xc0c   : > { %2669 = vadd.xlane.f32.xlu1 %v2668_v15  ;;  %v2661_v7 = vpop.xlane.xlu1 %2660 }
 0xc0d   : > { %v2663_v30 = vmul.f32 %v2661_v7, %v6728_v44 }
 0xc0f   : > { %v2665_v54 = vsub.f32 %v2653_v23, %v2663_v30 }
 0xc11   : > { %v2667_v33 = vmul.f32 %v2665_v54, %v2665_v54 }
 0xc13   : > { %v2671_v34 = vsel %vm1201_vm11, %v2667_v33, 0.0 }
 0xc14   : > { %2672 = vadd.xlane.f32.xlu0 %v2671_v34 }
 0xc7f   : > { %v2670_v35 = vpop.xlane.xlu1 %2669 }
 0xc80   : > { %v2674_v37 = vmul.f32 %v2670_v35, %v6728_v44 }
 0xc82   : > { %v2676_v38 = vadd.f32 1e-05, %v2674_v37 }
 0xc84   : > { %6288 = vrsqrt.f32 %v2676_v38  ;;  %vm2684_vm7 = vweird.f32 %v2676_v38 }
 0xc87   : > { %v2673_v57 = vpop.xlane.xlu0 %2672 }
 0xc88   : > { %v2675_v27 = vmul.f32 %v2673_v57, %v6728_v44  ;;  %v5324_v57 = vld [vmem:[%s7691_s7 + $0x10] sm:$0xf] }
 0xc8a   : > { %v6289_v42 = vpop.eup %6288  ;;  %v2677_v46 = vadd.f32 1e-05, %v2675_v27  ;;  %v2975_v27 = vsel %vm1423_vm13, %v5324_v57, 0 }
 0xc8b   : > { %v2679_v47 = vmul.f32 %v6289_v42, %v2676_v38  ;;  %vm2685_vm6 = vweird.f32 %v6289_v42 }
 0xc8c   : > { %6290 = vrsqrt.f32 %v2677_v46  ;;  %vm2686_vm8 = vmor %vm2684_vm7, %vm2685_vm6  ;;  %vm2694_vm10 = vweird.f32 %v2677_v46 }
 0xc8d   : > { %v2680_v45 = vmul.f32 %v6289_v42, %v2679_v47 }
 0xc8f   : > { %v2681_v49 = vmul.f32 0.5, %v2680_v45 }
 0xc91   : > { %v2682_v50 = vsub.f32 1.5, %v2681_v49 }
 0xc92   : > { %v6291_v51 = vpop.eup %6290 }
 0xc93   : > { %v2683_v53 = vmul.f32 %v6289_v42, %v2682_v50  ;;  %v2689_v55 = vmul.f32 %v6291_v51, %v2677_v46  ;;  %vm2695_vm9 = vweird.f32 %v6291_v51 }
 0xc94   : > { %vm2696_vm14 = vmor %vm2694_vm10, %vm2695_vm9 }
 0xc95   : > { %v2690_v56 = vmul.f32 %v6291_v51, %v2689_v55  ;;  %v2687_v58 = vsel %vm2686_vm8, %v6289_v42, %v2683_v53 }
 0xc96   : > { %v2698_v62 = vmul.f32 %v2687_v58, %v2664_v28 }
 0xc97   : > { %v2691_v59 = vmul.f32 0.5, %v2690_v56 }
 0xc98   : > { %v2703_v2 = vmul.f32 %v6238_v61, %v2698_v62 }
 0xc99   : > { %v2692_v60 = vsub.f32 1.5, %v2691_v59 }
 0xc9a   : > { %v7097_v5 = vadd.f32 %v6239_v1, %v2703_v2 }
 0xc9b   : > { %v2693_v63 = vmul.f32 %v6291_v51, %v2692_v60 }
 0xc9d   : > { %v2697_v0 = vsel %vm2696_vm14, %v6291_v51, %v2693_v63 }
 0xc9e   : > { %v2699_v3 = vmul.f32 %v2697_v0, %v2665_v54 }
 0xca0   : > { %v2704_v4 = vmul.f32 %v6238_v61, %v2699_v3 }
 0xca2   : > { %v7099_v6 = vadd.f32 %v6239_v1, %v2704_v4 }
 0xca4   : > { %v2710_v8 = vpack.c.bf16 %v7099_v6, %v7097_v5 }
 0xca6   : > { %5323 = vmatmul.msk.bf16.vlgmr.msra.gmra.mxu3 %vm1201_vm11, %v2710_v8 }
 0xd29   : > { %v2745_v10 = vpop.f32.mrf.mxu3 }
 0xd2a   : > { %v2746_v11 = vadd.f32 %v6240_v9, %v2745_v10 }
 0xd2c   : > { %2759 = vrot.lane.b32.xlu1 %v2746_v11, %s7746_s1  ;;  %v2755_v17 = vmul.f32 0.35355338, %v2746_v11 }
 0xd31   : > { %v2747_v12 = vpop.f32.mrf.mxu3 }
 0xd32   : > { %v2748_v13 = vadd.f32 %v6240_v9, %v2747_v12 }
 0xd34   : > { %2761 = vrot.lane.b32.xlu2 %v2748_v13, %s7746_s1  ;;  %v7109_v14 = vpack.i.bf16 %v2746_v11, %v2748_v13  ;;  %v2756_v48 = vmul.f32 0.35355338, %v2748_v13  ;;  %s7755_s1 = smov 48  }
 0xd3c   : > { %6212 = vrot.lane.b32.xlu2 %v7109_v14, %s7747_s25  ;;  %s7756_s25 = smov 40  }
 0xd44   : > { %2858 = vrot.lane.b32.xlu2 %v2746_v11, %s7748_s28 }
 0xd4c   : > { %2854 = vrot.lane.b32.xlu2 %v2755_v17, %s7749_s29 }
 0xd54   : > { %2997 = vrot.lane.b32.xlu2 %v2748_v13, %s7750_s4 }
 0xd5c   : > { %2995 = vrot.lane.b32.xlu2 %v2746_v11, %s7750_s4 }
 0xd64   : > { %2991 = vrot.lane.b32.xlu2 %v2755_v17, %s7751_s6 }
 0xd6c   : > { %3112 = vrot.lane.b32.xlu2 %v2756_v48, %s7752_s2 }
 0xd8e   : > { %v2762_v18 = vpop.permute.xlu2 %2761 }
 0xd8f   : > { %5328 = vmatpush.xpose.msk.msra.mxu0 %vm1231_vm12, %v2762_v18 }
 0xd96   : > { %v6213_v52 = vpop.permute.xlu2 %6212 }
 0xd97   : > { %v6214_v21 = vunpack.i.l.bf16 %v6213_v52  ;;  %v6215_v22 = vunpack.i.h.bf16 %v6213_v52 }
 0xd99   : > { %2844 = vmatpush.msra.mxu1 %v6214_v21 }
 0xd9b   : > { %2845 = vmatpush.msra.mxu1 %v6215_v22 }
 0xd9d   : > { %2984 = vmatpush.bf16.msrb.mxu1 %v2975_v27 }
 0xd9e   : > { %v2760_v23 = vpop.permute.xlu1 %2759  ;;  %v2859_v38 = vpop.permute.xlu2 %2858 }
 0xd9f   : > { %5329 = vmatpush.xpose.msk.msra.mxu0 %vm1231_vm12, %v2760_v23 }
 0xda2   : > { %5330 = vmatmul.msk.f32.vlgmr.msra.gmra.mxu0 %vm1231_vm12, %v2755_v17 }
 0xda6   : > { %v2855_v46 = vpop.permute.xlu2 %2854 }
 0xdaa   : > { %5331 = vmatmul.msk.f32.gmra.mxu0 %vm1231_vm12, %v2756_v48 }
 0xdae   : > { %v2998_v51 = vpop.permute.xlu2 %2997 }
 0xdb6   : > { %v2996_v56 = vpop.permute.xlu2 %2995 }
 0xdbe   : > { %v2992_v59 = vpop.permute.xlu2 %2991 }
 0xdc6   : > { %v3113_v9 = vpop.permute.xlu2 %3112 }
 0xe1f   : > { %v2790_v24 = vpop.f32.mrf.mxu0 }
 0xe20   : > { %v2796_v25 = vsel %vm753_vm4, %v2790_v24, -inf }
 0xe21   : > { %2797 = vmax.xlane.f32.xlu0 %v2796_v25 }
 0xe27   : > { %v2793_v26 = vpop.f32.mrf.mxu0 }
 0xe28   : > { %v2799_v28 = vsel %vm753_vm4, %v2793_v26, -inf }
 0xe29   : > { %2800 = vmax.xlane.f32.xlu0 %v2799_v28 }
 0xe94   : > { %v2798_v29 = vpop.xlane.xlu0 %2797 }
 0xe95   : > { %v2802_v15 = vsub.f32 %v2790_v24, %v2798_v29 }
 0xe97   : > { %v2804_v7 = vmul.f32 1.442695, %v2802_v15 }
 0xe99   : > { %6292 = vpow2.f32 %v2804_v7 }
 0xe9c   : > { %v2801_v30 = vpop.xlane.xlu0 %2800 }
 0xe9d   : > { %v2803_v54 = vsub.f32 %v2793_v26, %v2801_v30 }
 0xe9f   : > { %v6293_v33 = vpop.eup %6292  ;;  %v2806_v34 = vmul.f32 1.442695, %v2803_v54 }
 0xea0   : > { %v2808_v16 = vsel %vm753_vm4, %v6293_v33, 0.0 }
 0xea1   : > { %6294 = vpow2.f32 %v2806_v34  ;;  %2809 = vadd.xlane.f32.xlu0 %v2808_v16 }
 0xea7   : > { %v6295_v35 = vpop.eup %6294 }
 0xea8   : > { %v2811_v37 = vsel %vm753_vm4, %v6295_v35, 0.0 }
 0xea9   : > { %2812 = vadd.xlane.f32.xlu1 %v2811_v37 }
 0xeb5   : > { %2860 = vrot.lane.b32.xlu0 %v2748_v13, %s7748_s28 }
 0xebd   : > { %2856 = vrot.lane.b32.xlu0 %v2756_v48, %s7749_s29 }
 0xec2   : > { %3110 = vrot.lane.b32.xlu1 %v2755_v17, %s7752_s2 }
 0xec5   : > { %3116 = vrot.lane.b32.xlu0 %v2748_v13, %s7753_s27 }
 0xecd   : > { %3114 = vrot.lane.b32.xlu0 %v2746_v11, %s7753_s27  ;;  %s7757_s27 = sshll.u32 %s7759_s0, 3 }
 0xed5   : > { %2993 = vrot.lane.b32.xlu0 %v2756_v48, %s7751_s6 }
 0xf14   : > { %v2810_v39 = vpop.xlane.xlu0 %2809 }
 0xf15   : > { %6296 = vrcp.f32 %v2810_v39 }
 0xf1b   : > { %v6297_v42 = vpop.eup %6296 }
 0xf1c   : > { %v2816_v47 = vmul.f32 %v6297_v42, %v6293_v33  ;;  %v2813_v45 = vpop.xlane.xlu1 %2812 }
 0xf1d   : > { %6298 = vrcp.f32 %v2813_v45 }
 0xf1e   : > { %5332 = vmatmul.msk.f32.vlgmr.msra.gmra.mxu1 %vm753_vm4, %v2816_v47 }
 0xf23   : > { %v6299_v49 = vpop.eup %6298 }
 0xf24   : > { %v2817_v50 = vmul.f32 %v6299_v49, %v6295_v35 }
 0xf26   : > { %5333 = vmatmul.msk.f32.gmra.mxu1 %vm753_vm4, %v2817_v50 }
 0xf27   : > { %v2861_v53 = vpop.permute.xlu0 %2860 }
 0xf28   : > { %5334 = vmatpush.xpose.msk.msrb.mxu2 %vm1231_vm12, %v2861_v53 }
 0xf2c   : > { %5335 = vmatpush.xpose.msk.msrb.mxu2 %vm1231_vm12, %v2859_v38 }
 0xf2f   : > { %5336 = vmatmul.msk.f32.vlgmr.msrb.gmra.mxu2 %vm1231_vm12, %v2855_v46  ;;  %v2857_v55 = vpop.permute.xlu0 %2856 }
 0xf30   : > { %5342 = vmatpush.xpose.msk.msra.mxu2 %vm1231_vm12, %v2998_v51 }
 0xf34   : > { %5343 = vmatpush.xpose.msk.msra.mxu2 %vm1231_vm12, %v2996_v56  ;;  %v3111_v3 = vpop.permute.xlu1 %3110 }
 0xf37   : > { %5337 = vmatmul.msk.f32.gmra.mxu2 %vm1231_vm12, %v2857_v55  ;;  %v3117_v58 = vpop.permute.xlu0 %3116 }
 0xf38   : > { %5349 = vmatpush.xpose.msk.msra.mxu1 %vm1231_vm12, %v3117_v58 }
 0xf3f   : > { %5344 = vmatmul.msk.f32.vlgmr.msra.gmra.mxu2 %vm1231_vm12, %v2992_v59  ;;  %v3115_v60 = vpop.permute.xlu0 %3114 }
 0xf40   : > { %5350 = vmatpush.xpose.msk.msra.mxu1 %vm1231_vm12, %v3115_v60 }
 0xf47   : > { %v2994_v61 = vpop.permute.xlu0 %2993 }
 0xf48   : > { %5345 = vmatmul.msk.f32.gmra.mxu2 %vm1231_vm12, %v2994_v61 }
 0xf9b   : > { %v2847_v62 = vpop.f32.mrf.mxu1 }
 0xfa3   : > { %v2850_v63 = vpop.f32.mrf.mxu1 }
 0xfa4   : > { %v2853_v0 = vpack.c.bf16 %v2850_v63, %v2847_v62 }
 0xfa6   : > { %5341 = vmatmul.msk.bf16.vlgmr.msrb.gmra.mxu1 %vm1231_vm12, %v2853_v0 }
 0xfb2   : > { %v2887_v1 = vpop.f32.mrf.mxu2 }
 0xfb3   : > { %v2893_v2 = vsel %vm753_vm4, %v2887_v1, -inf }
 0xfb4   : > { %2894 = vmax.xlane.f32.xlu0 %v2893_v2 }
 0xfb6   : > { %5351 = vmatmul.msk.f32.vlgmr.msra.gmra.mxu1 %vm1231_vm12, %v3111_v3 }
 0xfba   : > { %v2890_v4 = vpop.f32.mrf.mxu2 }
 0xfbb   : > { %v2896_v8 = vsel %vm753_vm4, %v2890_v4, -inf }
 0xfbc   : > { %2897 = vmax.xlane.f32.xlu2 %v2896_v8 }
 0xfbe   : > { %5352 = vmatmul.msk.f32.gmra.mxu1 %vm1231_vm12, %v3113_v9 }
 0xfc2   : > { %v3024_v10 = vpop.f32.mrf.mxu2 }
 0xfc3   : > { %v3030_v11 = vsel %vm753_vm4, %v3024_v10, -inf }
 0xfc4   : > { %3031 = vmax.xlane.f32.xlu2 %v3030_v11 }
 0xfcb   : > { %v3027_v12 = vpop.f32.mrf.mxu2 }
 0xfcc   : > { %v3033_v13 = vsel %vm753_vm4, %v3027_v12, -inf }
 0xfcd   : > { %3034 = vmax.xlane.f32.xlu2 %v3033_v13 }
0x1023   : > { %v7156_v17 = vpop.f32.mrf.mxu1 }
0x1027   : > { %v2895_v52 = vpop.xlane.xlu0 %2894 }
0x1028   : > { %v2899_v23 = vsub.f32 %v2887_v1, %v2895_v52 }
0x102a   : > { %v2901_v26 = vmul.f32 1.442695, %v2899_v23 }
0x102b   : > { %v7158_v48 = vpop.f32.mrf.mxu1 }
0x102f   : > { %v2898_v18 = vpop.xlane.xlu2 %2897 }
0x1030   : > { %v2900_v21 = vsub.f32 %v2890_v4, %v2898_v18  ;;  %v5325_v18 = vld [vmem:[%s7691_s7 + $0x14] sm:$0xf] }
0x1031   : > { %v2955_v52 = vsel %vm1423_vm13, %v5325_v18, 0  ;;  %v5410_v18 = vld [vmem:[%s7695_s11 + $0xc0] sm:$0xf] }
0x1032   : > { %v2903_v22 = vmul.f32 1.442695, %v2900_v21  ;;  %2964 = vmatpush.bf16.msrb.mxu0 %v2955_v52  ;;  %v6078_v52 = vld [vmem:[%s7695_s11 + $0xdc] sm:$0xf0] }
0x1033   : > { %v3143_v24 = vpop.f32.mrf.mxu1 }
0x1034   : > { %6300 = vpow2.f32 %v2903_v22  ;;  %v3149_v25 = vsel %vm753_vm4, %v3143_v24, -inf }
0x1035   : > { %3150 = vmax.xlane.f32.xlu1 %v3149_v25  ;;  %6302 = vpow2.f32 %v2901_v26 }
0x1037   : > { %v3032_v28 = vpop.xlane.xlu2 %3031 }
0x1038   : > { %v3036_v29 = vsub.f32 %v3024_v10, %v3032_v28 }
0x103a   : > { %v6301_v15 = vpop.eup %6300  ;;  %v3038_v7 = vmul.f32 1.442695, %v3036_v29 }
0x103b   : > { %v3146_v30 = vpop.f32.mrf.mxu1  ;;  %v2908_v54 = vsel %vm753_vm4, %v6301_v15, 0.0  ;;  %v6303_v34 = vpop.eup %6302 }
0x103c   : > { %6304 = vpow2.f32 %v3038_v7  ;;  %2909 = vadd.xlane.f32.xlu2 %v2908_v54  ;;  %v3152_v33 = vsel %vm753_vm4, %v3146_v30, -inf  ;;  %v2905_v37 = vsel %vm753_vm4, %v6303_v34, 0.0 }
0x103d   : > { %3153 = vmax.xlane.f32.xlu0 %v3152_v33 }
0x1040   : > { %v3035_v27 = vpop.xlane.xlu2 %3034 }
0x1041   : > { %v3037_v47 = vsub.f32 %v3027_v12, %v3035_v27 }
0x1042   : > { %v6305_v16 = vpop.eup %6304 }
0x1043   : > { %v3042_v35 = vsel %vm753_vm4, %v6305_v16, 0.0  ;;  %v3040_v51 = vmul.f32 1.442695, %v3037_v47 }
0x1044   : > { %3043 = vadd.xlane.f32.xlu2 %v3042_v35  ;;  %v5327_v35 = vld [vmem:[%s7691_s7 + $0x1c] sm:$0xf] }
0x1045   : > { %2906 = vadd.xlane.f32.xlu0 %v2905_v37  ;;  %v3211_v37 = vsel %vm1423_vm13, %v5327_v35, 0 }
0x104e   : > { %6217 = vrot.lane.b32.xlu1 %v7109_v14, %s7754_s5  ;;  %s685_s5 = scalar_lea.vmem %s7706_s22, %s7757_s27 }
0x1056   : > { %6227 = vrot.lane.b32.xlu1 %v7109_v14, %s7755_s1 }
0x10a8   : > { %v3151_v38 = vpop.xlane.xlu1 %3150 }
0x10a9   : > { %v3155_v39 = vsub.f32 %v3143_v24, %v3151_v38 }
0x10ab   : > { %v3157_v57 = vmul.f32 1.442695, %v3155_v39 }
0x10ad   : > { %6306 = vpow2.f32 %v3157_v57 }
0x10af   : > { %v2910_v58 = vpop.xlane.xlu2 %2909 }
0x10b0   : > { %v3154_v42 = vpop.xlane.xlu0 %3153 }
0x10b1   : > { %v3156_v46 = vsub.f32 %v3146_v30, %v3154_v42 }
0x10b3   : > { %v6307_v45 = vpop.eup %6306  ;;  %v3159_v49 = vmul.f32 1.442695, %v3156_v46 }
0x10b4   : > { %v3161_v50 = vsel %vm753_vm4, %v6307_v45, 0.0 }
0x10b5   : > { %6308 = vpow2.f32 %v3159_v49  ;;  %3162 = vadd.xlane.f32.xlu0 %v3161_v50 }
0x10b6   : > { %6310 = vpow2.f32 %v3040_v51 }
0x10b7   : > { %v3044_v2 = vpop.xlane.xlu2 %3043 }
0x10b8   : > { %v2907_v53 = vpop.xlane.xlu0 %2906 }
0x10b9   : > { %6312 = vrcp.f32 %v2907_v53  ;;  %v6241_v53 = vld [vmem:[%s7692_s8 + $0x1] ss:$0 sm:$0xff] }
0x10ba   : > { %6314 = vrcp.f32 %v2910_v58 }
0x10bb   : > { %v6309_v55 = vpop.eup %6308  ;;  %6316 = vrcp.f32 %v3044_v2 }
0x10bc   : > { %v3164_v56 = vsel %vm753_vm4, %v6309_v55, 0.0  ;;  %v6311_v59 = vpop.eup %6310 }
0x10bd   : > { %3165 = vadd.xlane.f32.xlu2 %v3164_v56  ;;  %v3045_v1 = vsel %vm753_vm4, %v6311_v59, 0.0 }
0x10bf   : > { %v6313_v61 = vpop.eup %6312 }
0x10c0   : > { %v6218_v60 = vpop.permute.xlu1 %6217  ;;  %v2913_v0 = vmul.f32 %v6313_v61, %v6303_v34  ;;  %v6315_v4 = vpop.eup %6314  ;;  %v5326_v34 = vld [vmem:[%s7691_s7 + $0x18] sm:$0xf] }
0x10c1   : > { %v6219_v62 = vunpack.i.l.bf16 %v6218_v60  ;;  %v6220_v63 = vunpack.i.h.bf16 %v6218_v60  ;;  %v2914_v10 = vmul.f32 %v6315_v4, %v6301_v15  ;;  %v6317_v11 = vpop.eup %6316 }
0x10c2   : > { %v3050_v12 = vmul.f32 %v6317_v11, %v6305_v16  ;;  %v3092_v16 = vsel %vm1423_vm13, %v5326_v34, 0  ;;  %v6066_v34 = vld [vmem:[%s7695_s11 + $0x84] sm:$0xf] }
0x10c3   : > { %2941 = vmatpush.msrb.mxu3 %v6219_v62  ;;  %3101 = vmatpush.bf16.msra.mxu0 %v3092_v16 }
0x10c5   : > { %2942 = vmatpush.msrb.mxu3 %v6220_v63  ;;  %3046 = vadd.xlane.f32.xlu2 %v3045_v1 }
0x10c6   : > { %5338 = vmatmul.msk.f32.vlgmr.msrb.gmra.mxu3 %vm753_vm4, %v2913_v0 }
0x10c8   : > { %v6228_v3 = vpop.permute.xlu1 %6227 }
0x10c9   : > { %v6229_v8 = vunpack.i.l.bf16 %v6228_v3  ;;  %6222 = vrot.lane.b32.xlu0 %v7109_v14, %s7756_s25  ;;  %v6230_v9 = vunpack.i.h.bf16 %v6228_v3 }
0x10cb   : > { %3078 = vmatpush.msra.mxu3 %v6229_v8 }
0x10cd   : > { %3079 = vmatpush.msra.mxu3 %v6230_v9 }
0x10ce   : > { %5339 = vmatmul.msk.f32.gmra.mxu3 %vm753_vm4, %v2914_v10 }
0x10cf   : > { %3220 = vmatpush.bf16.msrb.mxu3 %v3211_v37  ;;  %v5380_v37 = vld [vmem:[%s7695_s11 + $0xa0] sm:$0xf0] }
0x10d6   : > { %5346 = vmatmul.msk.f32.vlgmr.msra.gmra.mxu3 %vm753_vm4, %v3050_v12 }
0x1128   : > { %v3163_v14 = vpop.xlane.xlu0 %3162 }
0x1129   : > { %6318 = vrcp.f32 %v3163_v14  ;;  %v6074_v14 = vld [vmem:[%s7695_s11 + $0xc4] sm:$0xf] }
0x112f   : > { %v6319_v23 = vpop.eup %6318 }
0x1130   : > { %v3166_v13 = vpop.xlane.xlu2 %3165  ;;  %v3169_v28 = vmul.f32 %v6319_v23, %v6307_v45  ;;  %v5418_v23 = vld [vmem:[%s7695_s11 + $0xc8] sm:$0xf] }
0x1138   : > { %v3047_v21 = vpop.xlane.xlu2 %3046 }
0x1139   : > { %6320 = vrcp.f32 %v3047_v21  ;;  %v5411_v21 = vor.u32 %v6078_v52, %v5410_v18  ;;  %v6069_v18 = vld [vmem:[%s7695_s11 + $0x9c] sm:$0xf] }
0x113a   : > { %6322 = vrcp.f32 %v3166_v13  ;;  %v5404_v52 = vld [vmem:[%s7695_s11 + $0xb8] sm:$0xf0] }
0x113b   : > { %v6223_v22 = vpop.permute.xlu0 %6222 }
0x113c   : > { %v6224_v24 = vunpack.i.l.bf16 %v6223_v22  ;;  %v6225_v25 = vunpack.i.h.bf16 %v6223_v22  ;;  %v5412_v22 = vld [vmem:[%s7695_s11 + $0xe0] sm:$0xf0] }
0x113e   : > { %3197 = vmatpush.msrb.mxu2 %v6224_v24  ;;  %v6079_v24 = vld [vmem:[%s7695_s11 + $0xe4] sm:$0xf0] }
0x113f   : > { %v6321_v26 = vpop.eup %6320 }
0x1140   : > { %3198 = vmatpush.msrb.mxu2 %v6225_v25  ;;  %v3051_v29 = vmul.f32 %v6321_v26, %v6311_v59  ;;  %v6323_v15 = vpop.eup %6322  ;;  %v5415_v26 = vor.u32 %v6074_v14, %v5412_v22 }
0x1141   : > { %5353 = vmatmul.msk.f32.vlgmr.msrb.gmra.mxu2 %vm753_vm4, %v3169_v28  ;;  %v3170_v7 = vmul.f32 %v6323_v15, %v6309_v55  ;;  %v5419_v28 = vor.u32 %v6079_v24, %v5418_v23  ;;  %v5420_v15 = vld [vmem:[%s7695_s11 + $0xe8] sm:$0xf0] }
0x1142   : > { %5347 = vmatmul.msk.f32.gmra.mxu3 %vm753_vm4, %v3051_v29  ;;  %v6075_v29 = vld [vmem:[%s7695_s11 + $0xcc] sm:$0xf]  ;;  %3436 = vmatpush.bf16.msrb.mxu1 %v5415_v26 }
0x1143   : > { %3450 = vmatpush.bf16.msra.mxu2 %v5419_v28 }
0x1149   : > { %v2944_v30 = vpop.f32.mrf.mxu3  ;;  %5354 = vmatmul.msk.f32.gmra.mxu2 %vm753_vm4, %v3170_v7 }
0x1151   : > { %v2947_v54 = vpop.f32.mrf.mxu3 }
0x1152   : > { %v2950_v33 = vpack.c.bf16 %v2947_v54, %v2944_v30  ;;  %v5423_v30 = vor.u32 %v6075_v29, %v5420_v15  ;;  %v5378_v54 = vld [vmem:[%s7695_s11 + $0x80] sm:$0xf] }
0x1154   : > { %5340 = vmatmul.msk.bf16.vlgmr.msrb.gmra.mxu0 %vm1231_vm12, %v2950_v33  ;;  %v6070_v33 = vld [vmem:[%s7695_s11 + $0x9c] sm:$0xf0]  ;;  %3464 = vmatpush.bf16.msra.mxu3 %v5423_v30 }
0x1155   : > { %3422 = vmatpush.bf16.msrb.mxu0 %v5411_v21  ;;  %v5379_v35 = vor.u32 %v6070_v33, %v5378_v54  ;;  %v5407_v21 = vor.u32 %v6069_v18, %v5404_v52  ;;  %v6242_v30 = vld [vmem:[%s7693_s9 + $0x1] ss:$0 sm:$0xff]  ;;  %v6107_v18 = vld [vmem:[%s7697_s13 + $0x2c8] sm:$0xff]  ;;  %v6120_v52 = vld [vmem:[%s7697_s13 + $0x330] sm:$0xff] }
0x1159   : > { %v3081_v38 = vpop.f32.mrf.mxu3  ;;  %3423 = vmatpush.bf16.msrb.mxu0 %v5379_v35 }
0x11c4   : > { %v3200_v39 = vpop.f32.mrf.mxu2 }
0x11c5   : > { %v3084_v57 = vpop.f32.mrf.mxu3 }
0x11c6   : > { %v3087_v27 = vpack.c.bf16 %v3084_v57, %v3081_v38  ;;  %v5386_v38 = vld [vmem:[%s7695_s11 + $0x88] sm:$0xf] }
0x11c7   : > { %v6071_v57 = vld [vmem:[%s7695_s11 + $0xa4] sm:$0xf0] }
0x11c8   : > { %5348 = vmatmul.msk.bf16.vlgmr.msra.gmra.mxu0 %vm1231_vm12, %v3087_v27  ;;  %v6067_v27 = vld [vmem:[%s7695_s11 + $0x8c] sm:$0xf] }
0x11cc   : > { %v3203_v42 = vpop.f32.mrf.mxu2 }
0x11cd   : > { %v3206_v46 = vpack.c.bf16 %v3203_v42, %v3200_v39  ;;  %v5383_v39 = vor.u32 %v6066_v34, %v5380_v37  ;;  %v5388_v42 = vld [vmem:[%s7695_s11 + $0xa8] sm:$0xf0] }
0x11cf   : > { %5355 = vmatmul.msk.bf16.vlgmr.msrb.gmra.mxu3 %vm1231_vm12, %v3206_v46  ;;  %v5387_v46 = vor.u32 %v6071_v57, %v5386_v38  ;;  %3437 = vmatpush.bf16.msrb.mxu1 %v5383_v39 }
0x11d1   : > { %v2966_v47 = vpop.f32.mrf.mxu0  ;;  %3451 = vmatpush.bf16.msra.mxu2 %v5387_v46  ;;  %v6113_v46 = vld [vmem:[%s7697_s13 + $0x2f8] sm:$0xff] }
0x11d2   : > { %v2987_v50 = vadd.f32 %v7156_v17, %v2966_v47  ;;  %v5391_v47 = vor.u32 %v6067_v27, %v5388_v42  ;;  %v6097_v42 = vld [vmem:[%s7697_s13 + $0x278] sm:$0xff] }
0x11d4   : > { %3465 = vmatpush.bf16.msra.mxu3 %v5391_v47  ;;  %v6088_v47 = vld [vmem:[%s7697_s13 + $0x230] sm:$0xff] }
0x11d9   : > { %v2968_v45 = vpop.f32.mrf.mxu0 }
0x11da   : > { %v2989_v60 = vadd.f32 %v7158_v48, %v2968_v45 }
0x1245   : > { %v3103_v49 = vpop.f32.mrf.mxu0 }
0x1246   : > { %v3108_v51 = vadd.f32 %v3103_v49, %v2987_v50  ;;  %v5426_v49 = vld [vmem:[%s7695_s11 + $0xd0] sm:$0xf] }
0x1247   : > { %v6080_v50 = vld [vmem:[%s7695_s11 + $0xec] sm:$0xf0] }
0x124d   : > { %v3105_v59 = vpop.f32.mrf.mxu0 }
0x124e   : > { %v3109_v62 = vadd.f32 %v3105_v59, %v2989_v60  ;;  %v6081_v59 = vld [vmem:[%s7695_s11 + $0xf4] sm:$0xf0] }
0x1252   : > { %v3222_v55 = vpop.f32.mrf.mxu3 }
0x1253   : > { %v3227_v56 = vadd.f32 %v3222_v55, %v3108_v51  ;;  %v6076_v51 = vld [vmem:[%s7695_s11 + $0xd4] sm:$0xf]  ;;  %v5427_v55 = vor.u32 %v6080_v50, %v5426_v49 }
0x1254   : > { %v6104_v49 = vld [vmem:[%s7697_s13 + $0x2b0] sm:$0xff] }
0x1255   : > { %v3234_v58 = vadd.f32 %v6241_v53, %v3227_v56  ;;  %v5428_v56 = vld [vmem:[%s7695_s11 + $0xf0] sm:$0xf0]  ;;  %3478 = vmatpush.bf16.msra.mxu0 %v5427_v55  ;;  %v6103_v55 = vld [vmem:[%s7697_s13 + $0x2a8] sm:$0xff] }
0x1256   : > { %v5431_v60 = vor.u32 %v6076_v51, %v5428_v56  ;;  %v6112_v50 = vld [vmem:[%s7697_s13 + $0x2f0] sm:$0xff]  ;;  %v6087_v51 = vld [vmem:[%s7697_s13 + $0x228] sm:$0xff] }
0x1257   : > { %v3236_v61 = vadd.f32 %v3234_v58, %v7097_v5  ;;  %v5434_v58 = vld [vmem:[%s7695_s11 + $0xd8] sm:$0xf]  ;;  %v6111_v56 = vld [vmem:[%s7697_s13 + $0x2e8] sm:$0xff] }
0x1258   : > { %3492 = vmatpush.bf16.msra.mxu1 %v5431_v60  ;;  %v6102_v60 = vld [vmem:[%s7697_s13 + $0x2a0] sm:$0xff] }
0x1259   : > { %v3242_v63 = vsel %vm1201_vm11, %v3236_v61, 0.0 }
0x125a   : > { %3243 = vadd.xlane.f32.xlu0 %v3242_v63  ;;  %v3224_v0 = vpop.f32.mrf.mxu3  ;;  %v5436_v63 = vld [vmem:[%s7695_s11 + $0xf8] sm:$0xf0] }
0x125b   : > { %v3228_v1 = vadd.f32 %v3224_v0, %v3109_v62  ;;  %v6077_v62 = vld [vmem:[%s7695_s11 + $0xdc] sm:$0xf]  ;;  %v5394_v0 = vld [vmem:[%s7695_s11 + $0x90] sm:$0xf] }
0x125d   : > { %v3235_v17 = vadd.f32 %v6241_v53, %v3228_v1 }
0x125f   : > { %v3237_v2 = vadd.f32 %v3235_v17, %v7099_v6 }
0x1261   : > { %v3245_v3 = vsel %vm1201_vm11, %v3237_v2, 0.0 }
0x1262   : > { %3246 = vadd.xlane.f32.xlu1 %v3245_v3  ;;  %v6072_v3 = vld [vmem:[%s7695_s11 + $0xac] sm:$0xf0] }
0x12cd   : > { %v3244_v4 = vpop.xlane.xlu0 %3243 }
0x12ce   : > { %v3248_v8 = vmul.f32 %v3244_v4, %v6728_v44  ;;  %v6068_v4 = vld [vmem:[%s7695_s11 + $0x94] sm:$0xf] }
0x12d0   : > { %v7205_v9 = vsub.f32 %v3236_v61, %v3248_v8  ;;  %v5435_v61 = vor.u32 %v6081_v59, %v5434_v58  ;;  %v6086_v58 = vld [vmem:[%s7697_s13 + $0x220] sm:$0xff] }
0x12d1   : > { %v6094_v59 = vld [vmem:[%s7697_s13 + $0x260] sm:$0xff] }
0x12d2   : > { %v3252_v5 = vmul.f32 %v7205_v9, %v7205_v9  ;;  %3506 = vmatpush.bf16.msrb.mxu2 %v5435_v61  ;;  %v6110_v61 = vld [vmem:[%s7697_s13 + $0x2e0] sm:$0xff] }
0x12d4   : > { %v3254_v48 = vsel %vm1201_vm11, %v3252_v5, 0.0  ;;  %v5395_v5 = vor.u32 %v6072_v3, %v5394_v0  ;;  %v6101_v0 = vld [vmem:[%s7697_s13 + $0x298] sm:$0xff]  ;;  %v6100_v3 = vld [vmem:[%s7697_s13 + $0x290] sm:$0xff] }
0x12d5   : > { %3255 = vadd.xlane.f32.xlu2 %v3254_v48  ;;  %v3247_v10 = vpop.xlane.xlu1 %3246  ;;  %v5396_v48 = vld [vmem:[%s7695_s11 + $0xb0] sm:$0xf0] }
0x12d6   : > { %v3249_v11 = vmul.f32 %v3247_v10, %v6728_v44  ;;  %v5402_v10 = vld [vmem:[%s7695_s11 + $0x98] sm:$0xf]  ;;  %3479 = vmatpush.bf16.msra.mxu0 %v5395_v5  ;;  %v6091_v5 = vld [vmem:[%s7697_s13 + $0x248] sm:$0xff] }
0x12d8   : > { %v7211_v12 = vsub.f32 %v3237_v2, %v3249_v11  ;;  %v5439_v2 = vor.u32 %v6077_v62, %v5436_v63  ;;  %v6073_v11 = vld [vmem:[%s7695_s11 + $0xb4] sm:$0xf0] }
0x12d9   : > { %v6085_v62 = vld [vmem:[%s7697_s13 + $0x218] sm:$0xff] }
0x12da   : > { %v3253_v6 = vmul.f32 %v7211_v12, %v7211_v12  ;;  %3520 = vmatpush.bf16.msrb.mxu3 %v5439_v2  ;;  %v6093_v63 = vld [vmem:[%s7697_s13 + $0x258] sm:$0xff]  ;;  %v6092_v2 = vld [vmem:[%s7697_s13 + $0x250] sm:$0xff] }
0x12dc   : > { %v3257_v13 = vsel %vm1201_vm11, %v3253_v6, 0.0  ;;  %v5399_v6 = vor.u32 %v6068_v4, %v5396_v48  ;;  %v6108_v4 = vld [vmem:[%s7697_s13 + $0x2d0] sm:$0xff]  ;;  %v6082_v48 = vld [vmem:[%s7697_s13 + $0x200] sm:$0xff] }
0x12dd   : > { %3258 = vadd.xlane.f32.xlu2 %v3257_v13  ;;  %v5403_v13 = vor.u32 %v6073_v11, %v5402_v10  ;;  %v6090_v10 = vld [vmem:[%s7697_s13 + $0x240] sm:$0xff]  ;;  %v6121_v11 = vld [vmem:[%s7697_s13 + $0x338] sm:$0xff] }
0x12de   : > { %3493 = vmatpush.bf16.msra.mxu1 %v5399_v6  ;;  %3521 = vmatpush.bf16.msrb.mxu3 %v5407_v21  ;;  %v6129_v6 = vld [vmem:[%s7697_s13 + $0x378] sm:$0xff]  ;;  %v6098_v21 = vld [vmem:[%s7697_s13 + $0x280] sm:$0xff] }
0x12df   : > { %3507 = vmatpush.bf16.msrb.mxu2 %v5403_v13  ;;  %v6099_v13 = vld [vmem:[%s7697_s13 + $0x288] sm:$0xff] }
0x1348   : > { %v3256_v25 = vpop.xlane.xlu2 %3255 }
0x1349   : > { %v3260_v7 = vmul.f32 %v3256_v25, %v6728_v44 }
0x134b   : > { %v7250_v16 = vadd.f32 1e-05, %v3260_v7 }
0x134d   : > { %6324 = vrsqrt.f32 %v7250_v16  ;;  %vm3270_vm13 = vweird.f32 %v7250_v16 }
0x1350   : > { %v3259_v45 = vpop.xlane.xlu2 %3258 }
0x1351   : > { %v3261_v53 = vmul.f32 %v3259_v45, %v6728_v44  ;;  %v6096_v45 = vld [vmem:[%s7697_s13 + $0x270] sm:$0xff] }
0x1353   : > { %v6325_v1 = vpop.eup %6324  ;;  %v3263_v17 = vadd.f32 1e-05, %v3261_v53  ;;  %v6095_v53 = vld [vmem:[%s7697_s13 + $0x268] sm:$0xff] }
0x1354   : > { %v3265_v8 = vmul.f32 %v6325_v1, %v7250_v16  ;;  %vm3271_vm12 = vweird.f32 %v6325_v1  ;;  %v6243_v16 = vld [vmem:[%s7694_s10 + $0x1] ss:$0 sm:$0xff] }
0x1355   : > { %6326 = vrsqrt.f32 %v3263_v17  ;;  %vm3272_vm15 = vmor %vm3270_vm13, %vm3271_vm12  ;;  %vm3280_vm1 = vweird.f32 %v3263_v17 }
0x1356   : > { %v3266_v14 = vmul.f32 %v6325_v1, %v3265_v8  ;;  %v6083_v8 = vld [vmem:[%s7697_s13 + $0x208] sm:$0xff] }
0x1358   : > { %v3267_v22 = vmul.f32 0.5, %v3266_v14  ;;  %v6128_v14 = vld [vmem:[%s7697_s13 + $0x370] sm:$0xff] }
0x135a   : > { %v3268_v23 = vsub.f32 1.5, %v3267_v22  ;;  %v6106_v22 = vld [vmem:[%s7697_s13 + $0x2c0] sm:$0xff] }
0x135b   : > { %v6327_v24 = vpop.eup %6326 }
0x135c   : > { %v3269_v25 = vmul.f32 %v6325_v1, %v3268_v23  ;;  %v3275_v26 = vmul.f32 %v6327_v24, %v3263_v17  ;;  %vm3281_vm0 = vweird.f32 %v6327_v24  ;;  %v6084_v17 = vld [vmem:[%s7697_s13 + $0x210] sm:$0xff]  ;;  %v6137_v23 = vld [vmem:[%s7697_s13 + $0x3b8] sm:$0xff] }
0x135d   : > { %vm3282_vm2 = vmor %vm3280_vm1, %vm3281_vm0 }
0x135e   : > { %v3276_v28 = vmul.f32 %v6327_v24, %v3275_v26  ;;  %v3273_v29 = vsel %vm3272_vm15, %v6325_v1, %v3269_v25  ;;  %v6109_v1 = vld [vmem:[%s7697_s13 + $0x2d8] sm:$0xff]  ;;  %v6119_v25 = vld [vmem:[%s7697_s13 + $0x328] sm:$0xff] }
0x135f   : > { %v3284_v54 = vmul.f32 %v3273_v29, %v7205_v9  ;;  %v6089_v9 = vld [vmem:[%s7697_s13 + $0x238] sm:$0xff]  ;;  %v6127_v26 = vld [vmem:[%s7697_s13 + $0x368] sm:$0xff]  ;;  %v6144_v29 = vld [vmem:[%s7697_s13 + $0x3f0] sm:$0xff] }
0x1360   : > { %v3277_v15 = vmul.f32 0.5, %v3276_v28  ;;  %v6136_v28 = vld [vmem:[%s7697_s13 + $0x3b0] sm:$0xff] }
0x1361   : > { %v3289_v35 = vmul.f32 %v6242_v30, %v3284_v54  ;;  %v6143_v54 = vld [vmem:[%s7697_s13 + $0x3e8] sm:$0xff] }
0x1362   : > { %v3278_v7 = vsub.f32 1.5, %v3277_v15  ;;  %v6118_v15 = vld [vmem:[%s7697_s13 + $0x320] sm:$0xff] }
0x1363   : > { %v7327_v39 = vadd.f32 %v6243_v16, %v3289_v35  ;;  %v6142_v35 = vld [vmem:[%s7697_s13 + $0x3e0] sm:$0xff] }
0x1364   : > { %v3279_v33 = vmul.f32 %v6327_v24, %v3278_v7  ;;  %v6126_v7 = vld [vmem:[%s7697_s13 + $0x360] sm:$0xff] }
0x1366   : > { %v3283_v34 = vsel %vm3282_vm2, %v6327_v24, %v3279_v33  ;;  %v6145_v24 = vld [vmem:[%s7697_s13 + $0x3f8] sm:$0xff] }
0x1367   : > { %v3285_v37 = vmul.f32 %v3283_v34, %v7211_v12  ;;  %v6105_v12 = vld [vmem:[%s7697_s13 + $0x2b8] sm:$0xff] }
0x1368   : > { %v6117_v33 = vld [vmem:[%s7697_s13 + $0x318] sm:$0xff] }
0x1369   : > { %v3290_v38 = vmul.f32 %v6242_v30, %v3285_v37  ;;  %v6135_v30 = vld [vmem:[%s7697_s13 + $0x3a8] sm:$0xff]  ;;  %v6125_v34 = vld [vmem:[%s7697_s13 + $0x358] sm:$0xff]  ;;  %v6116_v37 = vld [vmem:[%s7697_s13 + $0x310] sm:$0xff] }
0x136b   : > { %v7329_v57 = vadd.f32 %v6243_v16, %v3290_v38  ;;  %v6134_v16 = vld [vmem:[%s7697_s13 + $0x3a0] sm:$0xff]  ;;  %v6124_v38 = vld [vmem:[%s7697_s13 + $0x350] sm:$0xff] }
0x136d   : > { %v3296_v27 = vpack.c.bf16 %v7329_v57, %v7327_v39 }
0x136f   : > { %5440 = vmatmul.msk.bf16.vlgmr.msrb.gmra.mxu0 %vm1201_vm11, %v3296_v27  ;;  %5441 = vmatmul.msk.bf16.vlgmr.msrb.gmra.mxu1 %vm1201_vm11, %v3296_v27 }
0x1370   : > { %5442 = vmatmul.msk.bf16.vlgmr.msra.gmra.mxu2 %vm1201_vm11, %v3296_v27  ;;  %5443 = vmatmul.msk.bf16.vlgmr.msra.gmra.mxu3 %vm1201_vm11, %v3296_v27 }
0x1371   : > { %4070 = vmatpush.bf16.msrb.mxu0 %v6089_v9  ;;  %4084 = vmatpush.bf16.msrb.mxu1 %v6097_v42  ;;  %v6141_v9 = vld [vmem:[%s7697_s13 + $0x3d8] sm:$0xff]  ;;  %v6115_v42 = vld [vmem:[%s7697_s13 + $0x308] sm:$0xff] }
0x1372   : > { %4098 = vmatpush.bf16.msra.mxu2 %v6105_v12  ;;  %4112 = vmatpush.bf16.msra.mxu3 %v6113_v46  ;;  %v6123_v12 = vld [vmem:[%s7697_s13 + $0x348] sm:$0xff]  ;;  %v6132_v46 = vld [vmem:[%s7697_s13 + $0x390] sm:$0xff] }
0x1375   : > { %4071 = vmatpush.bf16.msrb.mxu0 %v6088_v47  ;;  %4085 = vmatpush.bf16.msrb.mxu1 %v6096_v45  ;;  %v6140_v47 = vld [vmem:[%s7697_s13 + $0x3d0] sm:$0xff]  ;;  %v6114_v45 = vld [vmem:[%s7697_s13 + $0x300] sm:$0xff] }
0x1376   : > { %4099 = vmatpush.bf16.msra.mxu2 %v6104_v49  ;;  %4113 = vmatpush.bf16.msra.mxu3 %v6112_v50  ;;  %v6122_v49 = vld [vmem:[%s7697_s13 + $0x340] sm:$0xff]  ;;  %v6131_v50 = vld [vmem:[%s7697_s13 + $0x388] sm:$0xff] }
0x1379   : > { %4072 = vmatpush.bf16.msrb.mxu0 %v6087_v51  ;;  %4086 = vmatpush.bf16.msrb.mxu1 %v6095_v53  ;;  %v6139_v51 = vld [vmem:[%s7697_s13 + $0x3c8] sm:$0xff] }
0x137a   : > { %4100 = vmatpush.bf16.msra.mxu2 %v6103_v55  ;;  %4114 = vmatpush.bf16.msra.mxu3 %v6111_v56  ;;  %v7530_v53 = vld [vmem:[%s7696_s12 + $0x8] sm:$0xff] }
0x137d   : > { %4073 = vmatpush.bf16.msrb.mxu0 %v6086_v58  ;;  %4087 = vmatpush.bf16.msrb.mxu1 %v6094_v59  ;;  %v6130_v58 = vld [vmem:[%s7697_s13 + $0x380] sm:$0xff] }
0x137e   : > { %4101 = vmatpush.bf16.msra.mxu2 %v6102_v60  ;;  %4115 = vmatpush.bf16.msra.mxu3 %v6110_v61  ;;  %v6138_v59 = vld [vmem:[%s7697_s13 + $0x3c0] sm:$0xff]  ;;  %v3317_v60 = vperm.slane %v7530_v53, 0  ;;  %v3318_v61 = vperm.slane %v7530_v53, 1 }
0x137f   : > { %5444 = vmatmul.msk.bf16.vlgmr.msra.gmra.mxu0 %vm1201_vm11, %v3296_v27  ;;  %5445 = vmatmul.msk.bf16.vlgmr.msra.gmra.mxu1 %vm1201_vm11, %v3296_v27 }
0x1380   : > { %5446 = vmatmul.msk.bf16.vlgmr.msrb.gmra.mxu2 %vm1201_vm11, %v3296_v27  ;;  %5447 = vmatmul.msk.bf16.vlgmr.msrb.gmra.mxu3 %vm1201_vm11, %v3296_v27  ;;  %v6133_v27 = vld [vmem:[%s7697_s13 + $0x398] sm:$0xff] }
0x1381   : > { %4074 = vmatpush.bf16.msrb.mxu0 %v6085_v62  ;;  %4088 = vmatpush.bf16.msrb.mxu1 %v6093_v63 }
0x1382   : > { %4102 = vmatpush.bf16.msra.mxu2 %v6101_v0  ;;  %4116 = vmatpush.bf16.msra.mxu3 %v6109_v1 }
0x1385   : > { %4075 = vmatpush.bf16.msrb.mxu0 %v6084_v17  ;;  %4089 = vmatpush.bf16.msrb.mxu1 %v6092_v2 }
0x1386   : > { %4103 = vmatpush.bf16.msra.mxu2 %v6100_v3  ;;  %4117 = vmatpush.bf16.msra.mxu3 %v6108_v4 }
0x1389   : > { %4076 = vmatpush.bf16.msrb.mxu0 %v6083_v8  ;;  %4090 = vmatpush.bf16.msrb.mxu1 %v6091_v5  ;;  %v3319_v8 = vperm.slane %v7530_v53, 2  ;;  %v3320_v5 = vperm.slane %v7530_v53, 3 }
0x138a   : > { %4104 = vmatpush.bf16.msra.mxu2 %v6099_v13  ;;  %4118 = vmatpush.bf16.msra.mxu3 %v6107_v18 }
0x138d   : > { %4077 = vmatpush.bf16.msrb.mxu0 %v6082_v48  ;;  %4091 = vmatpush.bf16.msrb.mxu1 %v6090_v10 }
0x138e   : > { %4105 = vmatpush.bf16.msra.mxu2 %v6098_v21  ;;  %4119 = vmatpush.bf16.msra.mxu3 %v6106_v22 }
0x1391   : > { %4126 = vmatpush.bf16.msra.mxu0 %v6121_v11  ;;  %4140 = vmatpush.bf16.msra.mxu1 %v6129_v6 }
0x1392   : > { %4154 = vmatpush.bf16.msrb.mxu2 %v6137_v23  ;;  %4168 = vmatpush.bf16.msrb.mxu3 %v6145_v24 }
0x1395   : > { %4127 = vmatpush.bf16.msra.mxu0 %v6120_v52  ;;  %4141 = vmatpush.bf16.msra.mxu1 %v6128_v14 }
0x1396   : > { %4155 = vmatpush.bf16.msrb.mxu2 %v6136_v28  ;;  %4169 = vmatpush.bf16.msrb.mxu3 %v6144_v29 }
0x1399   : > { %4128 = vmatpush.bf16.msra.mxu0 %v6119_v25  ;;  %4142 = vmatpush.bf16.msra.mxu1 %v6127_v26 }
0x139a   : > { %4156 = vmatpush.bf16.msrb.mxu2 %v6135_v30  ;;  %4170 = vmatpush.bf16.msrb.mxu3 %v6143_v54  ;;  %v3321_v30 = vperm.slane %v7530_v53, 4  ;;  %v3322_v54 = vperm.slane %v7530_v53, 5 }
0x139d   : > { %4129 = vmatpush.bf16.msra.mxu0 %v6118_v15  ;;  %4143 = vmatpush.bf16.msra.mxu1 %v6126_v7 }
0x139e   : > { %4157 = vmatpush.bf16.msrb.mxu2 %v6134_v16  ;;  %4171 = vmatpush.bf16.msrb.mxu3 %v6142_v35 }
0x13a1   : > { %4130 = vmatpush.bf16.msra.mxu0 %v6117_v33  ;;  %4144 = vmatpush.bf16.msra.mxu1 %v6125_v34 }
0x13a2   : > { %4158 = vmatpush.bf16.msrb.mxu2 %v6133_v27  ;;  %4172 = vmatpush.bf16.msrb.mxu3 %v6141_v9 }
0x13a5   : > { %4131 = vmatpush.bf16.msra.mxu0 %v6116_v37  ;;  %4145 = vmatpush.bf16.msra.mxu1 %v6124_v38 }
0x13a6   : > { %4159 = vmatpush.bf16.msrb.mxu2 %v6132_v46  ;;  %4173 = vmatpush.bf16.msrb.mxu3 %v6140_v47  ;;  %v3323_v46 = vperm.slane %v7530_v53, 6  ;;  %v3324_v47 = vperm.slane %v7530_v53, 7 }
0x13a9   : > { %4132 = vmatpush.bf16.msra.mxu0 %v6115_v42  ;;  %4146 = vmatpush.bf16.msra.mxu1 %v6123_v12 }
0x13aa   : > { %4160 = vmatpush.bf16.msrb.mxu2 %v6131_v50  ;;  %4174 = vmatpush.bf16.msrb.mxu3 %v6139_v51 }
0x13ad   : > { %4133 = vmatpush.bf16.msra.mxu0 %v6114_v45  ;;  %4147 = vmatpush.bf16.msra.mxu1 %v6122_v49 }
0x13ae   : > { %4161 = vmatpush.bf16.msrb.mxu2 %v6130_v58  ;;  %4175 = vmatpush.bf16.msrb.mxu3 %v6138_v59 }
0x13ec   : > { %v3425_v55 = vpop.f32.mrf.mxu0  ;;  %v3439_v56 = vpop.f32.mrf.mxu1 }
0x13ed   : > { %v3426_v62 = vadd.f32 %v3425_v55, %v3317_v60  ;;  %v3440_v63 = vadd.f32 %v3439_v56, %v3318_v61 }
0x13ef   : > { %v3528_v48 = vmax.f32 %v3426_v62, 0.0  ;;  %v3529_v10 = vmax.f32 %v3440_v63, 0.0 }
0x13f3   : > { %v3453_v0 = vpop.f32.mrf.mxu2  ;;  %v3467_v1 = vpop.f32.mrf.mxu3 }
0x13f4   : > { %v3427_v17 = vpop.f32.mrf.mxu0  ;;  %v3441_v2 = vpop.f32.mrf.mxu1  ;;  %v3454_v52 = vadd.f32 %v3453_v0, %v3319_v8  ;;  %v3468_v14 = vadd.f32 %v3467_v1, %v3320_v5 }
0x13f5   : > { %v3428_v3 = vadd.f32 %v3427_v17, %v3317_v60  ;;  %v3442_v4 = vadd.f32 %v3441_v2, %v3318_v61 }
0x13f6   : > { %v3530_v28 = vmax.f32 %v3454_v52, 0.0  ;;  %v3531_v29 = vmax.f32 %v3468_v14, 0.0 }
0x13f7   : > { %v3536_v11 = vmax.f32 %v3428_v3, 0.0  ;;  %v3537_v6 = vmax.f32 %v3442_v4, 0.0 }
0x13f9   : > { %v3544_v13 = vpack.c.bf16 %v3536_v11, %v3528_v48  ;;  %v3545_v18 = vpack.c.bf16 %v3537_v6, %v3529_v10 }
0x13fb   : > { %v3455_v21 = vpop.f32.mrf.mxu2  ;;  %v3469_v22 = vpop.f32.mrf.mxu3  ;;  %4078 = vmatmul.bf16.vlgmr.msrb.gmra.mxu0 %v3544_v13  ;;  %4092 = vmatmul.bf16.vlgmr.msrb.gmra.mxu1 %v3545_v18 }
0x13fc   : > { %v3456_v23 = vadd.f32 %v3455_v21, %v3319_v8  ;;  %v3470_v24 = vadd.f32 %v3469_v22, %v3320_v5  ;;  %v3481_v25 = vpop.f32.mrf.mxu0  ;;  %v3495_v26 = vpop.f32.mrf.mxu1  ;;  %v6244_v5 = vld [vmem:[%s7698_s14 + $0x1] ss:$0 sm:$0xff] }
0x13fd   : > { %v3482_v16 = vadd.f32 %v3481_v25, %v3321_v30  ;;  %v3496_v35 = vadd.f32 %v3495_v26, %v3322_v54 }
0x13fe   : > { %v3538_v15 = vmax.f32 %v3456_v23, 0.0  ;;  %v3539_v7 = vmax.f32 %v3470_v24, 0.0 }
0x13ff   : > { %v3532_v45 = vmax.f32 %v3482_v16, 0.0  ;;  %v3533_v49 = vmax.f32 %v3496_v35, 0.0 }
0x1400   : > { %v3546_v33 = vpack.c.bf16 %v3538_v15, %v3530_v28  ;;  %v3547_v34 = vpack.c.bf16 %v3539_v7, %v3531_v29 }
0x1402   : > { %4106 = vmatmul.bf16.vlgmr.msra.gmra.mxu2 %v3546_v33  ;;  %4120 = vmatmul.bf16.vlgmr.msra.gmra.mxu3 %v3547_v34 }
0x1403   : > { %v3509_v37 = vpop.f32.mrf.mxu2  ;;  %v3523_v38 = vpop.f32.mrf.mxu3 }
0x1404   : > { %v3483_v27 = vpop.f32.mrf.mxu0  ;;  %v3497_v9 = vpop.f32.mrf.mxu1  ;;  %v3510_v58 = vadd.f32 %v3509_v37, %v3323_v46  ;;  %v3524_v59 = vadd.f32 %v3523_v38, %v3324_v47 }
0x1405   : > { %v3484_v42 = vadd.f32 %v3483_v27, %v3321_v30  ;;  %v3498_v12 = vadd.f32 %v3497_v9, %v3322_v54 }
0x1406   : > { %v3534_v0 = vmax.f32 %v3510_v58, 0.0  ;;  %v3535_v1 = vmax.f32 %v3524_v59, 0.0 }
0x1407   : > { %v3540_v50 = vmax.f32 %v3484_v42, 0.0  ;;  %v3541_v51 = vmax.f32 %v3498_v12, 0.0 }
0x1409   : > { %v3548_v55 = vpack.c.bf16 %v3540_v50, %v3532_v45  ;;  %v3549_v56 = vpack.c.bf16 %v3541_v51, %v3533_v49 }
0x140b   : > { %v3511_v60 = vpop.f32.mrf.mxu2  ;;  %v3525_v61 = vpop.f32.mrf.mxu3  ;;  %4134 = vmatmul.bf16.vlgmr.msra.gmra.mxu0 %v3548_v55  ;;  %4148 = vmatmul.bf16.vlgmr.msra.gmra.mxu1 %v3549_v56 }
0x140c   : > { %v3512_v62 = vadd.f32 %v3511_v60, %v3323_v46  ;;  %v3526_v63 = vadd.f32 %v3525_v61, %v3324_v47 }
0x140e   : > { %v3542_v17 = vmax.f32 %v3512_v62, 0.0  ;;  %v3543_v2 = vmax.f32 %v3526_v63, 0.0  ;;  %v6147_v63 = vld [vmem:[%s7701_s17 + $0x28] sm:$0xff] }
0x140f   : > { %4322 = vmatpush.bf16.msra.mxu2 %v6147_v63  ;;  %v6160_v63 = vld [vmem:[%s7704_s20 + $0x10] sm:$0xff] }
0x1410   : > { %v3550_v3 = vpack.c.bf16 %v3542_v17, %v3534_v0  ;;  %v3551_v53 = vpack.c.bf16 %v3543_v2, %v3535_v1  ;;  %v6151_v0 = vld [vmem:[%s7701_s17 + $0x18] sm:$0xff]  ;;  %v6148_v2 = vld [vmem:[%s7701_s17] sm:$0xff] }
0x1411   : > { %4353 = vmatpush.bf16.msra.mxu3 %v6151_v0 }
0x1412   : > { %4162 = vmatmul.bf16.vlgmr.msrb.gmra.mxu2 %v3550_v3  ;;  %4176 = vmatmul.bf16.vlgmr.msrb.gmra.mxu3 %v3551_v53  ;;  %v6146_v3 = vld [vmem:[%s7701_s17 + $0x20] sm:$0xff]  ;;  %v6150_v53 = vld [vmem:[%s7701_s17 + $0x10] sm:$0xff] }
0x1413   : > { %4323 = vmatpush.bf16.msra.mxu2 %v6146_v3 }
0x1415   : > { %4354 = vmatpush.bf16.msra.mxu3 %v6150_v53 }
0x1478   : > { %v4079_v4 = vpop.f32.mrf.mxu0  ;;  %v4093_v8 = vpop.f32.mrf.mxu1 }
0x1479   : > { %v4080_v10 = vadd.f32 %v6244_v5, %v4079_v4 }
0x147b   : > { %v4094_v13 = vadd.f32 %v4093_v8, %v4080_v10  ;;  %v6154_v10 = vld [vmem:[%s7701_s17 + $0x40] sm:$0xff] }
0x1480   : > { %v4081_v48 = vpop.f32.mrf.mxu0  ;;  %v4095_v18 = vpop.f32.mrf.mxu1 }
0x1481   : > { %v4082_v14 = vadd.f32 %v6244_v5, %v4081_v48  ;;  %v6155_v5 = vld [vmem:[%s7701_s17 + $0x48] sm:$0xff] }
0x1482   : > { %4465 = vmatpush.bf16.msrb.mxu3 %v6155_v5 }
0x1483   : > { %v4096_v25 = vadd.f32 %v4095_v18, %v4082_v14 }
0x1485   : > { %v4107_v11 = vpop.f32.mrf.mxu2  ;;  %v4121_v6 = vpop.f32.mrf.mxu3 }
0x1486   : > { %v4108_v52 = vadd.f32 %v4107_v11, %v4094_v13  ;;  %4466 = vmatpush.bf16.msrb.mxu3 %v6154_v10 }
0x1488   : > { %v4135_v21 = vpop.f32.mrf.mxu0  ;;  %v4122_v22 = vadd.f32 %v4121_v6, %v4108_v52  ;;  %v4149_v29 = vpop.f32.mrf.mxu1 }
0x148a   : > { %v4136_v26 = vadd.f32 %v4135_v21, %v4122_v22 }
0x148c   : > { %v4150_v15 = vadd.f32 %v4149_v29, %v4136_v26 }
0x148d   : > { %v4109_v23 = vpop.f32.mrf.mxu2  ;;  %v4123_v24 = vpop.f32.mrf.mxu3 }
0x148e   : > { %v4110_v28 = vadd.f32 %v4109_v23, %v4096_v25 }
0x1490   : > { %v4124_v7 = vadd.f32 %v4123_v24, %v4110_v28  ;;  %v4137_v30 = vpop.f32.mrf.mxu0  ;;  %v4151_v38 = vpop.f32.mrf.mxu1  ;;  %v6245_v28 = vld [vmem:[%s7699_s15 + $0x1] ss:$0 sm:$0xff] }
0x1492   : > { %v4138_v16 = vadd.f32 %v4137_v30, %v4124_v7  ;;  %v6246_v30 = vld [vmem:[%s7700_s16 + $0x1] ss:$0 sm:$0xff] }
0x1494   : > { %v4152_v27 = vadd.f32 %v4151_v38, %v4138_v16 }
0x1495   : > { %v4163_v54 = vpop.f32.mrf.mxu2  ;;  %v4177_v33 = vpop.f32.mrf.mxu3 }
0x1496   : > { %v4164_v34 = vadd.f32 %v4163_v54, %v4150_v15 }
0x1498   : > { %v4178_v35 = vadd.f32 %v4177_v33, %v4164_v34 }
0x149a   : > { %v4182_v37 = vadd.f32 %v4178_v35, %v7327_v39 }
0x149c   : > { %v4188_v9 = vsel %vm1201_vm11, %v4182_v37, 0.0 }
0x149d   : > { %v4165_v42 = vpop.f32.mrf.mxu2  ;;  %4189 = vadd.xlane.f32.xlu2 %v4188_v9  ;;  %v4179_v46 = vpop.f32.mrf.mxu3 }
0x149e   : > { %v4166_v12 = vadd.f32 %v4165_v42, %v4152_v27  ;;  %v6153_v42 = vld [vmem:[%s7701_s17 + $0x38] sm:$0xff] }
0x14a0   : > { %v4180_v47 = vadd.f32 %v4179_v46, %v4166_v12  ;;  %v6152_v12 = vld [vmem:[%s7701_s17 + $0x30] sm:$0xff] }
0x14a2   : > { %v4183_v45 = vadd.f32 %v4180_v47, %v7329_v57  ;;  %v6149_v57 = vld [vmem:[%s7701_s17 + $0x8] sm:$0xff] }
0x14a3   : > { %4273 = vmatpush.bf16.msrb.mxu0 %v6149_v57  ;;  %v6156_v57 = vld [vmem:[%s7704_s20 + $0x20] sm:$0xff] }
0x14a4   : > { %v4191_v49 = vsel %vm1201_vm11, %v4183_v45, 0.0 }
0x14a5   : > { %4192 = vadd.xlane.f32.xlu2 %v4191_v49 }
0x14a7   : > { %4274 = vmatpush.bf16.msrb.mxu0 %v6148_v2  ;;  %v6164_v2 = vld [vmem:[%s7704_s20 + $0x40] sm:$0xff] }
0x1510   : > { %v4190_v50 = vpop.xlane.xlu2 %4189 }
0x1511   : > { %v4194_v51 = vmul.f32 %v4190_v50, %v6728_v44 }
0x1513   : > { %v4196_v55 = vsub.f32 %v4182_v37, %v4194_v51 }
0x1515   : > { %v4198_v56 = vmul.f32 %v4196_v55, %v4196_v55 }
0x1517   : > { %v4200_v39 = vsel %vm1201_vm11, %v4198_v56, 0.0 }
0x1518   : > { %4201 = vadd.xlane.f32.xlu2 %v4200_v39  ;;  %v4193_v58 = vpop.xlane.xlu2 %4192 }
0x1519   : > { %v4195_v59 = vmul.f32 %v4193_v58, %v6728_v44  ;;  %v6159_v58 = vld [vmem:[%s7704_s20 + $0x8] sm:$0xff] }
0x151b   : > { %v4197_v60 = vsub.f32 %v4183_v45, %v4195_v59  ;;  %v6157_v59 = vld [vmem:[%s7704_s20 + $0x28] sm:$0xff] }
0x151d   : > { %v4199_v61 = vmul.f32 %v4197_v60, %v4197_v60 }
0x151f   : > { %v4203_v62 = vsel %vm1201_vm11, %v4199_v61, 0.0 }
0x1520   : > { %4204 = vadd.xlane.f32.xlu0 %v4203_v62  ;;  %v6158_v62 = vld [vmem:[%s7704_s20] sm:$0xff] }
0x158b   : > { %v4202_v1 = vpop.xlane.xlu2 %4201 }
0x158c   : > { %v4206_v17 = vmul.f32 %v4202_v1, %v6728_v44  ;;  %v6165_v1 = vld [vmem:[%s7704_s20 + $0x48] sm:$0xff] }
0x158e   : > { %v4208_v4 = vadd.f32 1e-05, %v4206_v17 }
0x1590   : > { %6328 = vrsqrt.f32 %v4208_v4  ;;  %vm4216_vm5 = vweird.f32 %v4208_v4 }
0x1593   : > { %v4205_v8 = vpop.xlane.xlu0 %4204 }
0x1594   : > { %v4207_v48 = vmul.f32 %v4205_v8, %v6728_v44 }
0x1596   : > { %v6329_v11 = vpop.eup %6328  ;;  %v4209_v6 = vadd.f32 1e-05, %v4207_v48  ;;  %v6247_v48 = vld [vmem:[%s7702_s18] ss:$0 sm:$0xff] }
0x1597   : > { %v4211_v13 = vmul.f32 %v6329_v11, %v4208_v4  ;;  %vm4217_vm3 = vweird.f32 %v6329_v11 }
0x1598   : > { %6330 = vrsqrt.f32 %v4209_v6  ;;  %vm4218_vm6 = vmor %vm4216_vm5, %vm4217_vm3  ;;  %vm4226_vm8 = vweird.f32 %v4209_v6 }
0x1599   : > { %v4212_v18 = vmul.f32 %v6329_v11, %v4211_v13  ;;  %v6248_v13 = vld [vmem:[%s7703_s19] ss:$0 sm:$0xff] }
0x159b   : > { %v4213_v52 = vmul.f32 0.5, %v4212_v18 }
0x159d   : > { %v4214_v14 = vsub.f32 1.5, %v4213_v52 }
0x159e   : > { %v6331_v21 = vpop.eup %6330 }
0x159f   : > { %v4215_v22 = vmul.f32 %v6329_v11, %v4214_v14  ;;  %v4221_v23 = vmul.f32 %v6331_v21, %v4209_v6  ;;  %vm4227_vm7 = vweird.f32 %v6331_v21 }
0x15a0   : > { %vm4228_vm9 = vmor %vm4226_vm8, %vm4227_vm7 }
0x15a1   : > { %v4222_v24 = vmul.f32 %v6331_v21, %v4221_v23  ;;  %v4219_v44 = vsel %vm4218_vm6, %v6329_v11, %v4215_v22 }
0x15a2   : > { %v4230_v29 = vmul.f32 %v4219_v44, %v4196_v55 }
0x15a3   : > { %v4223_v25 = vmul.f32 0.5, %v4222_v24 }
0x15a4   : > { %v4235_v54 = vmul.f32 %v6245_v28, %v4230_v29 }
0x15a5   : > { %v4224_v26 = vsub.f32 1.5, %v4223_v25 }
0x15a6   : > { %v4240_v16 = vadd.f32 %v6246_v30, %v4235_v54  ;;  %v6162_v54 = vld [vmem:[%s7704_s20 + $0x30] sm:$0xff] }
0x15a7   : > { %v4225_v15 = vmul.f32 %v6331_v21, %v4224_v26 }
0x15a9   : > { %v4229_v7 = vsel %vm4228_vm9, %v6331_v21, %v4225_v15 }
0x15aa   : > { %v4231_v33 = vmul.f32 %v4229_v7, %v4197_v60  ;;  %v6161_v60 = vld [vmem:[%s7704_s20 + $0x18] sm:$0xff] }
0x15ac   : > { %v4236_v34 = vmul.f32 %v6245_v28, %v4231_v33 }
0x15ae   : > { %v4241_v35 = vadd.f32 %v6246_v30, %v4236_v34  ;;  %v6163_v30 = vld [vmem:[%s7704_s20 + $0x38] sm:$0xff] }
0x15b0   : > { %v4242_v37 = vpack.c.bf16 %v4241_v35, %v4240_v16 }
0x15b2   : > { %5847 = vmatmul.msk.bf16.vlgmr.msrb.gmra.mxu0 %vm1201_vm11, %v4242_v37  ;;  %5858 = vmatmul.msk.bf16.vlgmr.msra.gmra.mxu2 %vm1201_vm11, %v4242_v37 }
0x15b3   : > { %5871 = vmatmul.msk.bf16.vlgmr.msra.gmra.mxu3 %vm1201_vm11, %v4242_v37 }
0x15b4   : > { %4592 = vmatpush.bf16.msra.mxu3 %v6157_v59 }
0x15b8   : > { %4593 = vmatpush.bf16.msra.mxu3 %v6156_v57 }
0x15c3   : > { %5901 = vmatmul.msk.bf16.vlgmr.msrb.gmra.mxu3 %vm1201_vm11, %v4242_v37 }
0x162f   : > { %v4276_v38 = vpop.f32.mrf.mxu0 }
0x1635   : > { %v4325_v39 = vpop.f32.mrf.mxu2 }
0x1636   : > { %v4356_v27 = vpop.f32.mrf.mxu3 }
0x1637   : > { %v4278_v9 = vpop.f32.mrf.mxu0 }
0x1638   : > { %4295 = vmatpush.msrb.mxu1 %v4278_v9 }
0x163a   : > { %4296 = vmatpush.msrb.mxu1 %v4276_v38 }
0x163b   : > { %5848 = vmatmul.msk.f32.vlgmr.msrb.gmra.mxu1 %vm753_vm4, %v6524_v20 }
0x163c   : > { %4409 = vmatpush.bf16.msra.mxu1 %v6153_v42 }
0x163d   : > { %v4327_v0 = vpop.f32.mrf.mxu2 }
0x163e   : > { %v4358_v46 = vpop.f32.mrf.mxu3 }
0x163f   : > { %4375 = vmatpush.msra.mxu0 %v4358_v46 }
0x1640   : > { %4410 = vmatpush.bf16.msra.mxu1 %v6152_v12  ;;  %v6249_v12 = vld [vmem:[%s7705_s21] ss:$0 sm:$0xff] }
0x1641   : > { %4376 = vmatpush.msra.mxu0 %v4356_v27 }
0x1642   : > { %5872 = vmatmul.msk.f32.vlgmr.msra.gmra.mxu0 %vm753_vm4, %v6539_v31 }
0x1643   : > { %5849 = vmatmul.msk.f32.gmra.mxu1 %vm753_vm4, %v6522_v19 }
0x1644   : > { %4543 = vmatpush.bf16.msrb.mxu1 %v6159_v58 }
0x1646   : > { %v4468_v47 = vpop.f32.mrf.mxu3 }
0x1648   : > { %4544 = vmatpush.bf16.msrb.mxu1 %v6158_v62 }
0x164a   : > { %5873 = vmatmul.msk.f32.gmra.mxu0 %vm753_vm4, %v6541_v32 }
0x164b   : > { %5886 = vmatmul.msk.bf16.vlgmr.msra.gmra.mxu1 %vm1201_vm11, %v4242_v37 }
0x164e   : > { %v4470_v45 = vpop.f32.mrf.mxu3 }
0x164f   : > { %4487 = vmatpush.msrb.mxu0 %v4470_v45 }
0x1651   : > { %4488 = vmatpush.msrb.mxu0 %v4468_v47 }
0x1652   : > { %5902 = vmatmul.msk.f32.vlgmr.msrb.gmra.mxu0 %vm753_vm4, %v6557_v41 }
0x1653   : > { %4623 = vmatpush.bf16.msra.mxu0 %v6161_v60 }
0x1657   : > { %4624 = vmatpush.bf16.msra.mxu0 %v6160_v63 }
0x165a   : > { %5903 = vmatmul.msk.f32.gmra.mxu0 %vm753_vm4, %v6565_v43 }
0x165b   : > { %4735 = vmatpush.bf16.msrb.mxu0 %v6165_v1 }
0x165f   : > { %4736 = vmatpush.bf16.msrb.mxu0 %v6164_v2 }
0x16b8   : > { %v4298_v49 = vpop.f32.mrf.mxu1 }
0x16b9   : > { %v4326_v17 = vadd.f32 %v4325_v39, %v4298_v49 }
0x16bf   : > { %v4378_v56 = vpop.f32.mrf.mxu0 }
0x16c0   : > { %v4301_v50 = vpop.f32.mrf.mxu1  ;;  %v4384_v53 = vadd.f32 %v4378_v56, %v4326_v17 }
0x16c1   : > { %v4328_v10 = vadd.f32 %v4327_v0, %v4301_v50 }
0x16c7   : > { %v4381_v61 = vpop.f32.mrf.mxu0 }
0x16c8   : > { %v4412_v51 = vpop.f32.mrf.mxu1  ;;  %v4385_v11 = vadd.f32 %v4381_v61, %v4328_v10 }
0x16cf   : > { %v4490_v3 = vpop.f32.mrf.mxu0 }
0x16d0   : > { %v4414_v55 = vpop.f32.mrf.mxu1 }
0x16d1   : > { %4431 = vmatpush.msrb.mxu2 %v4414_v55 }
0x16d3   : > { %4432 = vmatpush.msrb.mxu2 %v4412_v51 }
0x16d4   : > { %5887 = vmatmul.msk.f32.vlgmr.msrb.gmra.mxu2 %vm753_vm4, %v6548_v36 }
0x16d7   : > { %v4493_v52 = vpop.f32.mrf.mxu0 }
0x16dc   : > { %5888 = vmatmul.msk.f32.gmra.mxu2 %vm753_vm4, %v6555_v40 }
0x1757   : > { %v4434_v4 = vpop.f32.mrf.mxu2 }
0x1758   : > { %v4440_v8 = vadd.f32 %v4434_v4, %v4384_v53 }
0x175a   : > { %v4496_v5 = vadd.f32 %v4490_v3, %v4440_v8 }
0x175c   : > { %v4502_v6 = vmul.f32 %v6247_v48, %v4496_v5 }
0x175e   : > { %v4508_v22 = vadd.f32 %v6248_v13, %v4502_v6 }
0x175f   : > { %v4437_v18 = vpop.f32.mrf.mxu2 }
0x1760   : > { %v4441_v14 = vadd.f32 %v4437_v18, %v4385_v11  ;;  %6332 = vtanh.f32 %v4508_v22 }
0x1762   : > { %v4497_v21 = vadd.f32 %v4493_v52, %v4441_v14 }
0x1764   : > { %v4503_v23 = vmul.f32 %v6247_v48, %v4497_v21 }
0x1766   : > { %v4509_v24 = vadd.f32 %v6248_v13, %v4503_v23  ;;  %v6333_v44 = vpop.eup %6332 }
0x1768   : > { %6334 = vtanh.f32 %v4509_v24 }
0x176e   : > { %v6335_v25 = vpop.eup %6334 }
0x176f   : > { %v4512_v26 = vpack.c.bf16 %v6335_v25, %v6333_v44 }
0x1771   : > { %5916 = vmatmul.msk.bf16.vlgmr.msrb.gmra.mxu1 %vm1201_vm11, %v4512_v26  ;;  %5927 = vmatmul.msk.bf16.vlgmr.msra.gmra.mxu3 %vm1201_vm11, %v4512_v26 }
0x1772   : > { %5940 = vmatmul.msk.bf16.vlgmr.msra.gmra.mxu0 %vm1201_vm11, %v4512_v26 }
0x1782   : > { %5970 = vmatmul.msk.bf16.vlgmr.msrb.gmra.mxu0 %vm1201_vm11, %v4512_v26 }
0x17ee   : > { %v4546_v28 = vpop.f32.mrf.mxu1 }
0x17ef   : > { %v4626_v29 = vpop.f32.mrf.mxu0 }
0x17f6   : > { %v4548_v15 = vpop.f32.mrf.mxu1 }
0x17f7   : > { %v4628_v7 = vpop.f32.mrf.mxu0  ;;  %4565 = vmatpush.msra.mxu2 %v4548_v15 }
0x17f8   : > { %4645 = vmatpush.msra.mxu1 %v4628_v7 }
0x17f9   : > { %4566 = vmatpush.msra.mxu2 %v4546_v28 }
0x17fa   : > { %4646 = vmatpush.msra.mxu1 %v4626_v29  ;;  %5917 = vmatmul.msk.f32.vlgmr.msra.gmra.mxu2 %vm753_vm4, %v6524_v20 }
0x17fb   : > { %5941 = vmatmul.msk.f32.vlgmr.msra.gmra.mxu1 %vm753_vm4, %v6539_v31  ;;  %4679 = vmatpush.bf16.msrb.mxu2 %v6163_v30 }
0x17ff   : > { %v4738_v33 = vpop.f32.mrf.mxu0  ;;  %4680 = vmatpush.bf16.msrb.mxu2 %v6162_v54 }
0x1802   : > { %5918 = vmatmul.msk.f32.gmra.mxu2 %vm753_vm4, %v6522_v19 }
0x1803   : > { %5942 = vmatmul.msk.f32.gmra.mxu1 %vm753_vm4, %v6541_v32  ;;  %v4595_v32 = vpop.f32.mrf.mxu3 }
0x1807   : > { %v4740_v34 = vpop.f32.mrf.mxu0 }
0x1808   : > { %4757 = vmatpush.msrb.mxu1 %v4740_v34 }
0x180a   : > { %4758 = vmatpush.msrb.mxu1 %v4738_v33  ;;  %5955 = vmatmul.msk.bf16.vlgmr.msrb.gmra.mxu2 %vm1201_vm11, %v4512_v26 }
0x180b   : > { %5971 = vmatmul.msk.f32.vlgmr.msrb.gmra.mxu1 %vm753_vm4, %v6557_v41  ;;  %v4597_v38 = vpop.f32.mrf.mxu3 }
0x1813   : > { %5972 = vmatmul.msk.f32.gmra.mxu1 %vm753_vm4, %v6565_v43 }
0x1878   : > { %v4648_v19 = vpop.f32.mrf.mxu1 }
0x187d   : > { %v4568_v20 = vpop.f32.mrf.mxu2 }
0x187e   : > { %v4596_v41 = vadd.f32 %v4595_v32, %v4568_v20 }
0x1880   : > { %v4651_v37 = vpop.f32.mrf.mxu1  ;;  %v4654_v9 = vadd.f32 %v4648_v19, %v4596_v41 }
0x1885   : > { %v4571_v31 = vpop.f32.mrf.mxu2 }
0x1886   : > { %v4598_v46 = vadd.f32 %v4597_v38, %v4571_v31 }
0x1888   : > { %v4760_v27 = vpop.f32.mrf.mxu1 }
0x188d   : > { %v4682_v16 = vpop.f32.mrf.mxu2 }
0x1895   : > { %v4684_v35 = vpop.f32.mrf.mxu2 }
0x1896   : > { %4701 = vmatpush.msrb.mxu3 %v4684_v35 }
0x1898   : > { %4702 = vmatpush.msrb.mxu3 %v4682_v16 }
0x1899   : > { %5956 = vmatmul.msk.f32.vlgmr.msrb.gmra.mxu3 %vm753_vm4, %v6548_v36  ;;  %v4655_v36 = vadd.f32 %v4651_v37, %v4598_v46 }
0x18a1   : > { %5957 = vmatmul.msk.f32.gmra.mxu3 %vm753_vm4, %v6555_v40  ;;  %v4763_v40 = vpop.f32.mrf.mxu1 }
0x191c   : > { %v4704_v43 = vpop.f32.mrf.mxu3 }
0x191d   : > { %v4710_v42 = vadd.f32 %v4704_v43, %v4654_v9 }
0x191f   : > { %v4766_v47 = vadd.f32 %v4760_v27, %v4710_v42 }
0x1921   : > { %v4772_v45 = vadd.f32 %v6249_v12, %v4766_v47 }
0x1923   : > { %v5973_v49 = vmul.f32 -1.442695, %v4772_v45 }
0x1924   : > { %v4707_v50 = vpop.f32.mrf.mxu3 }
0x1925   : > { %6336 = vpow2.f32 %v5973_v49  ;;  %v4711_v51 = vadd.f32 %v4707_v50, %v4655_v36 }
0x1927   : > { %v4767_v55 = vadd.f32 %v4763_v40, %v4711_v51 }
0x1929   : > { %v4773_v56 = vadd.f32 %v6249_v12, %v4767_v55 }
0x192b   : > { %v6337_v39 = vpop.eup %6336  ;;  %v5974_v58 = vmul.f32 -1.442695, %v4773_v56 }
0x192c   : > { %v4780_v59 = vadd.f32 1.0, %v6337_v39 }
0x192d   : > { %6338 = vpow2.f32 %v5974_v58 }
0x192e   : > { %6340 = vrcp.f32 %v4780_v59  ;;  %v4793_v0 = vand.u32 2147483648, %v4780_v59  ;;  %v4791_v17 = vand.u32 2147483647, %v4780_v59  ;;  %vm4787_vm11 = vweird.f32 %v4780_v59 }
0x1930   : > { %v4794_v53 = vor.u32 1.1754944e-38, %v4793_v0  ;;  %vm4792_vm14 = vcmp.eq.f32.partialorder %v4791_v17, 8.507059e+37 }
0x1933   : > { %v6339_v60 = vpop.eup %6338 }
0x1934   : > { %v6341_v61 = vpop.eup %6340  ;;  %v4781_v62 = vadd.f32 1.0, %v6339_v60 }
0x1935   : > { %v4783_v57 = vmul.f32 %v6341_v61, %v4780_v59  ;;  %vm4788_vm4 = vweird.f32 %v6341_v61 }
0x1936   : > { %6342 = vrcp.f32 %v4781_v62  ;;  %vm4789_vm10 = vmor %vm4787_vm11, %vm4788_vm4  ;;  %v4808_v10 = vand.u32 2147483648, %v4781_v62  ;;  %v4806_v6 = vand.u32 2147483647, %v4781_v62  ;;  %vm4802_vm13 = vweird.f32 %v4781_v62 }
0x1937   : > { %v4784_v63 = vsub.f32 1.0, %v4783_v57 }
0x1938   : > { %v4809_v18 = vor.u32 1.1754944e-38, %v4808_v10  ;;  %vm4807_vm0 = vcmp.eq.f32.partialorder %v4806_v6, 8.507059e+37 }
0x1939   : > { %v4785_v1 = vmul.f32 %v6341_v61, %v4784_v63 }
0x193b   : > { %v4786_v2 = vadd.f32 %v6341_v61, %v4785_v1 }
0x193c   : > { %v6343_v3 = vpop.eup %6342 }
0x193d   : > { %v4790_v4 = vsel %vm4789_vm10, %v6341_v61, %v4786_v2  ;;  %v4798_v8 = vmul.f32 %v6343_v3, %v4781_v62  ;;  %vm4803_vm12 = vweird.f32 %v6343_v3 }
0x193e   : > { %v4795_v5 = vsel %vm4792_vm14, %v4794_v53, %v4790_v4  ;;  %vm4804_vm15 = vmor %vm4802_vm13, %vm4803_vm12 }
0x193f   : > { %4812 = vst [vmem:[%s685_s5] sm:$0xff] %v4795_v5  ;;  %v4799_v48 = vsub.f32 1.0, %v4798_v8 }
0x1941   : > { %v4800_v11 = vmul.f32 %v6343_v3, %v4799_v48 }
0x1943   : > { %v4801_v13 = vadd.f32 %v6343_v3, %v4800_v11 }
0x1945   : > { %v4805_v52 = vsel %vm4804_vm15, %v6343_v3, %v4801_v13 }
0x1946   : > { %v4810_v14 = vsel %vm4807_vm0, %v4809_v18, %v4805_v52 }
0x1947   : > { %4813 = vst [vmem:[%s685_s5 + $0x8] sm:$0xff] %v4810_v14 }
0x1948 PF: > { %s32_s3 = sadd.s32 1, %s6350_s3  }
0x1949   : > { %p29_p4 = scmp.ge.s32.totalorder %s32_s3, 4  }
0x194b   :  { %31 = sbr.rel (!%p29_p4) target bundleno = 8 (0x8), region = 166 }

</bundles_post_ra>
